<compile_context>
chip_gen: v5e
topology: v5e:2x2
jax: 0.10.0
libtpu: 0.0.40
codegen_flags: <defaults>
</compile_context>

<pallas_src>
import functools

import jax
import jax.numpy as jnp
import numpy as np
from jax.experimental import pallas as pl
from jax.experimental.pallas import tpu as pltpu

INPUT_SIZE = 5
HIDDEN = 64
NUM_LAYERS = 2
OUTPUT_SIZE = 1


def lstm_fc_kernel(x_ref,                 # (B, S, F)  native batch-first
                   wih1_ref,              # (F, 4H)    gate cols [f,i,o,g]
                   whh1_ref,              # (H, 4H)
                   b1_ref,                # (1, 4H)    b_ih + b_hh, layer 1
                   wih2_ref,              # (H, 4H)
                   whh2_ref,              # (H, 4H)
                   b2_ref,                # (1, 4H)    b_ih + b_hh, layer 2
                   wfc_ref,               # (1, H)     fc weight as a row
                   bfc_ref,               # (1, 1)
                   out_ref,               # (B, 1)
                   *, seq_len, batch):
    H = HIDDEN

    def activations(gates):
        # gate columns are pre-ordered [f, i, o, g]:
        # one sigmoid over 3H columns, one tanh over the last H.
        sig = jax.nn.sigmoid(gates[:, :3 * H])
        f = sig[:, 0 * H:1 * H]
        i = sig[:, 1 * H:2 * H]
        o = sig[:, 2 * H:3 * H]
        g = jnp.tanh(gates[:, 3 * H:])
        return f, i, o, g

    zeros = jnp.zeros((batch, H), jnp.float32)
    h1, c1, h2, c2 = zeros, zeros, zeros, zeros

    # seq_len is small & static -> fully unrolled. Only the recurrent state
    # lives in vregs; weights are re-read from VMEM every step so nothing
    # spills across the serial dependency chain.
    for t in range(seq_len):
        # ---- layer-2 recurrent half: depends only on h2[t-1]; issued at
        #      the top of the step so it overlaps layer-1 work. ------------
        g2_rec = jnp.dot(h2, whh2_ref[...], preferred_element_type=jnp.float32)

        # ---- layer 1 ------------------------------------------------------
        x_t = x_ref[:, t, :]                       # (B, F), static slice
        g1 = (jnp.dot(x_t, wih1_ref[...], preferred_element_type=jnp.float32)
              + jnp.dot(h1, whh1_ref[...], preferred_element_type=jnp.float32)
              + b1_ref[...])
        f1, i1, o1, gg1 = activations(g1)
        c1 = f1 * c1 + i1 * gg1
        h1 = o1 * jnp.tanh(c1)

        # ---- layer 2 (input half; recurrent half already in flight) -------
        g2 = (g2_rec
              + jnp.dot(h1, wih2_ref[...], preferred_element_type=jnp.float32)
              + b2_ref[...])
        f2, i2, o2, gg2 = activations(g2)
        c2 = f2 * c2 + i2 * gg2
        h2 = o2 * jnp.tanh(c2)

    # fc(out[:, -1, :]) == fc(h2 at last step), done on the VPU/XLU.
    out_ref[...] = (jnp.sum(h2 * wfc_ref[...], axis=-1, keepdims=True)
                    + bfc_ref[...])


def prepare_params(params):
    """One-time layout prep for the kernel (NOT per forward call).

    Input `params` are PyTorch-layout (already transposed for x @ W^T) with
    gate order [i, f, g, o]. Output: gate order [f, i, o, g] (sigmoid block
    first, tanh block last, f aligned with c's lanes), fc weight as (1, H).
    """
    wih1_t, whh1_t, b1, wih2_t, whh2_t, b2, wfc_t, bfc = params
    H = HIDDEN

    def reorder(w):  # [..., 4H] PyTorch blocks (i,f,g,o) -> (f,i,o,g)
        i, f, g, o = (w[..., 0 * H:1 * H], w[..., 1 * H:2 * H],
                      w[..., 2 * H:3 * H], w[..., 3 * H:4 * H])
        return jnp.concatenate([f, i, o, g], axis=-1)

    return (reorder(wih1_t), reorder(whh1_t), reorder(b1),
            reorder(wih2_t), reorder(whh2_t), reorder(b2),
            jnp.transpose(wfc_t), bfc)


def lstm_model_forward(x, prepped_params):
    """x: (B, S, F) batch-first float32; prepped_params from prepare_params."""
    B, S, F = x.shape
    assert F == INPUT_SIZE

    vmem = pl.BlockSpec(memory_space=pltpu.MemorySpace.VMEM)
    kernel = functools.partial(lstm_fc_kernel, seq_len=S, batch=B)
    # Whole problem (x + weights + state) is a few hundred KB -> resident in
    # VMEM on v5e/v6e/v7x with no grid / pipelining, and x is passed in its
    # native (B, S, F) layout so the forward is a single kernel launch.
    # TODO(synk): for large batch, add a leading batch grid axis with
    # dimension_semantics=("parallel",) so the second v7x TensorCore is used.
    out = pl.pallas_call(
        kernel,
        out_shape=jax.ShapeDtypeStruct((B, OUTPUT_SIZE), jnp.float32),
        in_specs=[vmem] * (1 + len(prepped_params)),
        out_specs=vmem,
    )(x, *prepped_params)
    return out


def init_params(key):
    """Deterministic init mirroring PyTorch's default uniform(-k, k).

    Gate order along the 4H axis is the PyTorch order [i, f, g, o]; weights
    are stored transposed for x @ W^T, biases folded (b_ih + b_hh).
    """
    k_lstm = 1.0 / np.sqrt(HIDDEN)
    k_fc = 1.0 / np.sqrt(HIDDEN)
    keys = jax.random.split(key, 12)

    def u(k, shape, scale):
        return jax.random.uniform(k, shape, jnp.float32, -scale, scale)

    wih1_t = u(keys[0], (INPUT_SIZE, 4 * HIDDEN), k_lstm)
    whh1_t = u(keys[1], (HIDDEN, 4 * HIDDEN), k_lstm)
    b1 = (u(keys[2], (1, 4 * HIDDEN), k_lstm)
          + u(keys[3], (1, 4 * HIDDEN), k_lstm))
    wih2_t = u(keys[4], (HIDDEN, 4 * HIDDEN), k_lstm)
    whh2_t = u(keys[5], (HIDDEN, 4 * HIDDEN), k_lstm)
    b2 = (u(keys[6], (1, 4 * HIDDEN), k_lstm)
          + u(keys[7], (1, 4 * HIDDEN), k_lstm))
    wfc_t = u(keys[8], (HIDDEN, OUTPUT_SIZE), k_fc)
    bfc = u(keys[9], (1, OUTPUT_SIZE), k_fc)
    return (wih1_t, whh1_t, b1, wih2_t, whh2_t, b2, wfc_t, bfc)


def reference_forward(x, params):
    """Pure-JAX reference of the PyTorch forward (gate order i, f, g, o)."""
    wih1_t, whh1_t, b1, wih2_t, whh2_t, b2, wfc_t, bfc = params
    B = x.shape[0]
    H = HIDDEN

    def cell(x_t, h, c, wih, whh, b):
        gates = x_t @ wih + h @ whh + b
        i = jax.nn.sigmoid(gates[:, 0 * H:1 * H])
        f = jax.nn.sigmoid(gates[:, 1 * H:2 * H])
        g = jnp.tanh(gates[:, 2 * H:3 * H])
        o = jax.nn.sigmoid(gates[:, 3 * H:4 * H])
        c_new = f * c + i * g
        return o * jnp.tanh(c_new), c_new

    def scan_fn(carry, x_t):
        h1, c1, h2, c2 = carry
        h1, c1 = cell(x_t, h1, c1, wih1_t, whh1_t, b1)
        h2, c2 = cell(h1, h2, c2, wih2_t, whh2_t, b2)
        return (h1, c1, h2, c2), None

    zeros = jnp.zeros((B, H), jnp.float32)
    (h1, c1, h2, c2), _ = jax.lax.scan(
        scan_fn, (zeros, zeros, zeros, zeros), jnp.transpose(x, (1, 0, 2)))
    return h2 @ wfc_t + bfc


if __name__ == "__main__":
    key = jax.random.PRNGKey(0)
    k_x, k_p = jax.random.split(key)

    batch, seq = 2, 8
    x = jax.random.normal(k_x, (batch, seq, INPUT_SIZE), jnp.float32)
    params = init_params(k_p)
    prepped = prepare_params(params)   # one-time layout prep

    out = lstm_model_forward(x, prepped)
    out = jax.block_until_ready(out)

    ref = jax.block_until_ready(reference_forward(x, params))
    np.testing.assert_allclose(np.asarray(out), np.asarray(ref),
                               rtol=1e-2, atol=1e-2)

    print("KERNEL_OK")
</pallas_src>

<mosaic_0001>
module attributes {stable_mosaic.version = 11 : i64} {
  func.func @lstm_fc_kernel(%arg0: memref<2x8x5xf32, #tpu.memory_space<vmem>>, %arg1: memref<5x256xf32, #tpu.memory_space<vmem>>, %arg2: memref<64x256xf32, #tpu.memory_space<vmem>>, %arg3: memref<1x256xf32, #tpu.memory_space<vmem>>, %arg4: memref<64x256xf32, #tpu.memory_space<vmem>>, %arg5: memref<64x256xf32, #tpu.memory_space<vmem>>, %arg6: memref<1x256xf32, #tpu.memory_space<vmem>>, %arg7: memref<1x64xf32, #tpu.memory_space<vmem>>, %arg8: memref<1x1xf32, #tpu.memory_space<vmem>>, %arg9: memref<2x1xf32, #tpu.memory_space<vmem>>) attributes {dimension_semantics = [], scalar_prefetch = 0 : i64, scratch_operands = 0 : i64, tpu.core_type = #tpu.core_type<tc>} {
    %cst = arith.constant 0.000000e+00 : f32
    %0 = vector.broadcast %cst : f32 to vector<2x64xf32>
    %c0 = arith.constant 0 : index
    %c0_0 = arith.constant 0 : index
    %1 = vector.load %arg5[%c0, %c0_0] : memref<64x256xf32, #tpu.memory_space<vmem>>, vector<64x256xf32>
    %cst_1 = arith.constant dense<0.000000e+00> : vector<2x256xf32>
    %2 = tpu.matmul %0, %1, %cst_1 {dimension_numbers = #tpu.dot_dimension_numbers<[1], [0], [0], [1], [0, 0, 1, 1], [], []>} : vector<2x64xf32>, vector<64x256xf32>, vector<2x256xf32> -> vector<2x256xf32>
    %c0_2 = arith.constant 0 : index
    %c0_3 = arith.constant 0 : index
    %c0_4 = arith.constant 0 : index
    %3 = vector.load %arg0[%c0_2, %c0_3, %c0_4] : memref<2x8x5xf32, #tpu.memory_space<vmem>>, vector<2x1x5xf32>
    %4 = vector.shape_cast %3 : vector<2x1x5xf32> to vector<2x5xf32>
    %c0_5 = arith.constant 0 : index
    %c0_6 = arith.constant 0 : index
    %5 = vector.load %arg1[%c0_5, %c0_6] : memref<5x256xf32, #tpu.memory_space<vmem>>, vector<5x256xf32>
    %cst_7 = arith.constant dense<0.000000e+00> : vector<2x256xf32>
    %6 = tpu.matmul %4, %5, %cst_7 {dimension_numbers = #tpu.dot_dimension_numbers<[1], [0], [0], [1], [0, 0, 1, 1], [], []>} : vector<2x5xf32>, vector<5x256xf32>, vector<2x256xf32> -> vector<2x256xf32>
    %c0_8 = arith.constant 0 : index
    %c0_9 = arith.constant 0 : index
    %7 = vector.load %arg2[%c0_8, %c0_9] : memref<64x256xf32, #tpu.memory_space<vmem>>, vector<64x256xf32>
    %cst_10 = arith.constant dense<0.000000e+00> : vector<2x256xf32>
    %8 = tpu.matmul %0, %7, %cst_10 {dimension_numbers = #tpu.dot_dimension_numbers<[1], [0], [0], [1], [0, 0, 1, 1], [], []>} : vector<2x64xf32>, vector<64x256xf32>, vector<2x256xf32> -> vector<2x256xf32>
    %9 = arith.addf %6, %8 : vector<2x256xf32>
    %c0_11 = arith.constant 0 : index
    %c0_12 = arith.constant 0 : index
    %10 = vector.load %arg3[%c0_11, %c0_12] : memref<1x256xf32, #tpu.memory_space<vmem>>, vector<1x256xf32>
    %11 = vector.broadcast %10 : vector<1x256xf32> to vector<2x256xf32>
    %12 = arith.addf %9, %11 : vector<2x256xf32>
    %13 = vector.extract_strided_slice %12 {offsets = [0, 0], sizes = [2, 192], strides = [1, 1]} : vector<2x256xf32> to vector<2x192xf32>
    %14 = arith.negf %13 : vector<2x192xf32>
    %15 = math.exp %14 : vector<2x192xf32>
    %cst_13 = arith.constant 1.000000e+00 : f32
    %16 = vector.broadcast %cst_13 : f32 to vector<2x192xf32>
    %17 = arith.addf %16, %15 : vector<2x192xf32>
    %18 = arith.divf %16, %17 : vector<2x192xf32>
    %19 = vector.extract_strided_slice %18 {offsets = [0, 0], sizes = [2, 64], strides = [1, 1]} : vector<2x192xf32> to vector<2x64xf32>
    %20 = vector.extract_strided_slice %18 {offsets = [0, 64], sizes = [2, 64], strides = [1, 1]} : vector<2x192xf32> to vector<2x64xf32>
    %21 = vector.extract_strided_slice %18 {offsets = [0, 128], sizes = [2, 64], strides = [1, 1]} : vector<2x192xf32> to vector<2x64xf32>
    %22 = vector.extract_strided_slice %12 {offsets = [0, 192], sizes = [2, 64], strides = [1, 1]} : vector<2x256xf32> to vector<2x64xf32>
    %23 = math.tanh %22 : vector<2x64xf32>
    %24 = arith.mulf %19, %0 : vector<2x64xf32>
    %25 = arith.mulf %20, %23 : vector<2x64xf32>
    %26 = arith.addf %24, %25 : vector<2x64xf32>
    %27 = math.tanh %26 : vector<2x64xf32>
    %28 = arith.mulf %21, %27 : vector<2x64xf32>
    %c0_14 = arith.constant 0 : index
    %c0_15 = arith.constant 0 : index
    %29 = vector.load %arg4[%c0_14, %c0_15] : memref<64x256xf32, #tpu.memory_space<vmem>>, vector<64x256xf32>
    %cst_16 = arith.constant dense<0.000000e+00> : vector<2x256xf32>
    %30 = tpu.matmul %28, %29, %cst_16 {dimension_numbers = #tpu.dot_dimension_numbers<[1], [0], [0], [1], [0, 0, 1, 1], [], []>} : vector<2x64xf32>, vector<64x256xf32>, vector<2x256xf32> -> vector<2x256xf32>
    %31 = arith.addf %2, %30 : vector<2x256xf32>
    %c0_17 = arith.constant 0 : index
    %c0_18 = arith.constant 0 : index
    %32 = vector.load %arg6[%c0_17, %c0_18] : memref<1x256xf32, #tpu.memory_space<vmem>>, vector<1x256xf32>
    %33 = vector.broadcast %32 : vector<1x256xf32> to vector<2x256xf32>
    %34 = arith.addf %31, %33 : vector<2x256xf32>
    %35 = vector.extract_strided_slice %34 {offsets = [0, 0], sizes = [2, 192], strides = [1, 1]} : vector<2x256xf32> to vector<2x192xf32>
    %36 = arith.negf %35 : vector<2x192xf32>
    %37 = math.exp %36 : vector<2x192xf32>
    %cst_19 = arith.constant 1.000000e+00 : f32
    %38 = vector.broadcast %cst_19 : f32 to vector<2x192xf32>
    %39 = arith.addf %38, %37 : vector<2x192xf32>
    %40 = arith.divf %38, %39 : vector<2x192xf32>
    %41 = vector.extract_strided_slice %40 {offsets = [0, 0], sizes = [2, 64], strides = [1, 1]} : vector<2x192xf32> to vector<2x64xf32>
    %42 = vector.extract_strided_slice %40 {offsets = [0, 64], sizes = [2, 64], strides = [1, 1]} : vector<2x192xf32> to vector<2x64xf32>
    %43 = vector.extract_strided_slice %40 {offsets = [0, 128], sizes = [2, 64], strides = [1, 1]} : vector<2x192xf32> to vector<2x64xf32>
    %44 = vector.extract_strided_slice %34 {offsets = [0, 192], sizes = [2, 64], strides = [1, 1]} : vector<2x256xf32> to vector<2x64xf32>
    %45 = math.tanh %44 : vector<2x64xf32>
    %46 = arith.mulf %41, %0 : vector<2x64xf32>
    %47 = arith.mulf %42, %45 : vector<2x64xf32>
    %48 = arith.addf %46, %47 : vector<2x64xf32>
    %49 = math.tanh %48 : vector<2x64xf32>
    %50 = arith.mulf %43, %49 : vector<2x64xf32>
    %c0_20 = arith.constant 0 : index
    %c0_21 = arith.constant 0 : index
    %51 = vector.load %arg5[%c0_20, %c0_21] : memref<64x256xf32, #tpu.memory_space<vmem>>, vector<64x256xf32>
    %cst_22 = arith.constant dense<0.000000e+00> : vector<2x256xf32>
    %52 = tpu.matmul %50, %51, %cst_22 {dimension_numbers = #tpu.dot_dimension_numbers<[1], [0], [0], [1], [0, 0, 1, 1], [], []>} : vector<2x64xf32>, vector<64x256xf32>, vector<2x256xf32> -> vector<2x256xf32>
    %c0_23 = arith.constant 0 : index
    %c1 = arith.constant 1 : index
    %c0_24 = arith.constant 0 : index
    %53 = vector.load %arg0[%c0_23, %c1, %c0_24] : memref<2x8x5xf32, #tpu.memory_space<vmem>>, vector<2x1x5xf32>
    %54 = vector.shape_cast %53 : vector<2x1x5xf32> to vector<2x5xf32>
    %c0_25 = arith.constant 0 : index
    %c0_26 = arith.constant 0 : index
    %55 = vector.load %arg1[%c0_25, %c0_26] : memref<5x256xf32, #tpu.memory_space<vmem>>, vector<5x256xf32>
    %cst_27 = arith.constant dense<0.000000e+00> : vector<2x256xf32>
    %56 = tpu.matmul %54, %55, %cst_27 {dimension_numbers = #tpu.dot_dimension_numbers<[1], [0], [0], [1], [0, 0, 1, 1], [], []>} : vector<2x5xf32>, vector<5x256xf32>, vector<2x256xf32> -> vector<2x256xf32>
    %c0_28 = arith.constant 0 : index
    %c0_29 = arith.constant 0 : index
    %57 = vector.load %arg2[%c0_28, %c0_29] : memref<64x256xf32, #tpu.memory_space<vmem>>, vector<64x256xf32>
    %cst_30 = arith.constant dense<0.000000e+00> : vector<2x256xf32>
    %58 = tpu.matmul %28, %57, %cst_30 {dimension_numbers = #tpu.dot_dimension_numbers<[1], [0], [0], [1], [0, 0, 1, 1], [], []>} : vector<2x64xf32>, vector<64x256xf32>, vector<2x256xf32> -> vector<2x256xf32>
    %59 = arith.addf %56, %58 : vector<2x256xf32>
    %c0_31 = arith.constant 0 : index
    %c0_32 = arith.constant 0 : index
    %60 = vector.load %arg3[%c0_31, %c0_32] : memref<1x256xf32, #tpu.memory_space<vmem>>, vector<1x256xf32>
    %61 = vector.broadcast %60 : vector<1x256xf32> to vector<2x256xf32>
    %62 = arith.addf %59, %61 : vector<2x256xf32>
    %63 = vector.extract_strided_slice %62 {offsets = [0, 0], sizes = [2, 192], strides = [1, 1]} : vector<2x256xf32> to vector<2x192xf32>
    %64 = arith.negf %63 : vector<2x192xf32>
    %65 = math.exp %64 : vector<2x192xf32>
    %cst_33 = arith.constant 1.000000e+00 : f32
    %66 = vector.broadcast %cst_33 : f32 to vector<2x192xf32>
    %67 = arith.addf %66, %65 : vector<2x192xf32>
    %68 = arith.divf %66, %67 : vector<2x192xf32>
    %69 = vector.extract_strided_slice %68 {offsets = [0, 0], sizes = [2, 64], strides = [1, 1]} : vector<2x192xf32> to vector<2x64xf32>
    %70 = vector.extract_strided_slice %68 {offsets = [0, 64], sizes = [2, 64], strides = [1, 1]} : vector<2x192xf32> to vector<2x64xf32>
    %71 = vector.extract_strided_slice %68 {offsets = [0, 128], sizes = [2, 64], strides = [1, 1]} : vector<2x192xf32> to vector<2x64xf32>
    %72 = vector.extract_strided_slice %62 {offsets = [0, 192], sizes = [2, 64], strides = [1, 1]} : vector<2x256xf32> to vector<2x64xf32>
    %73 = math.tanh %72 : vector<2x64xf32>
    %74 = arith.mulf %69, %26 : vector<2x64xf32>
    %75 = arith.mulf %70, %73 : vector<2x64xf32>
    %76 = arith.addf %74, %75 : vector<2x64xf32>
    %77 = math.tanh %76 : vector<2x64xf32>
    %78 = arith.mulf %71, %77 : vector<2x64xf32>
    %c0_34 = arith.constant 0 : index
    %c0_35 = arith.constant 0 : index
    %79 = vector.load %arg4[%c0_34, %c0_35] : memref<64x256xf32, #tpu.memory_space<vmem>>, vector<64x256xf32>
    %cst_36 = arith.constant dense<0.000000e+00> : vector<2x256xf32>
    %80 = tpu.matmul %78, %79, %cst_36 {dimension_numbers = #tpu.dot_dimension_numbers<[1], [0], [0], [1], [0, 0, 1, 1], [], []>} : vector<2x64xf32>, vector<64x256xf32>, vector<2x256xf32> -> vector<2x256xf32>
    %81 = arith.addf %52, %80 : vector<2x256xf32>
    %c0_37 = arith.constant 0 : index
    %c0_38 = arith.constant 0 : index
    %82 = vector.load %arg6[%c0_37, %c0_38] : memref<1x256xf32, #tpu.memory_space<vmem>>, vector<1x256xf32>
    %83 = vector.broadcast %82 : vector<1x256xf32> to vector<2x256xf32>
    %84 = arith.addf %81, %83 : vector<2x256xf32>
    %85 = vector.extract_strided_slice %84 {offsets = [0, 0], sizes = [2, 192], strides = [1, 1]} : vector<2x256xf32> to vector<2x192xf32>
    %86 = arith.negf %85 : vector<2x192xf32>
    %87 = math.exp %86 : vector<2x192xf32>
    %cst_39 = arith.constant 1.000000e+00 : f32
    %88 = vector.broadcast %cst_39 : f32 to vector<2x192xf32>
    %89 = arith.addf %88, %87 : vector<2x192xf32>
    %90 = arith.divf %88, %89 : vector<2x192xf32>
    %91 = vector.extract_strided_slice %90 {offsets = [0, 0], sizes = [2, 64], strides = [1, 1]} : vector<2x192xf32> to vector<2x64xf32>
    %92 = vector.extract_strided_slice %90 {offsets = [0, 64], sizes = [2, 64], strides = [1, 1]} : vector<2x192xf32> to vector<2x64xf32>
    %93 = vector.extract_strided_slice %90 {offsets = [0, 128], sizes = [2, 64], strides = [1, 1]} : vector<2x192xf32> to vector<2x64xf32>
    %94 = vector.extract_strided_slice %84 {offsets = [0, 192], sizes = [2, 64], strides = [1, 1]} : vector<2x256xf32> to vector<2x64xf32>
    %95 = math.tanh %94 : vector<2x64xf32>
    %96 = arith.mulf %91, %48 : vector<2x64xf32>
    %97 = arith.mulf %92, %95 : vector<2x64xf32>
    %98 = arith.addf %96, %97 : vector<2x64xf32>
    %99 = math.tanh %98 : vector<2x64xf32>
    %100 = arith.mulf %93, %99 : vector<2x64xf32>
    %c0_40 = arith.constant 0 : index
    %c0_41 = arith.constant 0 : index
    %101 = vector.load %arg5[%c0_40, %c0_41] : memref<64x256xf32, #tpu.memory_space<vmem>>, vector<64x256xf32>
    %cst_42 = arith.constant dense<0.000000e+00> : vector<2x256xf32>
    %102 = tpu.matmul %100, %101, %cst_42 {dimension_numbers = #tpu.dot_dimension_numbers<[1], [0], [0], [1], [0, 0, 1, 1], [], []>} : vector<2x64xf32>, vector<64x256xf32>, vector<2x256xf32> -> vector<2x256xf32>
    %c0_43 = arith.constant 0 : index
    %c2 = arith.constant 2 : index
    %c0_44 = arith.constant 0 : index
    %103 = vector.load %arg0[%c0_43, %c2, %c0_44] : memref<2x8x5xf32, #tpu.memory_space<vmem>>, vector<2x1x5xf32>
    %104 = vector.shape_cast %103 : vector<2x1x5xf32> to vector<2x5xf32>
    %c0_45 = arith.constant 0 : index
    %c0_46 = arith.constant 0 : index
    %105 = vector.load %arg1[%c0_45, %c0_46] : memref<5x256xf32, #tpu.memory_space<vmem>>, vector<5x256xf32>
    %cst_47 = arith.constant dense<0.000000e+00> : vector<2x256xf32>
    %106 = tpu.matmul %104, %105, %cst_47 {dimension_numbers = #tpu.dot_dimension_numbers<[1], [0], [0], [1], [0, 0, 1, 1], [], []>} : vector<2x5xf32>, vector<5x256xf32>, vector<2x256xf32> -> vector<2x256xf32>
    %c0_48 = arith.constant 0 : index
    %c0_49 = arith.constant 0 : index
    %107 = vector.load %arg2[%c0_48, %c0_49] : memref<64x256xf32, #tpu.memory_space<vmem>>, vector<64x256xf32>
    %cst_50 = arith.constant dense<0.000000e+00> : vector<2x256xf32>
    %108 = tpu.matmul %78, %107, %cst_50 {dimension_numbers = #tpu.dot_dimension_numbers<[1], [0], [0], [1], [0, 0, 1, 1], [], []>} : vector<2x64xf32>, vector<64x256xf32>, vector<2x256xf32> -> vector<2x256xf32>
    %109 = arith.addf %106, %108 : vector<2x256xf32>
    %c0_51 = arith.constant 0 : index
    %c0_52 = arith.constant 0 : index
    %110 = vector.load %arg3[%c0_51, %c0_52] : memref<1x256xf32, #tpu.memory_space<vmem>>, vector<1x256xf32>
    %111 = vector.broadcast %110 : vector<1x256xf32> to vector<2x256xf32>
    %112 = arith.addf %109, %111 : vector<2x256xf32>
    %113 = vector.extract_strided_slice %112 {offsets = [0, 0], sizes = [2, 192], strides = [1, 1]} : vector<2x256xf32> to vector<2x192xf32>
    %114 = arith.negf %113 : vector<2x192xf32>
    %115 = math.exp %114 : vector<2x192xf32>
    %cst_53 = arith.constant 1.000000e+00 : f32
    %116 = vector.broadcast %cst_53 : f32 to vector<2x192xf32>
    %117 = arith.addf %116, %115 : vector<2x192xf32>
    %118 = arith.divf %116, %117 : vector<2x192xf32>
    %119 = vector.extract_strided_slice %118 {offsets = [0, 0], sizes = [2, 64], strides = [1, 1]} : vector<2x192xf32> to vector<2x64xf32>
    %120 = vector.extract_strided_slice %118 {offsets = [0, 64], sizes = [2, 64], strides = [1, 1]} : vector<2x192xf32> to vector<2x64xf32>
    %121 = vector.extract_strided_slice %118 {offsets = [0, 128], sizes = [2, 64], strides = [1, 1]} : vector<2x192xf32> to vector<2x64xf32>
    %122 = vector.extract_strided_slice %112 {offsets = [0, 192], sizes = [2, 64], strides = [1, 1]} : vector<2x256xf32> to vector<2x64xf32>
    %123 = math.tanh %122 : vector<2x64xf32>
    %124 = arith.mulf %119, %76 : vector<2x64xf32>
    %125 = arith.mulf %120, %123 : vector<2x64xf32>
    %126 = arith.addf %124, %125 : vector<2x64xf32>
    %127 = math.tanh %126 : vector<2x64xf32>
    %128 = arith.mulf %121, %127 : vector<2x64xf32>
    %c0_54 = arith.constant 0 : index
    %c0_55 = arith.constant 0 : index
    %129 = vector.load %arg4[%c0_54, %c0_55] : memref<64x256xf32, #tpu.memory_space<vmem>>, vector<64x256xf32>
    %cst_56 = arith.constant dense<0.000000e+00> : vector<2x256xf32>
    %130 = tpu.matmul %128, %129, %cst_56 {dimension_numbers = #tpu.dot_dimension_numbers<[1], [0], [0], [1], [0, 0, 1, 1], [], []>} : vector<2x64xf32>, vector<64x256xf32>, vector<2x256xf32> -> vector<2x256xf32>
    %131 = arith.addf %102, %130 : vector<2x256xf32>
    %c0_57 = arith.constant 0 : index
    %c0_58 = arith.constant 0 : index
    %132 = vector.load %arg6[%c0_57, %c0_58] : memref<1x256xf32, #tpu.memory_space<vmem>>, vector<1x256xf32>
    %133 = vector.broadcast %132 : vector<1x256xf32> to vector<2x256xf32>
    %134 = arith.addf %131, %133 : vector<2x256xf32>
    %135 = vector.extract_strided_slice %134 {offsets = [0, 0], sizes = [2, 192], strides = [1, 1]} : vector<2x256xf32> to vector<2x192xf32>
    %136 = arith.negf %135 : vector<2x192xf32>
    %137 = math.exp %136 : vector<2x192xf32>
    %cst_59 = arith.constant 1.000000e+00 : f32
    %138 = vector.broadcast %cst_59 : f32 to vector<2x192xf32>
    %139 = arith.addf %138, %137 : vector<2x192xf32>
    %140 = arith.divf %138, %139 : vector<2x192xf32>
    %141 = vector.extract_strided_slice %140 {offsets = [0, 0], sizes = [2, 64], strides = [1, 1]} : vector<2x192xf32> to vector<2x64xf32>
    %142 = vector.extract_strided_slice %140 {offsets = [0, 64], sizes = [2, 64], strides = [1, 1]} : vector<2x192xf32> to vector<2x64xf32>
    %143 = vector.extract_strided_slice %140 {offsets = [0, 128], sizes = [2, 64], strides = [1, 1]} : vector<2x192xf32> to vector<2x64xf32>
    %144 = vector.extract_strided_slice %134 {offsets = [0, 192], sizes = [2, 64], strides = [1, 1]} : vector<2x256xf32> to vector<2x64xf32>
    %145 = math.tanh %144 : vector<2x64xf32>
    %146 = arith.mulf %141, %98 : vector<2x64xf32>
    %147 = arith.mulf %142, %145 : vector<2x64xf32>
    %148 = arith.addf %146, %147 : vector<2x64xf32>
    %149 = math.tanh %148 : vector<2x64xf32>
    %150 = arith.mulf %143, %149 : vector<2x64xf32>
    %c0_60 = arith.constant 0 : index
    %c0_61 = arith.constant 0 : index
    %151 = vector.load %arg5[%c0_60, %c0_61] : memref<64x256xf32, #tpu.memory_space<vmem>>, vector<64x256xf32>
    %cst_62 = arith.constant dense<0.000000e+00> : vector<2x256xf32>
    %152 = tpu.matmul %150, %151, %cst_62 {dimension_numbers = #tpu.dot_dimension_numbers<[1], [0], [0], [1], [0, 0, 1, 1], [], []>} : vector<2x64xf32>, vector<64x256xf32>, vector<2x256xf32> -> vector<2x256xf32>
    %c0_63 = arith.constant 0 : index
    %c3 = arith.constant 3 : index
    %c0_64 = arith.constant 0 : index
    %153 = vector.load %arg0[%c0_63, %c3, %c0_64] : memref<2x8x5xf32, #tpu.memory_space<vmem>>, vector<2x1x5xf32>
    %154 = vector.shape_cast %153 : vector<2x1x5xf32> to vector<2x5xf32>
    %c0_65 = arith.constant 0 : index
    %c0_66 = arith.constant 0 : index
    %155 = vector.load %arg1[%c0_65, %c0_66] : memref<5x256xf32, #tpu.memory_space<vmem>>, vector<5x256xf32>
    %cst_67 = arith.constant dense<0.000000e+00> : vector<2x256xf32>
    %156 = tpu.matmul %154, %155, %cst_67 {dimension_numbers = #tpu.dot_dimension_numbers<[1], [0], [0], [1], [0, 0, 1, 1], [], []>} : vector<2x5xf32>, vector<5x256xf32>, vector<2x256xf32> -> vector<2x256xf32>
    %c0_68 = arith.constant 0 : index
    %c0_69 = arith.constant 0 : index
    %157 = vector.load %arg2[%c0_68, %c0_69] : memref<64x256xf32, #tpu.memory_space<vmem>>, vector<64x256xf32>
    %cst_70 = arith.constant dense<0.000000e+00> : vector<2x256xf32>
    %158 = tpu.matmul %128, %157, %cst_70 {dimension_numbers = #tpu.dot_dimension_numbers<[1], [0], [0], [1], [0, 0, 1, 1], [], []>} : vector<2x64xf32>, vector<64x256xf32>, vector<2x256xf32> -> vector<2x256xf32>
    %159 = arith.addf %156, %158 : vector<2x256xf32>
    %c0_71 = arith.constant 0 : index
    %c0_72 = arith.constant 0 : index
    %160 = vector.load %arg3[%c0_71, %c0_72] : memref<1x256xf32, #tpu.memory_space<vmem>>, vector<1x256xf32>
    %161 = vector.broadcast %160 : vector<1x256xf32> to vector<2x256xf32>
    %162 = arith.addf %159, %161 : vector<2x256xf32>
    %163 = vector.extract_strided_slice %162 {offsets = [0, 0], sizes = [2, 192], strides = [1, 1]} : vector<2x256xf32> to vector<2x192xf32>
    %164 = arith.negf %163 : vector<2x192xf32>
    %165 = math.exp %164 : vector<2x192xf32>
    %cst_73 = arith.constant 1.000000e+00 : f32
    %166 = vector.broadcast %cst_73 : f32 to vector<2x192xf32>
    %167 = arith.addf %166, %165 : vector<2x192xf32>
    %168 = arith.divf %166, %167 : vector<2x192xf32>
    %169 = vector.extract_strided_slice %168 {offsets = [0, 0], sizes = [2, 64], strides = [1, 1]} : vector<2x192xf32> to vector<2x64xf32>
    %170 = vector.extract_strided_slice %168 {offsets = [0, 64], sizes = [2, 64], strides = [1, 1]} : vector<2x192xf32> to vector<2x64xf32>
    %171 = vector.extract_strided_slice %168 {offsets = [0, 128], sizes = [2, 64], strides = [1, 1]} : vector<2x192xf32> to vector<2x64xf32>
    %172 = vector.extract_strided_slice %162 {offsets = [0, 192], sizes = [2, 64], strides = [1, 1]} : vector<2x256xf32> to vector<2x64xf32>
    %173 = math.tanh %172 : vector<2x64xf32>
    %174 = arith.mulf %169, %126 : vector<2x64xf32>
    %175 = arith.mulf %170, %173 : vector<2x64xf32>
    %176 = arith.addf %174, %175 : vector<2x64xf32>
    %177 = math.tanh %176 : vector<2x64xf32>
    %178 = arith.mulf %171, %177 : vector<2x64xf32>
    %c0_74 = arith.constant 0 : index
    %c0_75 = arith.constant 0 : index
    %179 = vector.load %arg4[%c0_74, %c0_75] : memref<64x256xf32, #tpu.memory_space<vmem>>, vector<64x256xf32>
    %cst_76 = arith.constant dense<0.000000e+00> : vector<2x256xf32>
    %180 = tpu.matmul %178, %179, %cst_76 {dimension_numbers = #tpu.dot_dimension_numbers<[1], [0], [0], [1], [0, 0, 1, 1], [], []>} : vector<2x64xf32>, vector<64x256xf32>, vector<2x256xf32> -> vector<2x256xf32>
    %181 = arith.addf %152, %180 : vector<2x256xf32>
    %c0_77 = arith.constant 0 : index
    %c0_78 = arith.constant 0 : index
    %182 = vector.load %arg6[%c0_77, %c0_78] : memref<1x256xf32, #tpu.memory_space<vmem>>, vector<1x256xf32>
    %183 = vector.broadcast %182 : vector<1x256xf32> to vector<2x256xf32>
    %184 = arith.addf %181, %183 : vector<2x256xf32>
    %185 = vector.extract_strided_slice %184 {offsets = [0, 0], sizes = [2, 192], strides = [1, 1]} : vector<2x256xf32> to vector<2x192xf32>
    %186 = arith.negf %185 : vector<2x192xf32>
    %187 = math.exp %186 : vector<2x192xf32>
    %cst_79 = arith.constant 1.000000e+00 : f32
    %188 = vector.broadcast %cst_79 : f32 to vector<2x192xf32>
    %189 = arith.addf %188, %187 : vector<2x192xf32>
    %190 = arith.divf %188, %189 : vector<2x192xf32>
    %191 = vector.extract_strided_slice %190 {offsets = [0, 0], sizes = [2, 64], strides = [1, 1]} : vector<2x192xf32> to vector<2x64xf32>
    %192 = vector.extract_strided_slice %190 {offsets = [0, 64], sizes = [2, 64], strides = [1, 1]} : vector<2x192xf32> to vector<2x64xf32>
    %193 = vector.extract_strided_slice %190 {offsets = [0, 128], sizes = [2, 64], strides = [1, 1]} : vector<2x192xf32> to vector<2x64xf32>
    %194 = vector.extract_strided_slice %184 {offsets = [0, 192], sizes = [2, 64], strides = [1, 1]} : vector<2x256xf32> to vector<2x64xf32>
    %195 = math.tanh %194 : vector<2x64xf32>
    %196 = arith.mulf %191, %148 : vector<2x64xf32>
    %197 = arith.mulf %192, %195 : vector<2x64xf32>
    %198 = arith.addf %196, %197 : vector<2x64xf32>
    %199 = math.tanh %198 : vector<2x64xf32>
    %200 = arith.mulf %193, %199 : vector<2x64xf32>
    %c0_80 = arith.constant 0 : index
    %c0_81 = arith.constant 0 : index
    %201 = vector.load %arg5[%c0_80, %c0_81] : memref<64x256xf32, #tpu.memory_space<vmem>>, vector<64x256xf32>
    %cst_82 = arith.constant dense<0.000000e+00> : vector<2x256xf32>
    %202 = tpu.matmul %200, %201, %cst_82 {dimension_numbers = #tpu.dot_dimension_numbers<[1], [0], [0], [1], [0, 0, 1, 1], [], []>} : vector<2x64xf32>, vector<64x256xf32>, vector<2x256xf32> -> vector<2x256xf32>
    %c0_83 = arith.constant 0 : index
    %c4 = arith.constant 4 : index
    %c0_84 = arith.constant 0 : index
    %203 = vector.load %arg0[%c0_83, %c4, %c0_84] : memref<2x8x5xf32, #tpu.memory_space<vmem>>, vector<2x1x5xf32>
    %204 = vector.shape_cast %203 : vector<2x1x5xf32> to vector<2x5xf32>
    %c0_85 = arith.constant 0 : index
    %c0_86 = arith.constant 0 : index
    %205 = vector.load %arg1[%c0_85, %c0_86] : memref<5x256xf32, #tpu.memory_space<vmem>>, vector<5x256xf32>
    %cst_87 = arith.constant dense<0.000000e+00> : vector<2x256xf32>
    %206 = tpu.matmul %204, %205, %cst_87 {dimension_numbers = #tpu.dot_dimension_numbers<[1], [0], [0], [1], [0, 0, 1, 1], [], []>} : vector<2x5xf32>, vector<5x256xf32>, vector<2x256xf32> -> vector<2x256xf32>
    %c0_88 = arith.constant 0 : index
    %c0_89 = arith.constant 0 : index
    %207 = vector.load %arg2[%c0_88, %c0_89] : memref<64x256xf32, #tpu.memory_space<vmem>>, vector<64x256xf32>
    %cst_90 = arith.constant dense<0.000000e+00> : vector<2x256xf32>
    %208 = tpu.matmul %178, %207, %cst_90 {dimension_numbers = #tpu.dot_dimension_numbers<[1], [0], [0], [1], [0, 0, 1, 1], [], []>} : vector<2x64xf32>, vector<64x256xf32>, vector<2x256xf32> -> vector<2x256xf32>
    %209 = arith.addf %206, %208 : vector<2x256xf32>
    %c0_91 = arith.constant 0 : index
    %c0_92 = arith.constant 0 : index
    %210 = vector.load %arg3[%c0_91, %c0_92] : memref<1x256xf32, #tpu.memory_space<vmem>>, vector<1x256xf32>
    %211 = vector.broadcast %210 : vector<1x256xf32> to vector<2x256xf32>
    %212 = arith.addf %209, %211 : vector<2x256xf32>
    %213 = vector.extract_strided_slice %212 {offsets = [0, 0], sizes = [2, 192], strides = [1, 1]} : vector<2x256xf32> to vector<2x192xf32>
    %214 = arith.negf %213 : vector<2x192xf32>
    %215 = math.exp %214 : vector<2x192xf32>
    %cst_93 = arith.constant 1.000000e+00 : f32
    %216 = vector.broadcast %cst_93 : f32 to vector<2x192xf32>
    %217 = arith.addf %216, %215 : vector<2x192xf32>
    %218 = arith.divf %216, %217 : vector<2x192xf32>
    %219 = vector.extract_strided_slice %218 {offsets = [0, 0], sizes = [2, 64], strides = [1, 1]} : vector<2x192xf32> to vector<2x64xf32>
    %220 = vector.extract_strided_slice %218 {offsets = [0, 64], sizes = [2, 64], strides = [1, 1]} : vector<2x192xf32> to vector<2x64xf32>
    %221 = vector.extract_strided_slice %218 {offsets = [0, 128], sizes = [2, 64], strides = [1, 1]} : vector<2x192xf32> to vector<2x64xf32>
    %222 = vector.extract_strided_slice %212 {offsets = [0, 192], sizes = [2, 64], strides = [1, 1]} : vector<2x256xf32> to vector<2x64xf32>
    %223 = math.tanh %222 : vector<2x64xf32>
    %224 = arith.mulf %219, %176 : vector<2x64xf32>
    %225 = arith.mulf %220, %223 : vector<2x64xf32>
    %226 = arith.addf %224, %225 : vector<2x64xf32>
    %227 = math.tanh %226 : vector<2x64xf32>
    %228 = arith.mulf %221, %227 : vector<2x64xf32>
    %c0_94 = arith.constant 0 : index
    %c0_95 = arith.constant 0 : index
    %229 = vector.load %arg4[%c0_94, %c0_95] : memref<64x256xf32, #tpu.memory_space<vmem>>, vector<64x256xf32>
    %cst_96 = arith.constant dense<0.000000e+00> : vector<2x256xf32>
    %230 = tpu.matmul %228, %229, %cst_96 {dimension_numbers = #tpu.dot_dimension_numbers<[1], [0], [0], [1], [0, 0, 1, 1], [], []>} : vector<2x64xf32>, vector<64x256xf32>, vector<2x256xf32> -> vector<2x256xf32>
    %231 = arith.addf %202, %230 : vector<2x256xf32>
    %c0_97 = arith.constant 0 : index
    %c0_98 = arith.constant 0 : index
    %232 = vector.load %arg6[%c0_97, %c0_98] : memref<1x256xf32, #tpu.memory_space<vmem>>, vector<1x256xf32>
    %233 = vector.broadcast %232 : vector<1x256xf32> to vector<2x256xf32>
    %234 = arith.addf %231, %233 : vector<2x256xf32>
    %235 = vector.extract_strided_slice %234 {offsets = [0, 0], sizes = [2, 192], strides = [1, 1]} : vector<2x256xf32> to vector<2x192xf32>
    %236 = arith.negf %235 : vector<2x192xf32>
    %237 = math.exp %236 : vector<2x192xf32>
    %cst_99 = arith.constant 1.000000e+00 : f32
    %238 = vector.broadcast %cst_99 : f32 to vector<2x192xf32>
    %239 = arith.addf %238, %237 : vector<2x192xf32>
    %240 = arith.divf %238, %239 : vector<2x192xf32>
    %241 = vector.extract_strided_slice %240 {offsets = [0, 0], sizes = [2, 64], strides = [1, 1]} : vector<2x192xf32> to vector<2x64xf32>
    %242 = vector.extract_strided_slice %240 {offsets = [0, 64], sizes = [2, 64], strides = [1, 1]} : vector<2x192xf32> to vector<2x64xf32>
    %243 = vector.extract_strided_slice %240 {offsets = [0, 128], sizes = [2, 64], strides = [1, 1]} : vector<2x192xf32> to vector<2x64xf32>
    %244 = vector.extract_strided_slice %234 {offsets = [0, 192], sizes = [2, 64], strides = [1, 1]} : vector<2x256xf32> to vector<2x64xf32>
    %245 = math.tanh %244 : vector<2x64xf32>
    %246 = arith.mulf %241, %198 : vector<2x64xf32>
    %247 = arith.mulf %242, %245 : vector<2x64xf32>
    %248 = arith.addf %246, %247 : vector<2x64xf32>
    %249 = math.tanh %248 : vector<2x64xf32>
    %250 = arith.mulf %243, %249 : vector<2x64xf32>
    %c0_100 = arith.constant 0 : index
    %c0_101 = arith.constant 0 : index
    %251 = vector.load %arg5[%c0_100, %c0_101] : memref<64x256xf32, #tpu.memory_space<vmem>>, vector<64x256xf32>
    %cst_102 = arith.constant dense<0.000000e+00> : vector<2x256xf32>
    %252 = tpu.matmul %250, %251, %cst_102 {dimension_numbers = #tpu.dot_dimension_numbers<[1], [0], [0], [1], [0, 0, 1, 1], [], []>} : vector<2x64xf32>, vector<64x256xf32>, vector<2x256xf32> -> vector<2x256xf32>
    %c0_103 = arith.constant 0 : index
    %c5 = arith.constant 5 : index
    %c0_104 = arith.constant 0 : index
    %253 = vector.load %arg0[%c0_103, %c5, %c0_104] : memref<2x8x5xf32, #tpu.memory_space<vmem>>, vector<2x1x5xf32>
    %254 = vector.shape_cast %253 : vector<2x1x5xf32> to vector<2x5xf32>
    %c0_105 = arith.constant 0 : index
    %c0_106 = arith.constant 0 : index
    %255 = vector.load %arg1[%c0_105, %c0_106] : memref<5x256xf32, #tpu.memory_space<vmem>>, vector<5x256xf32>
    %cst_107 = arith.constant dense<0.000000e+00> : vector<2x256xf32>
    %256 = tpu.matmul %254, %255, %cst_107 {dimension_numbers = #tpu.dot_dimension_numbers<[1], [0], [0], [1], [0, 0, 1, 1], [], []>} : vector<2x5xf32>, vector<5x256xf32>, vector<2x256xf32> -> vector<2x256xf32>
    %c0_108 = arith.constant 0 : index
    %c0_109 = arith.constant 0 : index
    %257 = vector.load %arg2[%c0_108, %c0_109] : memref<64x256xf32, #tpu.memory_space<vmem>>, vector<64x256xf32>
    %cst_110 = arith.constant dense<0.000000e+00> : vector<2x256xf32>
    %258 = tpu.matmul %228, %257, %cst_110 {dimension_numbers = #tpu.dot_dimension_numbers<[1], [0], [0], [1], [0, 0, 1, 1], [], []>} : vector<2x64xf32>, vector<64x256xf32>, vector<2x256xf32> -> vector<2x256xf32>
    %259 = arith.addf %256, %258 : vector<2x256xf32>
    %c0_111 = arith.constant 0 : index
    %c0_112 = arith.constant 0 : index
    %260 = vector.load %arg3[%c0_111, %c0_112] : memref<1x256xf32, #tpu.memory_space<vmem>>, vector<1x256xf32>
    %261 = vector.broadcast %260 : vector<1x256xf32> to vector<2x256xf32>
    %262 = arith.addf %259, %261 : vector<2x256xf32>
    %263 = vector.extract_strided_slice %262 {offsets = [0, 0], sizes = [2, 192], strides = [1, 1]} : vector<2x256xf32> to vector<2x192xf32>
    %264 = arith.negf %263 : vector<2x192xf32>
    %265 = math.exp %264 : vector<2x192xf32>
    %cst_113 = arith.constant 1.000000e+00 : f32
    %266 = vector.broadcast %cst_113 : f32 to vector<2x192xf32>
    %267 = arith.addf %266, %265 : vector<2x192xf32>
    %268 = arith.divf %266, %267 : vector<2x192xf32>
    %269 = vector.extract_strided_slice %268 {offsets = [0, 0], sizes = [2, 64], strides = [1, 1]} : vector<2x192xf32> to vector<2x64xf32>
    %270 = vector.extract_strided_slice %268 {offsets = [0, 64], sizes = [2, 64], strides = [1, 1]} : vector<2x192xf32> to vector<2x64xf32>
    %271 = vector.extract_strided_slice %268 {offsets = [0, 128], sizes = [2, 64], strides = [1, 1]} : vector<2x192xf32> to vector<2x64xf32>
    %272 = vector.extract_strided_slice %262 {offsets = [0, 192], sizes = [2, 64], strides = [1, 1]} : vector<2x256xf32> to vector<2x64xf32>
    %273 = math.tanh %272 : vector<2x64xf32>
    %274 = arith.mulf %269, %226 : vector<2x64xf32>
    %275 = arith.mulf %270, %273 : vector<2x64xf32>
    %276 = arith.addf %274, %275 : vector<2x64xf32>
    %277 = math.tanh %276 : vector<2x64xf32>
    %278 = arith.mulf %271, %277 : vector<2x64xf32>
    %c0_114 = arith.constant 0 : index
    %c0_115 = arith.constant 0 : index
    %279 = vector.load %arg4[%c0_114, %c0_115] : memref<64x256xf32, #tpu.memory_space<vmem>>, vector<64x256xf32>
    %cst_116 = arith.constant dense<0.000000e+00> : vector<2x256xf32>
    %280 = tpu.matmul %278, %279, %cst_116 {dimension_numbers = #tpu.dot_dimension_numbers<[1], [0], [0], [1], [0, 0, 1, 1], [], []>} : vector<2x64xf32>, vector<64x256xf32>, vector<2x256xf32> -> vector<2x256xf32>
    %281 = arith.addf %252, %280 : vector<2x256xf32>
    %c0_117 = arith.constant 0 : index
    %c0_118 = arith.constant 0 : index
    %282 = vector.load %arg6[%c0_117, %c0_118] : memref<1x256xf32, #tpu.memory_space<vmem>>, vector<1x256xf32>
    %283 = vector.broadcast %282 : vector<1x256xf32> to vector<2x256xf32>
    %284 = arith.addf %281, %283 : vector<2x256xf32>
    %285 = vector.extract_strided_slice %284 {offsets = [0, 0], sizes = [2, 192], strides = [1, 1]} : vector<2x256xf32> to vector<2x192xf32>
    %286 = arith.negf %285 : vector<2x192xf32>
    %287 = math.exp %286 : vector<2x192xf32>
    %cst_119 = arith.constant 1.000000e+00 : f32
    %288 = vector.broadcast %cst_119 : f32 to vector<2x192xf32>
    %289 = arith.addf %288, %287 : vector<2x192xf32>
    %290 = arith.divf %288, %289 : vector<2x192xf32>
    %291 = vector.extract_strided_slice %290 {offsets = [0, 0], sizes = [2, 64], strides = [1, 1]} : vector<2x192xf32> to vector<2x64xf32>
    %292 = vector.extract_strided_slice %290 {offsets = [0, 64], sizes = [2, 64], strides = [1, 1]} : vector<2x192xf32> to vector<2x64xf32>
    %293 = vector.extract_strided_slice %290 {offsets = [0, 128], sizes = [2, 64], strides = [1, 1]} : vector<2x192xf32> to vector<2x64xf32>
    %294 = vector.extract_strided_slice %284 {offsets = [0, 192], sizes = [2, 64], strides = [1, 1]} : vector<2x256xf32> to vector<2x64xf32>
    %295 = math.tanh %294 : vector<2x64xf32>
    %296 = arith.mulf %291, %248 : vector<2x64xf32>
    %297 = arith.mulf %292, %295 : vector<2x64xf32>
    %298 = arith.addf %296, %297 : vector<2x64xf32>
    %299 = math.tanh %298 : vector<2x64xf32>
    %300 = arith.mulf %293, %299 : vector<2x64xf32>
    %c0_120 = arith.constant 0 : index
    %c0_121 = arith.constant 0 : index
    %301 = vector.load %arg5[%c0_120, %c0_121] : memref<64x256xf32, #tpu.memory_space<vmem>>, vector<64x256xf32>
    %cst_122 = arith.constant dense<0.000000e+00> : vector<2x256xf32>
    %302 = tpu.matmul %300, %301, %cst_122 {dimension_numbers = #tpu.dot_dimension_numbers<[1], [0], [0], [1], [0, 0, 1, 1], [], []>} : vector<2x64xf32>, vector<64x256xf32>, vector<2x256xf32> -> vector<2x256xf32>
    %c0_123 = arith.constant 0 : index
    %c6 = arith.constant 6 : index
    %c0_124 = arith.constant 0 : index
    %303 = vector.load %arg0[%c0_123, %c6, %c0_124] : memref<2x8x5xf32, #tpu.memory_space<vmem>>, vector<2x1x5xf32>
    %304 = vector.shape_cast %303 : vector<2x1x5xf32> to vector<2x5xf32>
    %c0_125 = arith.constant 0 : index
    %c0_126 = arith.constant 0 : index
    %305 = vector.load %arg1[%c0_125, %c0_126] : memref<5x256xf32, #tpu.memory_space<vmem>>, vector<5x256xf32>
    %cst_127 = arith.constant dense<0.000000e+00> : vector<2x256xf32>
    %306 = tpu.matmul %304, %305, %cst_127 {dimension_numbers = #tpu.dot_dimension_numbers<[1], [0], [0], [1], [0, 0, 1, 1], [], []>} : vector<2x5xf32>, vector<5x256xf32>, vector<2x256xf32> -> vector<2x256xf32>
    %c0_128 = arith.constant 0 : index
    %c0_129 = arith.constant 0 : index
    %307 = vector.load %arg2[%c0_128, %c0_129] : memref<64x256xf32, #tpu.memory_space<vmem>>, vector<64x256xf32>
    %cst_130 = arith.constant dense<0.000000e+00> : vector<2x256xf32>
    %308 = tpu.matmul %278, %307, %cst_130 {dimension_numbers = #tpu.dot_dimension_numbers<[1], [0], [0], [1], [0, 0, 1, 1], [], []>} : vector<2x64xf32>, vector<64x256xf32>, vector<2x256xf32> -> vector<2x256xf32>
    %309 = arith.addf %306, %308 : vector<2x256xf32>
    %c0_131 = arith.constant 0 : index
    %c0_132 = arith.constant 0 : index
    %310 = vector.load %arg3[%c0_131, %c0_132] : memref<1x256xf32, #tpu.memory_space<vmem>>, vector<1x256xf32>
    %311 = vector.broadcast %310 : vector<1x256xf32> to vector<2x256xf32>
    %312 = arith.addf %309, %311 : vector<2x256xf32>
    %313 = vector.extract_strided_slice %312 {offsets = [0, 0], sizes = [2, 192], strides = [1, 1]} : vector<2x256xf32> to vector<2x192xf32>
    %314 = arith.negf %313 : vector<2x192xf32>
    %315 = math.exp %314 : vector<2x192xf32>
    %cst_133 = arith.constant 1.000000e+00 : f32
    %316 = vector.broadcast %cst_133 : f32 to vector<2x192xf32>
    %317 = arith.addf %316, %315 : vector<2x192xf32>
    %318 = arith.divf %316, %317 : vector<2x192xf32>
    %319 = vector.extract_strided_slice %318 {offsets = [0, 0], sizes = [2, 64], strides = [1, 1]} : vector<2x192xf32> to vector<2x64xf32>
    %320 = vector.extract_strided_slice %318 {offsets = [0, 64], sizes = [2, 64], strides = [1, 1]} : vector<2x192xf32> to vector<2x64xf32>
    %321 = vector.extract_strided_slice %318 {offsets = [0, 128], sizes = [2, 64], strides = [1, 1]} : vector<2x192xf32> to vector<2x64xf32>
    %322 = vector.extract_strided_slice %312 {offsets = [0, 192], sizes = [2, 64], strides = [1, 1]} : vector<2x256xf32> to vector<2x64xf32>
    %323 = math.tanh %322 : vector<2x64xf32>
    %324 = arith.mulf %319, %276 : vector<2x64xf32>
    %325 = arith.mulf %320, %323 : vector<2x64xf32>
    %326 = arith.addf %324, %325 : vector<2x64xf32>
    %327 = math.tanh %326 : vector<2x64xf32>
    %328 = arith.mulf %321, %327 : vector<2x64xf32>
    %c0_134 = arith.constant 0 : index
    %c0_135 = arith.constant 0 : index
    %329 = vector.load %arg4[%c0_134, %c0_135] : memref<64x256xf32, #tpu.memory_space<vmem>>, vector<64x256xf32>
    %cst_136 = arith.constant dense<0.000000e+00> : vector<2x256xf32>
    %330 = tpu.matmul %328, %329, %cst_136 {dimension_numbers = #tpu.dot_dimension_numbers<[1], [0], [0], [1], [0, 0, 1, 1], [], []>} : vector<2x64xf32>, vector<64x256xf32>, vector<2x256xf32> -> vector<2x256xf32>
    %331 = arith.addf %302, %330 : vector<2x256xf32>
    %c0_137 = arith.constant 0 : index
    %c0_138 = arith.constant 0 : index
    %332 = vector.load %arg6[%c0_137, %c0_138] : memref<1x256xf32, #tpu.memory_space<vmem>>, vector<1x256xf32>
    %333 = vector.broadcast %332 : vector<1x256xf32> to vector<2x256xf32>
    %334 = arith.addf %331, %333 : vector<2x256xf32>
    %335 = vector.extract_strided_slice %334 {offsets = [0, 0], sizes = [2, 192], strides = [1, 1]} : vector<2x256xf32> to vector<2x192xf32>
    %336 = arith.negf %335 : vector<2x192xf32>
    %337 = math.exp %336 : vector<2x192xf32>
    %cst_139 = arith.constant 1.000000e+00 : f32
    %338 = vector.broadcast %cst_139 : f32 to vector<2x192xf32>
    %339 = arith.addf %338, %337 : vector<2x192xf32>
    %340 = arith.divf %338, %339 : vector<2x192xf32>
    %341 = vector.extract_strided_slice %340 {offsets = [0, 0], sizes = [2, 64], strides = [1, 1]} : vector<2x192xf32> to vector<2x64xf32>
    %342 = vector.extract_strided_slice %340 {offsets = [0, 64], sizes = [2, 64], strides = [1, 1]} : vector<2x192xf32> to vector<2x64xf32>
    %343 = vector.extract_strided_slice %340 {offsets = [0, 128], sizes = [2, 64], strides = [1, 1]} : vector<2x192xf32> to vector<2x64xf32>
    %344 = vector.extract_strided_slice %334 {offsets = [0, 192], sizes = [2, 64], strides = [1, 1]} : vector<2x256xf32> to vector<2x64xf32>
    %345 = math.tanh %344 : vector<2x64xf32>
    %346 = arith.mulf %341, %298 : vector<2x64xf32>
    %347 = arith.mulf %342, %345 : vector<2x64xf32>
    %348 = arith.addf %346, %347 : vector<2x64xf32>
    %349 = math.tanh %348 : vector<2x64xf32>
    %350 = arith.mulf %343, %349 : vector<2x64xf32>
    %c0_140 = arith.constant 0 : index
    %c0_141 = arith.constant 0 : index
    %351 = vector.load %arg5[%c0_140, %c0_141] : memref<64x256xf32, #tpu.memory_space<vmem>>, vector<64x256xf32>
    %cst_142 = arith.constant dense<0.000000e+00> : vector<2x256xf32>
    %352 = tpu.matmul %350, %351, %cst_142 {dimension_numbers = #tpu.dot_dimension_numbers<[1], [0], [0], [1], [0, 0, 1, 1], [], []>} : vector<2x64xf32>, vector<64x256xf32>, vector<2x256xf32> -> vector<2x256xf32>
    %c0_143 = arith.constant 0 : index
    %c7 = arith.constant 7 : index
    %c0_144 = arith.constant 0 : index
    %353 = vector.load %arg0[%c0_143, %c7, %c0_144] : memref<2x8x5xf32, #tpu.memory_space<vmem>>, vector<2x1x5xf32>
    %354 = vector.shape_cast %353 : vector<2x1x5xf32> to vector<2x5xf32>
    %c0_145 = arith.constant 0 : index
    %c0_146 = arith.constant 0 : index
    %355 = vector.load %arg1[%c0_145, %c0_146] : memref<5x256xf32, #tpu.memory_space<vmem>>, vector<5x256xf32>
    %cst_147 = arith.constant dense<0.000000e+00> : vector<2x256xf32>
    %356 = tpu.matmul %354, %355, %cst_147 {dimension_numbers = #tpu.dot_dimension_numbers<[1], [0], [0], [1], [0, 0, 1, 1], [], []>} : vector<2x5xf32>, vector<5x256xf32>, vector<2x256xf32> -> vector<2x256xf32>
    %c0_148 = arith.constant 0 : index
    %c0_149 = arith.constant 0 : index
    %357 = vector.load %arg2[%c0_148, %c0_149] : memref<64x256xf32, #tpu.memory_space<vmem>>, vector<64x256xf32>
    %cst_150 = arith.constant dense<0.000000e+00> : vector<2x256xf32>
    %358 = tpu.matmul %328, %357, %cst_150 {dimension_numbers = #tpu.dot_dimension_numbers<[1], [0], [0], [1], [0, 0, 1, 1], [], []>} : vector<2x64xf32>, vector<64x256xf32>, vector<2x256xf32> -> vector<2x256xf32>
    %359 = arith.addf %356, %358 : vector<2x256xf32>
    %c0_151 = arith.constant 0 : index
    %c0_152 = arith.constant 0 : index
    %360 = vector.load %arg3[%c0_151, %c0_152] : memref<1x256xf32, #tpu.memory_space<vmem>>, vector<1x256xf32>
    %361 = vector.broadcast %360 : vector<1x256xf32> to vector<2x256xf32>
    %362 = arith.addf %359, %361 : vector<2x256xf32>
    %363 = vector.extract_strided_slice %362 {offsets = [0, 0], sizes = [2, 192], strides = [1, 1]} : vector<2x256xf32> to vector<2x192xf32>
    %364 = arith.negf %363 : vector<2x192xf32>
    %365 = math.exp %364 : vector<2x192xf32>
    %cst_153 = arith.constant 1.000000e+00 : f32
    %366 = vector.broadcast %cst_153 : f32 to vector<2x192xf32>
    %367 = arith.addf %366, %365 : vector<2x192xf32>
    %368 = arith.divf %366, %367 : vector<2x192xf32>
    %369 = vector.extract_strided_slice %368 {offsets = [0, 0], sizes = [2, 64], strides = [1, 1]} : vector<2x192xf32> to vector<2x64xf32>
    %370 = vector.extract_strided_slice %368 {offsets = [0, 64], sizes = [2, 64], strides = [1, 1]} : vector<2x192xf32> to vector<2x64xf32>
    %371 = vector.extract_strided_slice %368 {offsets = [0, 128], sizes = [2, 64], strides = [1, 1]} : vector<2x192xf32> to vector<2x64xf32>
    %372 = vector.extract_strided_slice %362 {offsets = [0, 192], sizes = [2, 64], strides = [1, 1]} : vector<2x256xf32> to vector<2x64xf32>
    %373 = math.tanh %372 : vector<2x64xf32>
    %374 = arith.mulf %369, %326 : vector<2x64xf32>
    %375 = arith.mulf %370, %373 : vector<2x64xf32>
    %376 = arith.addf %374, %375 : vector<2x64xf32>
    %377 = math.tanh %376 : vector<2x64xf32>
    %378 = arith.mulf %371, %377 : vector<2x64xf32>
    %c0_154 = arith.constant 0 : index
    %c0_155 = arith.constant 0 : index
    %379 = vector.load %arg4[%c0_154, %c0_155] : memref<64x256xf32, #tpu.memory_space<vmem>>, vector<64x256xf32>
    %cst_156 = arith.constant dense<0.000000e+00> : vector<2x256xf32>
    %380 = tpu.matmul %378, %379, %cst_156 {dimension_numbers = #tpu.dot_dimension_numbers<[1], [0], [0], [1], [0, 0, 1, 1], [], []>} : vector<2x64xf32>, vector<64x256xf32>, vector<2x256xf32> -> vector<2x256xf32>
    %381 = arith.addf %352, %380 : vector<2x256xf32>
    %c0_157 = arith.constant 0 : index
    %c0_158 = arith.constant 0 : index
    %382 = vector.load %arg6[%c0_157, %c0_158] : memref<1x256xf32, #tpu.memory_space<vmem>>, vector<1x256xf32>
    %383 = vector.broadcast %382 : vector<1x256xf32> to vector<2x256xf32>
    %384 = arith.addf %381, %383 : vector<2x256xf32>
    %385 = vector.extract_strided_slice %384 {offsets = [0, 0], sizes = [2, 192], strides = [1, 1]} : vector<2x256xf32> to vector<2x192xf32>
    %386 = arith.negf %385 : vector<2x192xf32>
    %387 = math.exp %386 : vector<2x192xf32>
    %cst_159 = arith.constant 1.000000e+00 : f32
    %388 = vector.broadcast %cst_159 : f32 to vector<2x192xf32>
    %389 = arith.addf %388, %387 : vector<2x192xf32>
    %390 = arith.divf %388, %389 : vector<2x192xf32>
    %391 = vector.extract_strided_slice %390 {offsets = [0, 0], sizes = [2, 64], strides = [1, 1]} : vector<2x192xf32> to vector<2x64xf32>
    %392 = vector.extract_strided_slice %390 {offsets = [0, 64], sizes = [2, 64], strides = [1, 1]} : vector<2x192xf32> to vector<2x64xf32>
    %393 = vector.extract_strided_slice %390 {offsets = [0, 128], sizes = [2, 64], strides = [1, 1]} : vector<2x192xf32> to vector<2x64xf32>
    %394 = vector.extract_strided_slice %384 {offsets = [0, 192], sizes = [2, 64], strides = [1, 1]} : vector<2x256xf32> to vector<2x64xf32>
    %395 = math.tanh %394 : vector<2x64xf32>
    %396 = arith.mulf %391, %348 : vector<2x64xf32>
    %397 = arith.mulf %392, %395 : vector<2x64xf32>
    %398 = arith.addf %396, %397 : vector<2x64xf32>
    %399 = math.tanh %398 : vector<2x64xf32>
    %400 = arith.mulf %393, %399 : vector<2x64xf32>
    %c0_160 = arith.constant 0 : index
    %c0_161 = arith.constant 0 : index
    %401 = vector.load %arg7[%c0_160, %c0_161] : memref<1x64xf32, #tpu.memory_space<vmem>>, vector<1x64xf32>
    %402 = vector.broadcast %401 : vector<1x64xf32> to vector<2x64xf32>
    %403 = arith.mulf %400, %402 : vector<2x64xf32>
    %cst_162 = arith.constant dense<0.000000e+00> : vector<2xf32>
    %404 = vector.multi_reduction <add>, %403, %cst_162 [1] : vector<2x64xf32> to vector<2xf32>
    %405 = vector.shape_cast %404 : vector<2xf32> to vector<2x1xf32>
    %c0_163 = arith.constant 0 : index
    %c0_164 = arith.constant 0 : index
    %406 = vector.load %arg8[%c0_163, %c0_164] : memref<1x1xf32, #tpu.memory_space<vmem>>, vector<1x1xf32>
    %407 = vector.broadcast %406 : vector<1x1xf32> to vector<2x1xf32>
    %408 = arith.addf %405, %407 : vector<2x1xf32>
    %c0_165 = arith.constant 0 : index
    %c0_166 = arith.constant 0 : index
    %409 = vector.load %arg9[%c0_165, %c0_166] : memref<2x1xf32, #tpu.memory_space<vmem>>, vector<2x1xf32>
    tpu.vector_store %arg9[%c0_165, %c0_166], %408 {strides = array<i32>} : memref<2x1xf32, #tpu.memory_space<vmem>>, vector<2x1xf32>,
    return
  }
}

</mosaic_0001>

<bundles_post_ra>
// kernel: tpu_custom_call.1
= control target key start
LH: loop header
LB: loop body
LE: loop exit
PB: predicated region body
PF: predicated region fallthrough
CT: control target
= control target key end

     0   :  { %s3771_s0 = inlined_call_operand.vmem [shape: f32[2,8,5], index: 0, kind: input, shape index: {}]   ;;  %s3772_s1 = inlined_call_operand.vmem [shape: f32[5,256], index: 1, kind: input, shape index: {}]   ;;  %s3773_s2 = inlined_call_operand.hbm [shape: f32[64,256], index: 2, kind: input, shape index: {}]   ;;  %s3774_s3 = inlined_call_operand.vmem [shape: f32[1,256], index: 3, kind: input, shape index: {}]   ;;  %s3775_s4 = inlined_call_operand.hbm [shape: f32[64,256], index: 4, kind: input, shape index: {}]   ;;  %s3776_s5 = inlined_call_operand.hbm [shape: f32[64,256], index: 5, kind: input, shape index: {}]   ;;  %s3777_s6 = inlined_call_operand.vmem [shape: f32[1,256], index: 6, kind: input, shape index: {}]   ;;  %s3778_s7 = inlined_call_operand.vmem [shape: f32[1,64], index: 7, kind: input, shape index: {}]   ;;  %s3779_s8 = inlined_call_operand.<no memory space> [shape: f32[1,1], index: 8, kind: input, shape index: {}]   ;;  %s3780_s9 = inlined_call_operand.vmem [shape: f32[2,1], index: 9, kind: output, shape index: {}]  }
   0x1   :  { %v14_v0 = vstv %s3779_s8 }
   0x2   :  { %15 = vst [vmem:[#allocation2] sm:$0x1] %v14_v0 }
   0x3   :  { %16 = vsyncpa [#allocation4], 0 }
   0x4   :  { %17 = vsyncpa [#allocation6], 0  ;;  %s41_s13 = sshll.u32 %s3775_s4, 4  ;;  %s2842_s14 = smov [#allocation5]   ;;  %s42_s13 = int_to_ptr.hbm [resolvable:$true] %s41_s13 }
   0x5   :  { %s43_s15 = sshll.u32 %s2842_s14, 4  ;;  %s26_s18 = sshll.u32 %s3773_s2, 4  ;;  %s44_s15 = int_to_ptr.vmem [resolvable:$true] %s43_s15  ;;  %s27_s18 = int_to_ptr.hbm [resolvable:$true] %s26_s18 }
   0x6   :  { %s2843_s19 = smov 256   ;;  %s2844_s20 = smov 16  }
   0x7   :  { %49 = dma.hbm_to_vmem [thread:$0]  %s42_s13, 2048, %s44_s15, [#allocation6], %s2843_s19, %s2843_s19, %s2844_s20  }
   0x8   :  { %s2845_s8 = smov [#allocation3]   ;;  %s54_s24 = sshll.u32 %s3776_s5, 4  ;;  %s55_s24 = int_to_ptr.hbm [resolvable:$true] %s54_s24 }
   0x9   :  { %s28_s21 = sshll.u32 %s2845_s8, 4  ;;  %s2846_s4 = smov [#allocation7]   ;;  %s29_s21 = int_to_ptr.vmem [resolvable:$true] %s28_s21 }
   0xa   :  { %34 = dma.hbm_to_vmem [thread:$0]  %s27_s18, 2048, %s29_s21, [#allocation4], %s2843_s19, %s2843_s19, %s2844_s20  }
   0xb   :  { %s56_s25 = sshll.u32 %s2846_s4, 4  ;;  %s57_s25 = int_to_ptr.vmem [resolvable:$true] %s56_s25 }
   0xc   :  { %62 = dma.hbm_to_vmem [thread:$0]  %s55_s24, 2048, %s57_s25, [#allocation6], %s2843_s19, %s2843_s19, %s2844_s20  }
   0xd   :  { %2838 = dma.done.wait [#allocation4], 2048  }
   0xe   :  { %2839 = vsyncadd [#allocation4], 4294965248 }
   0xf   :  { %2840 = dma.done.wait [#allocation6], 4096  }
  0x10   :  { %2841 = vsyncadd [#allocation6], 4294963200  ;;  %v2911_v1 = vld [vmem:[#allocation3 + $0x70] sm:$0xff]  ;;  %v2913_v2 = vld [vmem:[#allocation3 + $0x60] sm:$0xff]  ;;  %vm169_vm0 = vcmask 1044480   ;;  %vm164_vm1 = vcmask 1041409  }
  0x11   :  { %129 = vmatpush.msra.mxu0 %v2911_v1  ;;  %v2916_v3 = vld [vmem:[#allocation3 + $0x50] sm:$0xff]  ;;  %v2918_v4 = vld [vmem:[#allocation3 + $0x78] sm:$0xff]  ;;  %v98_v7 = vld [vmem:[%s3771_s0 + $0x8] sm:$0x1]  ;;  %vm166_vm2 = vcmask 39936   ;;  %v2847_v23 = vmov 0.0  }
  0x12   :  { %149 = vmatpush.msra.mxu1 %v2918_v4  ;;  %v2924_v5 = vld [vmem:[%s3772_s1] sm:$0x1f]  ;;  %v163_v8 = vrot.slane %v98_v7, 7  ;;  %v2935_v9 = vld [vmem:[#allocation3 + $0x68] sm:$0xff]  ;;  %v2951_v15 = vld [vmem:[#allocation3 + $0x30] sm:$0xff]  ;;  %vm117_vm11 = vcmask 523264  }
  0x13   :  { %3810 = vst [vmem:[#allocation10_spill] sm:$0xff] %v2924_v5  ;;  %v97_v6 = vld [vmem:[%s3771_s0] sm:$0x1]  ;;  %130 = vmatpush.msra.mxu0 %v2913_v2  ;;  %2367 = vmatpush.msk.msra.mxu2 %vm169_vm0, %v2924_v5  ;;  %v2937_v10 = vld [vmem:[#allocation3 + $0x40] sm:$0xff]  ;;  %v2944_v13 = vld [vmem:[#allocation3 + $0x48] sm:$0xff] }
  0x14   :  { %150 = vmatpush.msra.mxu1 %v2935_v9  ;;  %v2940_v11 = vld [vmem:[#allocation3 + $0x58] sm:$0xff]  ;;  %v165_v12 = vsel %vm164_vm1, %v163_v8, %v97_v6  ;;  %v2949_v14 = vld [vmem:[%s3772_s1 + $0x8] sm:$0x1f]  ;;  %v2967_v19 = vld [vmem:[#allocation3 + $0x10] sm:$0xff] }
  0x15   :  { %131 = vmatpush.msra.mxu0 %v2916_v3  ;;  %3811 = vst [vmem:[#allocation11_spill] sm:$0xff] %v2949_v14  ;;  %2368 = vmatmul.msk.f32.vlgmr.msra.gmra.mxu2 %vm166_vm2, %v165_v12  ;;  %v2956_v16 = vld [vmem:[#allocation3 + $0x38] sm:$0xff]  ;;  %v2960_v17 = vld [vmem:[#allocation3 + $0x20] sm:$0xff]  ;;  %v2965_v18 = vld [vmem:[#allocation3 + $0x28] sm:$0xff] }
  0x16   :  { %151 = vmatpush.msra.mxu1 %v2940_v11  ;;  %2369 = vmatpush.msk.msra.mxu3 %vm169_vm0, %v2949_v14  ;;  %3812 = vst [vmem:[#allocation12_spill] sm:$0xff] %v2960_v17  ;;  %v2971_v20 = vld [vmem:[#allocation3 + $0x18] sm:$0xff]  ;;  %v2973_v21 = vld [vmem:[#allocation3] sm:$0xff]  ;;  %v2977_v22 = vld [vmem:[#allocation3 + $0x8] sm:$0xff] }
  0x17   :  { %132 = vmatpush.msra.mxu0 %v2937_v10  ;;  %2370 = vmatmul.msk.f32.vlgmr.msra.gmra.mxu3 %vm166_vm2, %v165_v12  ;;  %3813 = vst [vmem:[#allocation13_spill] sm:$0xff] %v2965_v18  ;;  %v216_v24 = vld [vmem:[%s3774_s3] sm:$0x3]  ;;  %v2990_v30 = vld [vmem:[#allocation5 + $0x70] sm:$0xff]  ;;  %v2998_v33 = vld [vmem:[#allocation5 + $0x68] sm:$0xff]  ;;  %s2848_s3 = smov 64  }
  0x18   :  { %152 = vmatpush.msra.mxu1 %v2944_v13  ;;  %3814 = vst [vmem:[#allocation14_spill] sm:$0xff] %v2967_v19  ;;  %v2987_v26 = vperm.slane %v216_v24, 0  ;;  %v2992_v31 = vld [vmem:[#allocation5 + $0x78] sm:$0xff]  ;;  %v2994_v32 = vld [vmem:[#allocation5 + $0x60] sm:$0xff]  ;;  %299 = vmatpush.msrb.mxu2 %v2990_v30  ;;  %v3000_v35 = vld [vmem:[#allocation5 + $0x50] sm:$0xff]  ;;  %v3026_v48 = vperm.slane %v216_v24, 1 }
  0x19   :  { %133 = vmatpush.msra.mxu0 %v2951_v15  ;;  %3815 = vst [vmem:[#allocation15_spill] sm:$0xff] %v2971_v20  ;;  %319 = vmatpush.msrb.mxu3 %v2992_v31  ;;  %v3002_v36 = vld [vmem:[#allocation5 + $0x58] sm:$0xff]  ;;  %v3006_v37 = vld [vmem:[#allocation5 + $0x40] sm:$0xff]  ;;  %v3008_v38 = vld [vmem:[#allocation5 + $0x48] sm:$0xff] }
  0x1a   :  { %153 = vmatpush.msra.mxu1 %v2956_v16  ;;  %3816 = vst [vmem:[#allocation16_spill] sm:$0xff] %v2973_v21  ;;  %300 = vmatpush.msrb.mxu2 %v2994_v32  ;;  %v3012_v39 = vld [vmem:[#allocation5 + $0x30] sm:$0xff]  ;;  %v3014_v40 = vld [vmem:[#allocation5 + $0x38] sm:$0xff]  ;;  %v3018_v41 = vld [vmem:[#allocation5 + $0x20] sm:$0xff] }
  0x1b   :  { %134 = vmatpush.msra.mxu0 %v2960_v17  ;;  %3817 = vst [vmem:[#allocation17_spill] sm:$0xff] %v2977_v22  ;;  %320 = vmatpush.msrb.mxu3 %v2998_v33  ;;  %v3020_v42 = vld [vmem:[#allocation5 + $0x28] sm:$0xff]  ;;  %v3033_v63 = vld [vmem:[#allocation5 + $0x10] sm:$0xff]  ;;  %v3035_v0 = vld [vmem:[#allocation5 + $0x18] sm:$0xff] }
  0x1c   :  { %154 = vmatpush.msra.mxu1 %v2965_v18  ;;  %3818 = vst [vmem:[#allocation18_spill] sm:$0xff] %v2987_v26  ;;  %301 = vmatpush.msrb.mxu2 %v3000_v35  ;;  %v3039_v6 = vld [vmem:[#allocation7 + $0x70] sm:$0xff]  ;;  %v3041_v7 = vld [vmem:[#allocation7 + $0x78] sm:$0xff]  ;;  %v3045_v8 = vld [vmem:[#allocation5] sm:$0xff] }
  0x1d   :  { %135 = vmatpush.msra.mxu0 %v2967_v19  ;;  %321 = vmatpush.msrb.mxu3 %v3002_v36  ;;  %v3047_v12 = vld [vmem:[#allocation5 + $0x8] sm:$0xff]  ;;  %v3049_v24 = vld [vmem:[#allocation7 + $0x60] sm:$0xff] }
  0x1e   :  { %155 = vmatpush.msra.mxu1 %v2971_v20  ;;  %302 = vmatpush.msrb.mxu2 %v3006_v37 }
  0x1f   :  { %136 = vmatpush.msra.mxu0 %v2973_v21  ;;  %322 = vmatpush.msrb.mxu3 %v3008_v38 }
  0x20   :  { %137 = vmatmul.f32.vlgmr.msra.gmra.mxu0 %v2847_v23  ;;  %156 = vmatpush.msra.mxu1 %v2977_v22 }
  0x21   :  { %157 = vmatmul.f32.vlgmr.msra.gmra.mxu1 %v2847_v23  ;;  %303 = vmatpush.msrb.mxu2 %v3012_v39 }
  0x22   :  { %323 = vmatpush.msrb.mxu3 %v3014_v40  ;;  %339 = vmatpush.msrb.mxu0 %v3039_v6 }
  0x23   :  { %304 = vmatpush.msrb.mxu2 %v3018_v41  ;;  %359 = vmatpush.msrb.mxu1 %v3041_v7 }
  0x24   :  { %324 = vmatpush.msrb.mxu3 %v3020_v42  ;;  %340 = vmatpush.msrb.mxu0 %v3049_v24 }
  0x25   :  { %305 = vmatpush.msrb.mxu2 %v3033_v63 }
  0x26   :  { %325 = vmatpush.msrb.mxu3 %v3035_v0 }
  0x27   :  { %306 = vmatpush.msrb.mxu2 %v3045_v8 }
  0x28   :  { %326 = vmatpush.msrb.mxu3 %v3047_v12 }
  0x29   :  { %437 = vmatpush.msra.mxu2 %v2911_v1 }
  0x2a   :  { %457 = vmatpush.msra.mxu3 %v2918_v4 }
  0x2b   :  { %438 = vmatpush.msra.mxu2 %v2913_v2 }
  0x2c   :  { %458 = vmatpush.msra.mxu3 %v2935_v9 }
  0x2d   :  { %439 = vmatpush.msra.mxu2 %v2916_v3 }
  0x2e   :  { %459 = vmatpush.msra.mxu3 %v2940_v11 }
  0x2f   :  { %440 = vmatpush.msra.mxu2 %v2937_v10 }
  0x30   :  { %460 = vmatpush.msra.mxu3 %v2944_v13 }
  0x31   :  { %441 = vmatpush.msra.mxu2 %v2951_v15 }
  0x32   :  { %461 = vmatpush.msra.mxu3 %v2956_v16 }
  0x33   :  { %442 = vmatpush.msra.mxu2 %v2960_v17 }
  0x34   :  { %462 = vmatpush.msra.mxu3 %v2965_v18 }
  0x35   :  { %443 = vmatpush.msra.mxu2 %v2967_v19 }
  0x36   :  { %463 = vmatpush.msra.mxu3 %v2971_v20 }
  0x37   :  { %444 = vmatpush.msra.mxu2 %v2973_v21 }
  0x38   :  { %464 = vmatpush.msra.mxu3 %v2977_v22 }
  0x98   :  { %v193_v25 = vpop.f32.mrf.mxu2 }
  0x9a   :  { %v213_v46 = vpop.f32.mrf.mxu3 }
  0x9d   :  { %v138_v27 = vpop.f32.mrf.mxu0 }
  0x9e   :  { %v194_v28 = vadd.f32 %v193_v25, %v138_v27  ;;  %v158_v45 = vpop.f32.mrf.mxu1  ;;  %v3053_v25 = vld [vmem:[#allocation7 + $0x68] sm:$0xff]  ;;  %v3055_v27 = vld [vmem:[#allocation7 + $0x50] sm:$0xff] }
  0x9f   :  { %v214_v47 = vadd.f32 %v213_v46, %v158_v45  ;;  %360 = vmatpush.msrb.mxu1 %v3053_v25  ;;  %341 = vmatpush.msrb.mxu0 %v3055_v27  ;;  %v3073_v45 = vld [vmem:[#allocation7 + $0x38] sm:$0xff] }
  0xa0   :  { %v222_v29 = vadd.f32 %v2987_v26, %v194_v28  ;;  %v3057_v28 = vld [vmem:[#allocation7 + $0x58] sm:$0xff] }
  0xa1   :  { %v223_v50 = vadd.f32 %v3026_v48, %v214_v47  ;;  %361 = vmatpush.msrb.mxu1 %v3057_v28  ;;  %v3085_v47 = vld [vmem:[#allocation7 + $0x20] sm:$0xff] }
  0xa2   :  { %v2371_v34 = vmul.f32 -1.442695, %v222_v29 }
  0xa3   :  { %v2372_v62 = vmul.f32 -1.442695, %v223_v50 }
  0xa4   :  { %2484 = vpow2.f32 %v2371_v34  ;;  %v3063_v34 = vld [vmem:[#allocation7 + $0x40] sm:$0xff] }
  0xa5   :  { %342 = vmatpush.msrb.mxu0 %v3063_v34 }
  0xaa   :  { %v2485_v43 = vpop.eup %2484 }
  0xab   :  { %v230_v44 = vadd.f32 1.0, %v2485_v43  ;;  %v3065_v43 = vld [vmem:[#allocation7 + $0x48] sm:$0xff] }
  0xac   :  { %362 = vmatpush.msrb.mxu1 %v3065_v43 }
  0xad   :  { %2486 = vrcp.f32 %v230_v44  ;;  %v243_v53 = vand.u32 2147483648, %v230_v44  ;;  %v241_v55 = vand.u32 2147483647, %v230_v44  ;;  %vm237_vm4 = vweird.f32 %v230_v44 }
  0xae   :  { %2488 = vtanh.f32 %v223_v50  ;;  %363 = vmatpush.msrb.mxu1 %v3073_v45  ;;  %v3089_v50 = vld [vmem:[#allocation7 + $0x10] sm:$0xff] }
  0xaf   :  { %v244_v58 = vor.u32 1.1754944e-38, %v243_v53  ;;  %vm242_vm6 = vcmp.eq.f32.partialorder %v241_v55, 8.507059e+37  ;;  %2490 = vpow2.f32 %v2372_v62  ;;  %v3100_v53 = vld [vmem:[#allocation7 + $0x8] sm:$0xff] }
  0xb0   :  { %3819 = vst [vmem:[#allocation19_spill] sm:$0xff] %v3100_v53  ;;  %v428_v55 = vld [vmem:[%s3771_s0 + $0x9] sm:$0x1] }
  0xb3   :  { %v2487_v49 = vpop.eup %2486 }
  0xb4   :  { %v233_v51 = vmul.f32 %v2487_v49, %v230_v44  ;;  %vm238_vm3 = vweird.f32 %v2487_v49  ;;  %v2489_v57 = vpop.eup %2488  ;;  %v3071_v44 = vld [vmem:[#allocation7 + $0x30] sm:$0xff] }
  0xb5   :  { %vm239_vm5 = vmor %vm237_vm4, %vm238_vm3  ;;  %v2491_v29 = vpop.eup %2490  ;;  %343 = vmatpush.msrb.mxu0 %v3071_v44 }
  0xb6   :  { %v234_v52 = vsub.f32 1.0, %v233_v51  ;;  %v3075_v46 = vadd.f32 1.0, %v2491_v29  ;;  %v3094_v51 = vld [vmem:[#allocation7 + $0x18] sm:$0xff] }
  0xb7   :  { %344 = vmatpush.msrb.mxu0 %v3085_v47 }
  0xb8   :  { %v235_v54 = vmul.f32 %v2487_v49, %v234_v52  ;;  %2492 = vrcp.f32 %v3075_v46  ;;  %v3098_v52 = vld [vmem:[#allocation7] sm:$0xff]  ;;  %vm252_vm7 = vweird.f32 %v3075_v46 }
  0xb9   :  { %345 = vmatpush.msrb.mxu0 %v3089_v50 }
  0xba   :  { %v236_v56 = vadd.f32 %v2487_v49, %v235_v54 }
  0xbb   :  { %346 = vmatpush.msrb.mxu0 %v3098_v52 }
  0xbc   :  { %v240_v59 = vsel %vm239_vm5, %v2487_v49, %v236_v56  ;;  %v3087_v49 = vld [vmem:[#allocation7 + $0x28] sm:$0xff]  ;;  %347 = vmatmul.f32.vlgmr.msrb.gmra.mxu0 %v2847_v23  ;;  %v427_v56 = vld [vmem:[%s3771_s0 + $0x1] sm:$0x1] }
  0xbd   :  { %v3029_v60 = vsel %vm242_vm6, %v244_v58, %v240_v59  ;;  %364 = vmatpush.msrb.mxu1 %v3087_v49  ;;  %2379 = vmatpush.msk.msra.mxu0 %vm169_vm0, %v2924_v5 }
  0xbe   :  { %v264_v61 = vmul.f32 %v2489_v57, %v3029_v60  ;;  %v2493_v54 = vpop.eup %2492  ;;  %v471_v57 = vrot.slane %v428_v55, 7  ;;  %v263_v62 = vmul.f32 0.0, %v3029_v60 }
  0xbf   :  { %365 = vmatpush.msrb.mxu1 %v3094_v51  ;;  %619 = vmatpush.msrb.mxu0 %v3039_v6  ;;  %vm253_vm8 = vweird.f32 %v2493_v54 }
  0xc0   :  { %266 = vrot.lane.b32.xlu0 %v264_v61, %s2848_s3  ;;  %v472_v58 = vsel %vm164_vm1, %v471_v57, %v427_v56  ;;  %v258_v56 = vand.u32 2147483648, %v3075_v46  ;;  %vm254_vm9 = vmor %vm252_vm7, %vm253_vm8 }
  0xc1   :  { %366 = vmatpush.msrb.mxu1 %v3100_v53  ;;  %620 = vmatpush.msrb.mxu0 %v3049_v24 }
  0xc2   :  { %367 = vmatmul.f32.vlgmr.msrb.gmra.mxu1 %v2847_v23  ;;  %v248_v23 = vmul.f32 %v2493_v54, %v3075_v46  ;;  %v259_v60 = vor.u32 1.1754944e-38, %v258_v56 }
  0xc3   :  { %2381 = vmatpush.msk.msra.mxu1 %vm169_vm0, %v2949_v14  ;;  %621 = vmatpush.msrb.mxu0 %v3055_v27 }
  0xc4   :  { %v249_v59 = vsub.f32 1.0, %v248_v23  ;;  %2380 = vmatmul.msk.f32.vlgmr.msra.gmra.mxu0 %vm166_vm2, %v472_v58  ;;  %v256_v23 = vand.u32 2147483647, %v3075_v46 }
  0xc5   :  { %639 = vmatpush.msrb.mxu1 %v3041_v7  ;;  %622 = vmatpush.msrb.mxu0 %v3063_v34 }
  0xc6   :  { %v250_v61 = vmul.f32 %v2493_v54, %v249_v59  ;;  %vm257_vm10 = vcmp.eq.f32.partialorder %v256_v23, 8.507059e+37 }
  0xc7   :  { %640 = vmatpush.msrb.mxu1 %v3053_v25  ;;  %623 = vmatpush.msrb.mxu0 %v3071_v44 }
  0xc8   :  { %v251_v57 = vadd.f32 %v2493_v54, %v250_v61 }
  0xc9   :  { %641 = vmatpush.msrb.mxu1 %v3057_v28  ;;  %624 = vmatpush.msrb.mxu0 %v3085_v47 }
  0xca   :  { %2382 = vmatmul.msk.f32.vlgmr.msra.gmra.mxu1 %vm166_vm2, %v472_v58  ;;  %v255_v58 = vsel %vm254_vm9, %v2493_v54, %v251_v57 }
  0xcb   :  { %642 = vmatpush.msrb.mxu1 %v3065_v43  ;;  %625 = vmatpush.msrb.mxu0 %v3089_v50  ;;  %v260_v59 = vsel %vm257_vm10, %v259_v60, %v255_v58 }
  0xcd   :  { %643 = vmatpush.msrb.mxu1 %v3073_v45  ;;  %626 = vmatpush.msrb.mxu0 %v3098_v52 }
  0xcf   :  { %644 = vmatpush.msrb.mxu1 %v3087_v49  ;;  %2393 = vmatpush.msk.msra.mxu0 %vm169_vm0, %v2924_v5 }
  0xd1   :  { %645 = vmatpush.msrb.mxu1 %v3094_v51 }
  0xd3   :  { %646 = vmatpush.msrb.mxu1 %v3100_v53 }
  0xd5   :  { %2395 = vmatpush.msk.msra.mxu1 %vm169_vm0, %v2949_v14 }
 0x132   :  { %v267_v29 = vpop.permute.xlu0 %266 }
 0x133   :  { %v3142_v55 = vadd.f32 %v267_v29, %v263_v62  ;;  %v371_v62 = vld [vmem:[%s3777_s6] sm:$0x3] }
 0x134   :  { %v3194_v29 = vperm.slane %v371_v62, 0 }
 0x135   :  { %2494 = vtanh.f32 %v3142_v55 }
 0x136   :  { %3820 = vst [vmem:[#allocation20_spill] sm:$0xff] %v3194_v29 }
 0x139   :  { %v348_v54 = vpop.f32.mrf.mxu0 }
 0x13b   :  { %v2495_v46 = vpop.eup %2494 }
 0x13c   :  { %v271_v61 = vmul.f32 %v2495_v46, %v260_v59 }
 0x13e   :  { %2373 = vmatmul.msk.f32.vlgmr.msrb.gmra.mxu2 %vm117_vm11, %v271_v61  ;;  %2374 = vmatmul.msk.f32.vlgmr.msrb.gmra.mxu3 %vm117_vm11, %v271_v61 }
 0x13f   :  { %576 = vmatpush.msrb.mxu2 %v2990_v30  ;;  %596 = vmatpush.msrb.mxu3 %v2992_v31 }
 0x141   :  { %577 = vmatpush.msrb.mxu2 %v2994_v32  ;;  %597 = vmatpush.msrb.mxu3 %v2998_v33  ;;  %v492_v58 = vpop.f32.mrf.mxu0 }
 0x143   :  { %578 = vmatpush.msrb.mxu2 %v3000_v35  ;;  %598 = vmatpush.msrb.mxu3 %v3002_v36 }
 0x145   :  { %579 = vmatpush.msrb.mxu2 %v3006_v37  ;;  %599 = vmatpush.msrb.mxu3 %v3008_v38 }
 0x146   :  { %2377 = vmatmul.msk.f32.vlgmr.msra.gmra.mxu2 %vm117_vm11, %v271_v61  ;;  %2378 = vmatmul.msk.f32.vlgmr.msra.gmra.mxu3 %vm117_vm11, %v271_v61 }
 0x147   :  { %580 = vmatpush.msrb.mxu2 %v3012_v39  ;;  %600 = vmatpush.msrb.mxu3 %v3014_v40 }
 0x149   :  { %581 = vmatpush.msrb.mxu2 %v3018_v41  ;;  %601 = vmatpush.msrb.mxu3 %v3020_v42 }
 0x14b   :  { %582 = vmatpush.msrb.mxu2 %v3033_v63  ;;  %602 = vmatpush.msrb.mxu3 %v3035_v0 }
 0x14d   :  { %583 = vmatpush.msrb.mxu2 %v3045_v8  ;;  %603 = vmatpush.msrb.mxu3 %v3047_v12 }
 0x14f   :  { %711 = vmatpush.msra.mxu2 %v2911_v1  ;;  %731 = vmatpush.msra.mxu3 %v2918_v4 }
 0x151   :  { %712 = vmatpush.msra.mxu2 %v2913_v2  ;;  %732 = vmatpush.msra.mxu3 %v2935_v9 }
 0x153   :  { %713 = vmatpush.msra.mxu2 %v2916_v3  ;;  %733 = vmatpush.msra.mxu3 %v2940_v11 }
 0x155   :  { %714 = vmatpush.msra.mxu2 %v2937_v10  ;;  %734 = vmatpush.msra.mxu3 %v2944_v13 }
 0x157   :  { %715 = vmatpush.msra.mxu2 %v2951_v15  ;;  %735 = vmatpush.msra.mxu3 %v2956_v16 }
 0x159   :  { %716 = vmatpush.msra.mxu2 %v2960_v17  ;;  %736 = vmatpush.msra.mxu3 %v2965_v18  ;;  %v3198_v18 = vperm.slane %v371_v62, 1 }
 0x15b   :  { %717 = vmatpush.msra.mxu2 %v2967_v19  ;;  %737 = vmatpush.msra.mxu3 %v2971_v20  ;;  %v368_v20 = vpop.f32.mrf.mxu1  ;;  %3821 = vst [vmem:[#allocation21_spill] sm:$0xff] %v3198_v18 }
 0x15d   :  { %718 = vmatpush.msra.mxu2 %v2973_v21  ;;  %738 = vmatpush.msra.mxu3 %v2977_v22 }
 0x1c1   :  { %v308_v56 = vpop.f32.mrf.mxu2  ;;  %v328_v22 = vpop.f32.mrf.mxu3 }
 0x1c2   :  { %v349_v57 = vadd.f32 %v348_v54, %v308_v56  ;;  %v369_v5 = vadd.f32 %v368_v20, %v328_v22 }
 0x1c4   :  { %v377_v23 = vadd.f32 %v3194_v29, %v349_v57  ;;  %v378_v57 = vadd.f32 %v3198_v18, %v369_v5  ;;  %v512_v29 = vpop.f32.mrf.mxu1 }
 0x1c6   :  { %v2375_v60 = vmul.f32 -1.442695, %v377_v23 }
 0x1c8   :  { %2496 = vpow2.f32 %v2375_v60 }
 0x1c9   :  { %v446_v46 = vpop.f32.mrf.mxu2  ;;  %v466_v60 = vpop.f32.mrf.mxu3 }
 0x1ca   :  { %v493_v59 = vadd.f32 %v492_v58, %v446_v46 }
 0x1cc   :  { %v515_v61 = vadd.f32 %v493_v59, %v2987_v26  ;;  %v513_v59 = vadd.f32 %v512_v29, %v466_v60 }
 0x1ce   :  { %v2497_v21 = vpop.eup %2496  ;;  %v2383_v19 = vmul.f32 -1.442695, %v515_v61  ;;  %v516_v22 = vadd.f32 %v513_v59, %v3026_v48 }
 0x1cf   :  { %v385_v14 = vadd.f32 1.0, %v2497_v21 }
 0x1d0   :  { %2498 = vpow2.f32 %v2383_v19 }
 0x1d1   :  { %2500 = vrcp.f32 %v385_v14  ;;  %v398_v26 = vand.u32 2147483648, %v385_v14  ;;  %v396_v19 = vand.u32 2147483647, %v385_v14  ;;  %vm392_vm13 = vweird.f32 %v385_v14 }
 0x1d3   :  { %v399_v62 = vor.u32 1.1754944e-38, %v398_v26  ;;  %vm397_vm15 = vcmp.eq.f32.partialorder %v396_v19, 8.507059e+37 }
 0x1d6   :  { %v2499_v54 = vpop.eup %2498 }
 0x1d7   :  { %v2501_v56 = vpop.eup %2500  ;;  %v523_v23 = vadd.f32 1.0, %v2499_v54 }
 0x1d8   :  { %v388_v58 = vmul.f32 %v2501_v56, %v385_v14  ;;  %vm393_vm12 = vweird.f32 %v2501_v56 }
 0x1d9   :  { %2502 = vrcp.f32 %v523_v23  ;;  %vm394_vm14 = vmor %vm392_vm13, %vm393_vm12  ;;  %v536_v29 = vand.u32 2147483648, %v523_v23  ;;  %vm530_vm4 = vweird.f32 %v523_v23 }
 0x1da   :  { %v389_v46 = vsub.f32 1.0, %v388_v58  ;;  %2504 = vtanh.f32 %v378_v57 }
 0x1db   :  { %2506 = vtanh.f32 %v516_v22  ;;  %v537_v59 = vor.u32 1.1754944e-38, %v536_v29 }
 0x1dc   :  { %v390_v61 = vmul.f32 %v2501_v56, %v389_v46  ;;  %v534_v46 = vand.u32 2147483647, %v523_v23 }
 0x1de   :  { %v391_v21 = vadd.f32 %v2501_v56, %v390_v61  ;;  %vm535_vm6 = vcmp.eq.f32.partialorder %v534_v46, 8.507059e+37 }
 0x1df   :  { %v2503_v20 = vpop.eup %2502 }
 0x1e0   :  { %v395_v5 = vsel %vm394_vm14, %v2501_v56, %v391_v21  ;;  %v526_v54 = vmul.f32 %v2503_v20, %v523_v23  ;;  %v2505_v18 = vpop.eup %2504  ;;  %vm531_vm3 = vweird.f32 %v2503_v20  ;;  %v2384_v21 = vmul.f32 -1.442695, %v516_v22 }
 0x1e1   :  { %v400_v17 = vsel %vm397_vm15, %v399_v62, %v395_v5  ;;  %vm532_vm5 = vmor %vm530_vm4, %vm531_vm3  ;;  %v2507_v26 = vpop.eup %2506 }
 0x1e2   :  { %v419_v53 = vmul.f32 %v2505_v18, %v400_v17  ;;  %v527_v58 = vsub.f32 1.0, %v526_v54  ;;  %v2376_v18 = vmul.f32 -1.442695, %v378_v57 }
 0x1e4   :  { %421 = vrot.lane.b32.xlu1 %v419_v53, %s2848_s3  ;;  %v528_v60 = vmul.f32 %v2503_v20, %v527_v58  ;;  %2508 = vpow2.f32 %v2376_v18 }
 0x1e5   :  { %2510 = vpow2.f32 %v2384_v21 }
 0x1e6   :  { %v529_v14 = vadd.f32 %v2503_v20, %v528_v60 }
 0x1e8   :  { %v533_v61 = vsel %vm532_vm5, %v2503_v20, %v529_v14  ;;  %v418_v14 = vmul.f32 0.0, %v400_v17 }
 0x1e9   :  { %v538_v56 = vsel %vm535_vm6, %v537_v59, %v533_v61 }
 0x1ea   :  { %v557_v19 = vmul.f32 %v2507_v26, %v538_v56  ;;  %v2509_v62 = vpop.eup %2508 }
 0x1eb   :  { %v386_v53 = vadd.f32 1.0, %v2509_v62  ;;  %v2511_v5 = vpop.eup %2510 }
 0x1ec   :  { %559 = vrot.lane.b32.xlu0 %v557_v19, %s2848_s3  ;;  %v524_v54 = vadd.f32 1.0, %v2511_v5  ;;  %v556_v5 = vmul.f32 %v538_v56, %v3142_v55 }
 0x1ed   :  { %2512 = vrcp.f32 %v386_v53  ;;  %v413_v22 = vand.u32 2147483648, %v386_v53  ;;  %vm407_vm8 = vweird.f32 %v386_v53  ;;  %v411_v19 = vand.u32 2147483647, %v386_v53 }
 0x1ee   :  { %2514 = vrcp.f32 %v524_v54  ;;  %vm545_vm13 = vweird.f32 %v524_v54 }
 0x1ef   :  { %v414_v62 = vor.u32 1.1754944e-38, %v413_v22  ;;  %vm412_vm10 = vcmp.eq.f32.partialorder %v411_v19, 8.507059e+37 }
 0x1f3   :  { %v2513_v58 = vpop.eup %2512 }
 0x1f4   :  { %v403_v23 = vmul.f32 %v2513_v58, %v386_v53  ;;  %v2515_v20 = vpop.eup %2514  ;;  %vm408_vm7 = vweird.f32 %v2513_v58  ;;  %v702_v53 = vld [vmem:[%s3771_s0 + $0xa] sm:$0x1] }
 0x1f5   :  { %v541_v60 = vmul.f32 %v2515_v20, %v524_v54  ;;  %vm409_vm9 = vmor %vm407_vm8, %vm408_vm7  ;;  %vm546_vm12 = vweird.f32 %v2515_v20  ;;  %v745_v56 = vrot.slane %v702_v53, 7 }
 0x1f6   :  { %v404_v29 = vsub.f32 1.0, %v403_v23  ;;  %vm547_vm14 = vmor %vm545_vm13, %vm546_vm12 }
 0x1f7   :  { %v542_v57 = vsub.f32 1.0, %v541_v60 }
 0x1f8   :  { %v405_v46 = vmul.f32 %v2513_v58, %v404_v29 }
 0x1f9   :  { %v543_v21 = vmul.f32 %v2515_v20, %v542_v57 }
 0x1fa   :  { %v406_v26 = vadd.f32 %v2513_v58, %v405_v46 }
 0x1fb   :  { %v544_v46 = vadd.f32 %v2515_v20, %v543_v21 }
 0x1fc   :  { %v410_v18 = vsel %vm409_vm9, %v2513_v58, %v406_v26  ;;  %v549_v58 = vand.u32 2147483647, %v524_v54  ;;  %v701_v26 = vld [vmem:[%s3771_s0 + $0x2] sm:$0x1] }
 0x1fd   :  { %v415_v29 = vsel %vm412_vm10, %v414_v62, %v410_v18  ;;  %v548_v55 = vsel %vm547_vm14, %v2515_v20, %v544_v46  ;;  %v3832_v62 = vld [vmem:[#allocation18_spill] sm:$0xff] }
 0x1fe   :  { %vm550_vm15 = vcmp.eq.f32.partialorder %v549_v58, 8.507059e+37 }
 0x256   :  { %v422_v59 = vpop.permute.xlu1 %421 }
 0x257   :  { %v3204_v61 = vadd.f32 %v422_v59, %v418_v14  ;;  %v551_v59 = vand.u32 2147483648, %v524_v54 }
 0x259   :  { %2516 = vtanh.f32 %v3204_v61  ;;  %v552_v57 = vor.u32 1.1754944e-38, %v551_v59 }
 0x25b   :  { %v553_v22 = vsel %vm550_vm15, %v552_v57, %v548_v55  ;;  %v3833_v55 = vld [vmem:[#allocation21_spill] sm:$0xff] }
 0x25e   :  { %v560_v23 = vpop.permute.xlu0 %559 }
 0x25f   :  { %v2517_v17 = vpop.eup %2516  ;;  %v3208_v14 = vadd.f32 %v560_v23, %v556_v5 }
 0x260   :  { %v426_v60 = vmul.f32 %v2517_v17, %v415_v29 }
 0x261   :  { %2518 = vtanh.f32 %v3208_v14 }
 0x262   :  { %2387 = vmatmul.msk.f32.vlgmr.msrb.gmra.mxu0 %vm117_vm11, %v426_v60  ;;  %2388 = vmatmul.msk.f32.vlgmr.msrb.gmra.mxu1 %vm117_vm11, %v426_v60 }
 0x263   :  { %850 = vmatpush.msrb.mxu0 %v2990_v30  ;;  %870 = vmatpush.msrb.mxu1 %v2992_v31  ;;  %v746_v31 = vsel %vm164_vm1, %v745_v56, %v701_v26 }
 0x265   :  { %851 = vmatpush.msrb.mxu0 %v2994_v32  ;;  %871 = vmatpush.msrb.mxu1 %v2998_v33 }
 0x267   :  { %v2519_v54 = vpop.eup %2518  ;;  %852 = vmatpush.msrb.mxu0 %v3000_v35  ;;  %872 = vmatpush.msrb.mxu1 %v3002_v36  ;;  %v3831_v35 = vld [vmem:[#allocation20_spill] sm:$0xff] }
 0x268   :  { %v564_v30 = vmul.f32 %v2519_v54, %v553_v22 }
 0x269   :  { %853 = vmatpush.msrb.mxu0 %v3006_v37  ;;  %873 = vmatpush.msrb.mxu1 %v3008_v38 }
 0x26a   :  { %2385 = vmatmul.msk.f32.vlgmr.msrb.gmra.mxu2 %vm117_vm11, %v564_v30  ;;  %2386 = vmatmul.msk.f32.vlgmr.msrb.gmra.mxu3 %vm117_vm11, %v564_v30 }
 0x26b   :  { %2394 = vmatmul.msk.f32.vlgmr.msra.gmra.mxu0 %vm166_vm2, %v746_v31  ;;  %2396 = vmatmul.msk.f32.vlgmr.msra.gmra.mxu1 %vm166_vm2, %v746_v31 }
 0x26c   :  { %854 = vmatpush.msrb.mxu0 %v3012_v39  ;;  %874 = vmatpush.msrb.mxu1 %v3014_v40 }
 0x26d   :  { %893 = vmatpush.msrb.mxu2 %v3039_v6  ;;  %913 = vmatpush.msrb.mxu3 %v3041_v7 }
 0x26e   :  { %855 = vmatpush.msrb.mxu0 %v3018_v41  ;;  %875 = vmatpush.msrb.mxu1 %v3020_v42 }
 0x26f   :  { %894 = vmatpush.msrb.mxu2 %v3049_v24  ;;  %914 = vmatpush.msrb.mxu3 %v3053_v25 }
 0x270   :  { %856 = vmatpush.msrb.mxu0 %v3033_v63  ;;  %876 = vmatpush.msrb.mxu1 %v3035_v0 }
 0x271   :  { %895 = vmatpush.msrb.mxu2 %v3055_v27  ;;  %915 = vmatpush.msrb.mxu3 %v3057_v28 }
 0x272   :  { %2391 = vmatmul.msk.f32.vlgmr.msra.gmra.mxu2 %vm117_vm11, %v564_v30  ;;  %2392 = vmatmul.msk.f32.vlgmr.msra.gmra.mxu3 %vm117_vm11, %v564_v30 }
 0x273   :  { %857 = vmatpush.msrb.mxu0 %v3045_v8  ;;  %877 = vmatpush.msrb.mxu1 %v3047_v12 }
 0x274   :  { %896 = vmatpush.msrb.mxu2 %v3063_v34  ;;  %916 = vmatpush.msrb.mxu3 %v3065_v43 }
 0x275   :  { %985 = vmatpush.msra.mxu0 %v2911_v1  ;;  %1005 = vmatpush.msra.mxu1 %v2918_v4  ;;  %v3822_v1 = vld [vmem:[#allocation19_spill] sm:$0xff]  ;;  %v3825_v4 = vld [vmem:[#allocation10_spill] sm:$0xff] }
 0x276   :  { %897 = vmatpush.msrb.mxu2 %v3071_v44  ;;  %917 = vmatpush.msrb.mxu3 %v3073_v45 }
 0x277   :  { %986 = vmatpush.msra.mxu0 %v2913_v2  ;;  %1006 = vmatpush.msra.mxu1 %v2935_v9  ;;  %v3823_v2 = vld [vmem:[#allocation12_spill] sm:$0xff]  ;;  %v3826_v9 = vld [vmem:[#allocation11_spill] sm:$0xff] }
 0x278   :  { %898 = vmatpush.msrb.mxu2 %v3085_v47  ;;  %918 = vmatpush.msrb.mxu3 %v3087_v49 }
 0x279   :  { %987 = vmatpush.msra.mxu0 %v2916_v3  ;;  %1007 = vmatpush.msra.mxu1 %v2940_v11  ;;  %v3824_v3 = vld [vmem:[#allocation13_spill] sm:$0xff]  ;;  %v3828_v11 = vld [vmem:[#allocation15_spill] sm:$0xff] }
 0x27a   :  { %899 = vmatpush.msrb.mxu2 %v3089_v50  ;;  %919 = vmatpush.msrb.mxu3 %v3094_v51 }
 0x27b   :  { %988 = vmatpush.msra.mxu0 %v2937_v10  ;;  %1008 = vmatpush.msra.mxu1 %v2944_v13  ;;  %v3827_v10 = vld [vmem:[#allocation14_spill] sm:$0xff]  ;;  %v3829_v13 = vld [vmem:[#allocation16_spill] sm:$0xff] }
 0x27c   :  { %900 = vmatpush.msrb.mxu2 %v3098_v52  ;;  %920 = vmatpush.msrb.mxu3 %v3822_v1 }
 0x27d   :  { %989 = vmatpush.msra.mxu0 %v2951_v15  ;;  %1009 = vmatpush.msra.mxu1 %v2956_v16  ;;  %v3830_v15 = vld [vmem:[#allocation17_spill] sm:$0xff] }
 0x27e   :  { %2407 = vmatpush.msk.msra.mxu2 %vm169_vm0, %v3825_v4  ;;  %2409 = vmatpush.msk.msra.mxu3 %vm169_vm0, %v3826_v9 }
 0x27f   :  { %990 = vmatpush.msra.mxu0 %v3823_v2  ;;  %1010 = vmatpush.msra.mxu1 %v3824_v3 }
 0x281   :  { %991 = vmatpush.msra.mxu0 %v3827_v10  ;;  %1011 = vmatpush.msra.mxu1 %v3828_v11 }
 0x283   :  { %992 = vmatpush.msra.mxu0 %v3829_v13  ;;  %1012 = vmatpush.msra.mxu1 %v3830_v15 }
 0x2df   :  { %v628_v16 = vpop.f32.mrf.mxu0  ;;  %v648_v46 = vpop.f32.mrf.mxu1 }
 0x2e8   :  { %v766_v19 = vpop.f32.mrf.mxu0  ;;  %v786_v54 = vpop.f32.mrf.mxu1 }
 0x2ed   :  { %v585_v32 = vpop.f32.mrf.mxu2  ;;  %v605_v17 = vpop.f32.mrf.mxu3 }
 0x2ee   :  { %v629_v33 = vadd.f32 %v628_v16, %v585_v32  ;;  %v649_v59 = vadd.f32 %v648_v46, %v605_v17 }
 0x2f0   :  { %v651_v36 = vadd.f32 %v629_v33, %v3831_v35  ;;  %v652_v56 = vadd.f32 %v649_v59, %v3833_v55 }
 0x2f2   :  { %v2389_v20 = vmul.f32 -1.442695, %v651_v36 }
 0x2f4   :  { %2520 = vpow2.f32 %v2389_v20 }
 0x2f5   :  { %v720_v18 = vpop.f32.mrf.mxu2  ;;  %v740_v26 = vpop.f32.mrf.mxu3 }
 0x2f6   :  { %v767_v21 = vadd.f32 %v766_v19, %v720_v18  ;;  %v787_v31 = vadd.f32 %v786_v54, %v740_v26  ;;  %v2390_v26 = vmul.f32 -1.442695, %v652_v56 }
 0x2f8   :  { %v789_v5 = vadd.f32 %v767_v21, %v3832_v62  ;;  %v790_v11 = vadd.f32 %v787_v31, %v3026_v48 }
 0x2fa   :  { %v2521_v23 = vpop.eup %2520  ;;  %v2397_v29 = vmul.f32 -1.442695, %v789_v5  ;;  %v2398_v59 = vmul.f32 -1.442695, %v790_v11 }
 0x2fb   :  { %v659_v60 = vadd.f32 1.0, %v2521_v23 }
 0x2fc   :  { %2522 = vpow2.f32 %v2397_v29 }
 0x2fd   :  { %2524 = vrcp.f32 %v659_v60  ;;  %v672_v2 = vand.u32 2147483648, %v659_v60  ;;  %v670_v4 = vand.u32 2147483647, %v659_v60  ;;  %vm666_vm4 = vweird.f32 %v659_v60 }
 0x2ff   :  { %v673_v13 = vor.u32 1.1754944e-38, %v672_v2  ;;  %vm671_vm6 = vcmp.eq.f32.partialorder %v670_v4, 8.507059e+37 }
 0x302   :  { %v2523_v53 = vpop.eup %2522 }
 0x303   :  { %v2525_v58 = vpop.eup %2524  ;;  %v797_v57 = vadd.f32 1.0, %v2523_v53 }
 0x304   :  { %v662_v22 = vmul.f32 %v2525_v58, %v659_v60  ;;  %vm667_vm3 = vweird.f32 %v2525_v58 }
 0x305   :  { %2526 = vrcp.f32 %v797_v57  ;;  %vm668_vm5 = vmor %vm666_vm4, %vm667_vm3  ;;  %v810_v19 = vand.u32 2147483648, %v797_v57  ;;  %v808_v21 = vand.u32 2147483647, %v797_v57  ;;  %vm804_vm8 = vweird.f32 %v797_v57 }
 0x306   :  { %v663_v30 = vsub.f32 1.0, %v662_v22  ;;  %2528 = vtanh.f32 %v652_v56 }
 0x307   :  { %2530 = vtanh.f32 %v790_v11  ;;  %v811_v23 = vor.u32 1.1754944e-38, %v810_v19  ;;  %vm809_vm10 = vcmp.eq.f32.partialorder %v808_v21, 8.507059e+37 }
 0x308   :  { %v664_v3 = vmul.f32 %v2525_v58, %v663_v30  ;;  %2532 = vpow2.f32 %v2398_v59  ;;  %v3401_v59 = vld [vmem:[#allocation3 + $0x10] sm:$0xff] }
 0x309   :  { %3840 = vst [vmem:[#allocation15_spill] sm:$0xff] %v3401_v59 }
 0x30a   :  { %v665_v9 = vadd.f32 %v2525_v58, %v664_v3 }
 0x30b   :  { %v2527_v10 = vpop.eup %2526 }
 0x30c   :  { %v669_v15 = vsel %vm668_vm5, %v2525_v58, %v665_v9  ;;  %v800_v16 = vmul.f32 %v2527_v10, %v797_v57  ;;  %v2529_v32 = vpop.eup %2528  ;;  %vm805_vm7 = vweird.f32 %v2527_v10 }
 0x30d   :  { %v674_v33 = vsel %vm671_vm6, %v673_v13, %v669_v15  ;;  %vm806_vm9 = vmor %vm804_vm8, %vm805_vm7  ;;  %v2531_v29 = vpop.eup %2530 }
 0x30e   :  { %v693_v36 = vmul.f32 %v2529_v32, %v674_v33  ;;  %v801_v20 = vsub.f32 1.0, %v800_v16  ;;  %v2533_v53 = vpop.eup %2532  ;;  %v692_v21 = vmul.f32 %v674_v33, %v3204_v61  ;;  %v3350_v33 = vld [vmem:[#allocation5 + $0x58] sm:$0xff] }
 0x30f   :  { %v798_v58 = vadd.f32 1.0, %v2533_v53  ;;  %v3404_v53 = vld [vmem:[#allocation3 + $0x18] sm:$0xff] }
 0x310   :  { %695 = vrot.lane.b32.xlu1 %v693_v36, %s2848_s3  ;;  %v802_v18 = vmul.f32 %v2527_v10, %v801_v20  ;;  %3841 = vst [vmem:[#allocation16_spill] sm:$0xff] %v3404_v53 }
 0x311   :  { %2534 = vrcp.f32 %v798_v58  ;;  %v825_v13 = vand.u32 2147483648, %v798_v58  ;;  %vm819_vm13 = vweird.f32 %v798_v58  ;;  %v823_v56 = vand.u32 2147483647, %v798_v58 }
 0x312   :  { %v803_v5 = vadd.f32 %v2527_v10, %v802_v18  ;;  %2536 = vpow2.f32 %v2390_v26  ;;  %v3410_v26 = vld [vmem:[#allocation3 + $0x8] sm:$0xff] }
 0x313   :  { %v826_v32 = vor.u32 1.1754944e-38, %v825_v13  ;;  %vm824_vm15 = vcmp.eq.f32.partialorder %v823_v56, 8.507059e+37  ;;  %3843 = vst [vmem:[#allocation22_spill] sm:$0xff] %v3410_v26 }
 0x314   :  { %v807_v17 = vsel %vm806_vm9, %v2527_v10, %v803_v5 }
 0x315   :  { %v812_v60 = vsel %vm809_vm10, %v811_v23, %v807_v17 }
 0x316   :  { %v831_v46 = vmul.f32 %v2531_v29, %v812_v60  ;;  %v830_v3 = vmul.f32 %v812_v60, %v3208_v14  ;;  %v3395_v60 = vld [vmem:[#allocation3 + $0x20] sm:$0xff] }
 0x317   :  { %v2535_v54 = vpop.eup %2534  ;;  %3838 = vst [vmem:[#allocation11_spill] sm:$0xff] %v3395_v60 }
 0x318   :  { %833 = vrot.lane.b32.xlu2 %v831_v46, %s2848_s3  ;;  %v2537_v22 = vpop.eup %2536  ;;  %v815_v30 = vmul.f32 %v2535_v54, %v798_v58  ;;  %vm820_vm12 = vweird.f32 %v2535_v54  ;;  %v3398_v46 = vld [vmem:[#allocation3 + $0x28] sm:$0xff]  ;;  %v3407_v58 = vld [vmem:[#allocation3] sm:$0xff] }
 0x319   :  { %v660_v57 = vadd.f32 1.0, %v2537_v22  ;;  %vm821_vm14 = vmor %vm819_vm13, %vm820_vm12  ;;  %3839 = vst [vmem:[#allocation14_spill] sm:$0xff] %v3398_v46 }
 0x31a   :  { %v816_v31 = vsub.f32 1.0, %v815_v30  ;;  %3842 = vst [vmem:[#allocation17_spill] sm:$0xff] %v3407_v58 }
 0x31b   :  { %2538 = vrcp.f32 %v660_v57  ;;  %v687_v29 = vand.u32 2147483648, %v660_v57  ;;  %vm681_vm4 = vweird.f32 %v660_v57 }
 0x31c   :  { %v817_v2 = vmul.f32 %v2535_v54, %v816_v31 }
 0x31e   :  { %v818_v10 = vadd.f32 %v2535_v54, %v817_v2 }
 0x320   :  { %v822_v16 = vsel %vm821_vm14, %v2535_v54, %v818_v10 }
 0x321   :  { %v2539_v11 = vpop.eup %2538  ;;  %v827_v20 = vsel %vm824_vm15, %v826_v32, %v822_v16 }
 0x322   :  { %v677_v15 = vmul.f32 %v2539_v11, %v660_v57  ;;  %vm682_vm3 = vweird.f32 %v2539_v11 }
 0x323   :  { %vm683_vm5 = vmor %vm681_vm4, %vm682_vm3 }
 0x324   :  { %v678_v19 = vsub.f32 1.0, %v677_v15 }
 0x326   :  { %v679_v18 = vmul.f32 %v2539_v11, %v678_v19 }
 0x328   :  { %v680_v17 = vadd.f32 %v2539_v11, %v679_v18 }
 0x372   :  { %v834_v4 = vpop.permute.xlu2 %833 }
 0x373   :  { %v3285_v9 = vadd.f32 %v834_v4, %v830_v3 }
 0x375   :  { %2540 = vtanh.f32 %v3285_v9 }
 0x37b   :  { %v2541_v36 = vpop.eup %2540 }
 0x37c   :  { %v838_v14 = vmul.f32 %v2541_v36, %v827_v20 }
 0x37e   :  { %2399 = vmatmul.msk.f32.vlgmr.msrb.gmra.mxu0 %vm117_vm11, %v838_v14  ;;  %2400 = vmatmul.msk.f32.vlgmr.msrb.gmra.mxu1 %vm117_vm11, %v838_v14 }
 0x37f   :  { %1167 = vmatpush.msrb.mxu0 %v3039_v6  ;;  %1187 = vmatpush.msrb.mxu1 %v3041_v7  ;;  %v685_v6 = vand.u32 2147483647, %v660_v57  ;;  %v684_v7 = vsel %vm683_vm5, %v2539_v11, %v680_v17 }
 0x381   :  { %1168 = vmatpush.msrb.mxu0 %v3049_v24  ;;  %1188 = vmatpush.msrb.mxu1 %v3053_v25  ;;  %v688_v24 = vor.u32 1.1754944e-38, %v687_v29  ;;  %vm686_vm6 = vcmp.eq.f32.partialorder %v685_v6, 8.507059e+37 }
 0x382   :  { %v696_v5 = vpop.permute.xlu1 %695 }
 0x383   :  { %v3295_v23 = vadd.f32 %v696_v5, %v692_v21  ;;  %1169 = vmatpush.msrb.mxu0 %v3055_v27  ;;  %1189 = vmatpush.msrb.mxu1 %v3057_v28  ;;  %v689_v27 = vsel %vm686_vm6, %v688_v24, %v684_v7 }
 0x385   :  { %2542 = vtanh.f32 %v3295_v23  ;;  %1170 = vmatpush.msrb.mxu0 %v3063_v34  ;;  %1190 = vmatpush.msrb.mxu1 %v3065_v43  ;;  %v976_v34 = vld [vmem:[%s3771_s0 + $0xb] sm:$0x1] }
 0x386   :  { %2405 = vmatmul.msk.f32.vlgmr.msra.gmra.mxu0 %vm117_vm11, %v838_v14  ;;  %2406 = vmatmul.msk.f32.vlgmr.msra.gmra.mxu1 %vm117_vm11, %v838_v14  ;;  %v1019_v43 = vrot.slane %v976_v34, 7 }
 0x387   :  { %1171 = vmatpush.msrb.mxu0 %v3071_v44  ;;  %1191 = vmatpush.msrb.mxu1 %v3073_v45  ;;  %v3317_v44 = vld [vmem:[#allocation5 + $0x70] sm:$0xff]  ;;  %v3320_v45 = vld [vmem:[#allocation5 + $0x78] sm:$0xff] }
 0x389   :  { %1172 = vmatpush.msrb.mxu0 %v3085_v47  ;;  %1192 = vmatpush.msrb.mxu1 %v3087_v49  ;;  %v975_v47 = vld [vmem:[%s3771_s0 + $0x3] sm:$0x1] }
 0x38a   :  { %v3329_v49 = vld [vmem:[%s3772_s1] sm:$0x1f]  ;;  %v1020_v61 = vsel %vm164_vm1, %v1019_v43, %v975_v47 }
 0x38b   :  { %v2543_v25 = vpop.eup %2542  ;;  %1173 = vmatpush.msrb.mxu0 %v3089_v50  ;;  %1193 = vmatpush.msrb.mxu1 %v3094_v51  ;;  %v3336_v50 = vld [vmem:[%s3772_s1 + $0x8] sm:$0x1f] }
 0x38c   :  { %v700_v28 = vmul.f32 %v2543_v25, %v689_v27  ;;  %v3340_v51 = vld [vmem:[#allocation5 + $0x60] sm:$0xff] }
 0x38d   :  { %1174 = vmatpush.msrb.mxu0 %v3098_v52  ;;  %1194 = vmatpush.msrb.mxu1 %v3822_v1  ;;  %v3343_v52 = vld [vmem:[#allocation5 + $0x68] sm:$0xff]  ;;  %v3347_v1 = vld [vmem:[#allocation5 + $0x50] sm:$0xff] }
 0x38e   :  { %2401 = vmatmul.msk.f32.vlgmr.msrb.gmra.mxu2 %vm117_vm11, %v700_v28  ;;  %2402 = vmatmul.msk.f32.vlgmr.msrb.gmra.mxu3 %vm117_vm11, %v700_v28 }
 0x38f   :  { %1124 = vmatpush.msrb.mxu2 %v3317_v44  ;;  %1144 = vmatpush.msrb.mxu3 %v3320_v45 }
 0x390   :  { %2421 = vmatpush.msk.msra.mxu0 %vm169_vm0, %v3329_v49  ;;  %2423 = vmatpush.msk.msra.mxu1 %vm169_vm0, %v3336_v50 }
 0x391   :  { %1125 = vmatpush.msrb.mxu2 %v3340_v51  ;;  %1145 = vmatpush.msrb.mxu3 %v3343_v52 }
 0x393   :  { %1126 = vmatpush.msrb.mxu2 %v3347_v1  ;;  %1146 = vmatpush.msrb.mxu3 %v3350_v33 }
 0x395   :  { %1127 = vmatpush.msrb.mxu2 %v3006_v37  ;;  %1147 = vmatpush.msrb.mxu3 %v3008_v38  ;;  %v3365_v37 = vld [vmem:[#allocation3 + $0x70] sm:$0xff]  ;;  %v3368_v38 = vld [vmem:[#allocation3 + $0x78] sm:$0xff] }
 0x396   :  { %2408 = vmatmul.msk.f32.vlgmr.msra.gmra.mxu2 %vm166_vm2, %v1020_v61  ;;  %2410 = vmatmul.msk.f32.vlgmr.msra.gmra.mxu3 %vm166_vm2, %v1020_v61 }
 0x397   :  { %1128 = vmatpush.msrb.mxu2 %v3012_v39  ;;  %1148 = vmatpush.msrb.mxu3 %v3014_v40  ;;  %v3371_v39 = vld [vmem:[#allocation3 + $0x60] sm:$0xff]  ;;  %v3374_v40 = vld [vmem:[#allocation3 + $0x68] sm:$0xff] }
 0x399   :  { %1129 = vmatpush.msrb.mxu2 %v3018_v41  ;;  %1149 = vmatpush.msrb.mxu3 %v3020_v42  ;;  %v3377_v41 = vld [vmem:[#allocation3 + $0x50] sm:$0xff]  ;;  %v3380_v42 = vld [vmem:[#allocation3 + $0x58] sm:$0xff] }
 0x39b   :  { %1130 = vmatpush.msrb.mxu2 %v3033_v63  ;;  %1150 = vmatpush.msrb.mxu3 %v3035_v0  ;;  %v3383_v63 = vld [vmem:[#allocation3 + $0x40] sm:$0xff]  ;;  %v3386_v0 = vld [vmem:[#allocation3 + $0x48] sm:$0xff] }
 0x39c   :  { %3834 = vst [vmem:[#allocation19_spill] sm:$0xff] %v3383_v63 }
 0x39d   :  { %1131 = vmatpush.msrb.mxu2 %v3045_v8  ;;  %1151 = vmatpush.msrb.mxu3 %v3047_v12  ;;  %3835 = vst [vmem:[#allocation12_spill] sm:$0xff] %v3386_v0  ;;  %v3389_v8 = vld [vmem:[#allocation3 + $0x30] sm:$0xff]  ;;  %v3392_v12 = vld [vmem:[#allocation3 + $0x38] sm:$0xff] }
 0x39e   :  { %3836 = vst [vmem:[#allocation13_spill] sm:$0xff] %v3389_v8 }
 0x39f   :  { %1259 = vmatpush.msra.mxu2 %v3365_v37  ;;  %1279 = vmatpush.msra.mxu3 %v3368_v38  ;;  %3837 = vst [vmem:[#allocation10_spill] sm:$0xff] %v3392_v12 }
 0x3a1   :  { %1260 = vmatpush.msra.mxu2 %v3371_v39  ;;  %1280 = vmatpush.msra.mxu3 %v3374_v40 }
 0x3a3   :  { %1261 = vmatpush.msra.mxu2 %v3377_v41  ;;  %1281 = vmatpush.msra.mxu3 %v3380_v42 }
 0x3a5   :  { %1262 = vmatpush.msra.mxu2 %v3383_v63  ;;  %1282 = vmatpush.msra.mxu3 %v3386_v0 }
 0x3a7   :  { %1263 = vmatpush.msra.mxu2 %v3389_v8  ;;  %1283 = vmatpush.msra.mxu3 %v3392_v12 }
 0x3a9   :  { %1264 = vmatpush.msra.mxu2 %v3395_v60  ;;  %1284 = vmatpush.msra.mxu3 %v3398_v46 }
 0x3ab   :  { %1265 = vmatpush.msra.mxu2 %v3401_v59  ;;  %1285 = vmatpush.msra.mxu3 %v3404_v53 }
 0x3ad   :  { %1266 = vmatpush.msra.mxu2 %v3407_v58  ;;  %1286 = vmatpush.msra.mxu3 %v3410_v26 }
 0x3fb   :  { %v859_v54 = vpop.f32.mrf.mxu0  ;;  %v879_v16 = vpop.f32.mrf.mxu1 }
 0x403   :  { %v994_v2 = vpop.f32.mrf.mxu0  ;;  %v1014_v5 = vpop.f32.mrf.mxu1 }
 0x411   :  { %v902_v22 = vpop.f32.mrf.mxu2  ;;  %v922_v13 = vpop.f32.mrf.mxu3 }
 0x412   :  { %v903_v30 = vadd.f32 %v902_v22, %v859_v54  ;;  %v923_v32 = vadd.f32 %v922_v13, %v879_v16 }
 0x414   :  { %v925_v57 = vadd.f32 %v903_v30, %v3831_v35  ;;  %v926_v19 = vadd.f32 %v923_v32, %v3833_v55 }
 0x416   :  { %v2403_v31 = vmul.f32 -1.442695, %v925_v57 }
 0x418   :  { %2544 = vpow2.f32 %v2403_v31 }
 0x419   :  { %v1040_v3 = vpop.f32.mrf.mxu2  ;;  %v1060_v18 = vpop.f32.mrf.mxu3 }
 0x41a   :  { %v1041_v4 = vadd.f32 %v1040_v3, %v994_v2  ;;  %v1061_v29 = vadd.f32 %v1060_v18, %v1014_v5 }
 0x41c   :  { %v1063_v10 = vadd.f32 %v1041_v4, %v3832_v62  ;;  %v1064_v28 = vadd.f32 %v1061_v29, %v3026_v48 }
 0x41e   :  { %v2545_v11 = vpop.eup %2544  ;;  %v2411_v56 = vmul.f32 -1.442695, %v1063_v10 }
 0x41f   :  { %v933_v15 = vadd.f32 1.0, %v2545_v11 }
 0x420   :  { %2546 = vpow2.f32 %v2411_v56 }
 0x421   :  { %2548 = vrcp.f32 %v933_v15  ;;  %v946_v6 = vand.u32 2147483648, %v933_v15  ;;  %v944_v24 = vand.u32 2147483647, %v933_v15  ;;  %vm940_vm8 = vweird.f32 %v933_v15 }
 0x423   :  { %v947_v34 = vor.u32 1.1754944e-38, %v946_v6  ;;  %vm945_vm10 = vcmp.eq.f32.partialorder %v944_v24, 8.507059e+37 }
 0x426   :  { %v2547_v36 = vpop.eup %2546 }
 0x427   :  { %v2549_v20 = vpop.eup %2548  ;;  %v1071_v14 = vadd.f32 1.0, %v2547_v36  ;;  %v2404_v36 = vmul.f32 -1.442695, %v926_v19 }
 0x428   :  { %v936_v21 = vmul.f32 %v2549_v20, %v933_v15  ;;  %vm941_vm7 = vweird.f32 %v2549_v20  ;;  %v2412_v15 = vmul.f32 -1.442695, %v1064_v28 }
 0x429   :  { %2550 = vrcp.f32 %v1071_v14  ;;  %vm942_vm9 = vmor %vm940_vm8, %vm941_vm7  ;;  %v1084_v57 = vand.u32 2147483648, %v1071_v14  ;;  %v1082_v2 = vand.u32 2147483647, %v1071_v14  ;;  %vm1078_vm13 = vweird.f32 %v1071_v14 }
 0x42a   :  { %v937_v17 = vsub.f32 1.0, %v936_v21  ;;  %2552 = vtanh.f32 %v926_v19 }
 0x42b   :  { %2554 = vtanh.f32 %v1064_v28  ;;  %v1085_v4 = vor.u32 1.1754944e-38, %v1084_v57  ;;  %vm1083_vm15 = vcmp.eq.f32.partialorder %v1082_v2, 8.507059e+37  ;;  %v3432_v57 = vld [vmem:[#allocation7 + $0x78] sm:$0xff] }
 0x42c   :  { %v938_v7 = vmul.f32 %v2549_v20, %v937_v17  ;;  %2556 = vpow2.f32 %v2412_v15  ;;  %v3452_v15 = vld [vmem:[#allocation7 + $0x40] sm:$0xff] }
 0x42e   :  { %v939_v25 = vadd.f32 %v2549_v20, %v938_v7 }
 0x42f   :  { %v2551_v27 = vpop.eup %2550 }
 0x430   :  { %v943_v43 = vsel %vm942_vm9, %v2549_v20, %v939_v25  ;;  %v1074_v47 = vmul.f32 %v2551_v27, %v1071_v14  ;;  %v2553_v61 = vpop.eup %2552  ;;  %vm1079_vm12 = vweird.f32 %v2551_v27 }
 0x431   :  { %v948_v54 = vsel %vm945_vm10, %v947_v34, %v943_v43  ;;  %vm1080_vm14 = vmor %vm1078_vm13, %vm1079_vm12  ;;  %v2555_v11 = vpop.eup %2554 }
 0x432   :  { %v967_v22 = vmul.f32 %v2553_v61, %v948_v54  ;;  %v1075_v30 = vsub.f32 1.0, %v1074_v47  ;;  %v2557_v16 = vpop.eup %2556  ;;  %v966_v2 = vmul.f32 %v948_v54, %v3295_v23 }
 0x433   :  { %v1072_v32 = vadd.f32 1.0, %v2557_v16  ;;  %v3455_v16 = vld [vmem:[#allocation7 + $0x48] sm:$0xff] }
 0x434   :  { %969 = vrot.lane.b32.xlu0 %v967_v22, %s2848_s3  ;;  %v1076_v31 = vmul.f32 %v2551_v27, %v1075_v30  ;;  %v3429_v30 = vld [vmem:[#allocation7 + $0x70] sm:$0xff] }
 0x435   :  { %2558 = vrcp.f32 %v1072_v32  ;;  %v1099_v19 = vand.u32 2147483648, %v1072_v32  ;;  %vm1093_vm4 = vweird.f32 %v1072_v32 }
 0x436   :  { %v1077_v3 = vadd.f32 %v2551_v27, %v1076_v31  ;;  %2560 = vpow2.f32 %v2404_v36  ;;  %v3462_v36 = vld [vmem:[#allocation7 + $0x30] sm:$0xff] }
 0x437   :  { %v1100_v43 = vor.u32 1.1754944e-38, %v1099_v19  ;;  %v1250_v19 = vld [vmem:[%s3771_s0 + $0xc] sm:$0x1] }
 0x438   :  { %v1081_v10 = vsel %vm1080_vm14, %v2551_v27, %v1077_v3  ;;  %v1097_v27 = vand.u32 2147483647, %v1072_v32  ;;  %v3436_v3 = vld [vmem:[#allocation7 + $0x60] sm:$0xff] }
 0x439   :  { %v1086_v13 = vsel %vm1083_vm15, %v1085_v4, %v1081_v10  ;;  %v3439_v4 = vld [vmem:[#allocation7 + $0x68] sm:$0xff] }
 0x43a   :  { %v1105_v56 = vmul.f32 %v2555_v11, %v1086_v13  ;;  %v1104_v29 = vmul.f32 %v1086_v13, %v3285_v9  ;;  %vm1098_vm6 = vcmp.eq.f32.partialorder %v1097_v27, 8.507059e+37  ;;  %v3444_v13 = vld [vmem:[#allocation7 + $0x50] sm:$0xff]  ;;  %v3483_v27 = vld [vmem:[#allocation7] sm:$0xff] }
 0x43b   :  { %v2559_v20 = vpop.eup %2558 }
 0x43c   :  { %1107 = vrot.lane.b32.xlu2 %v1105_v56, %s2848_s3  ;;  %v2561_v18 = vpop.eup %2560  ;;  %v1089_v21 = vmul.f32 %v2559_v20, %v1072_v32  ;;  %vm1094_vm3 = vweird.f32 %v2559_v20  ;;  %v3447_v56 = vld [vmem:[#allocation7 + $0x58] sm:$0xff] }
 0x43d   :  { %v3419_v14 = vadd.f32 1.0, %v2561_v18  ;;  %vm1095_vm5 = vmor %vm1093_vm4, %vm1094_vm3 }
 0x43e   :  { %v1090_v5 = vsub.f32 1.0, %v1089_v21 }
 0x43f   :  { %2562 = vrcp.f32 %v3419_v14  ;;  %v961_v54 = vand.u32 2147483648, %v3419_v14  ;;  %vm955_vm8 = vweird.f32 %v3419_v14  ;;  %v959_v32 = vand.u32 2147483647, %v3419_v14 }
 0x440   :  { %v1091_v17 = vmul.f32 %v2559_v20, %v1090_v5  ;;  %v3468_v5 = vld [vmem:[#allocation7 + $0x20] sm:$0xff] }
 0x441   :  { %v962_v21 = vor.u32 1.1754944e-38, %v961_v54  ;;  %vm960_vm10 = vcmp.eq.f32.partialorder %v959_v32, 8.507059e+37  ;;  %v3528_v54 = vld [vmem:[#allocation5 + $0x18] sm:$0xff]  ;;  %v3531_v32 = vld [vmem:[#allocation5] sm:$0xff] }
 0x442   :  { %v1092_v24 = vadd.f32 %v2559_v20, %v1091_v17 }
 0x444   :  { %v1096_v34 = vsel %vm1095_vm5, %v2559_v20, %v1092_v24  ;;  %v3465_v20 = vld [vmem:[#allocation7 + $0x38] sm:$0xff] }
 0x445   :  { %v2563_v25 = vpop.eup %2562  ;;  %v1101_v61 = vsel %vm1098_vm6, %v1100_v43, %v1096_v34  ;;  %v3477_v24 = vld [vmem:[#allocation7 + $0x18] sm:$0xff]  ;;  %v1293_v34 = vrot.slane %v1250_v19, 7  ;;  %v1249_v43 = vld [vmem:[%s3771_s0 + $0x4] sm:$0x1] }
 0x446   :  { %v951_v28 = vmul.f32 %v2563_v25, %v3419_v14  ;;  %vm956_vm7 = vweird.f32 %v2563_v25  ;;  %v3471_v14 = vld [vmem:[#allocation7 + $0x28] sm:$0xff] }
 0x447   :  { %vm957_vm9 = vmor %vm955_vm8, %vm956_vm7 }
 0x448   :  { %v952_v9 = vsub.f32 1.0, %v951_v28  ;;  %v3486_v28 = vld [vmem:[#allocation7 + $0x8] sm:$0xff] }
 0x44a   :  { %v953_v31 = vmul.f32 %v2563_v25, %v952_v9  ;;  %v3508_v9 = vld [vmem:[#allocation5 + $0x48] sm:$0xff] }
 0x44c   :  { %v954_v23 = vadd.f32 %v2563_v25, %v953_v31  ;;  %v3516_v31 = vld [vmem:[#allocation5 + $0x38] sm:$0xff] }
 0x44e   :  { %v958_v18 = vsel %vm957_vm9, %v2563_v25, %v954_v23  ;;  %v3525_v23 = vld [vmem:[#allocation5 + $0x10] sm:$0xff] }
 0x496   :  { %v1108_v6 = vpop.permute.xlu2 %1107 }
 0x497   :  { %v3423_v7 = vadd.f32 %v1108_v6, %v1104_v29  ;;  %v963_v29 = vsel %vm960_vm10, %v962_v21, %v958_v18  ;;  %v3474_v6 = vld [vmem:[#allocation7 + $0x10] sm:$0xff]  ;;  %v3534_v18 = vld [vmem:[#allocation5 + $0x8] sm:$0xff] }
 0x499   :  { %2564 = vtanh.f32 %v3423_v7 }
 0x49f   :  { %v2565_v47 = vpop.eup %2564 }
 0x4a0   :  { %v1112_v22 = vmul.f32 %v2565_v47, %v1101_v61  ;;  %v1294_v47 = vsel %vm164_vm1, %v1293_v34, %v1249_v43  ;;  %v3505_v61 = vld [vmem:[#allocation5 + $0x40] sm:$0xff] }
 0x4a2   :  { %2413 = vmatmul.msk.f32.vlgmr.msrb.gmra.mxu2 %vm117_vm11, %v1112_v22  ;;  %2414 = vmatmul.msk.f32.vlgmr.msrb.gmra.mxu3 %vm117_vm11, %v1112_v22 }
 0x4a3   :  { %1441 = vmatpush.msrb.mxu2 %v3429_v30  ;;  %1461 = vmatpush.msrb.mxu3 %v3432_v57 }
 0x4a5   :  { %1442 = vmatpush.msrb.mxu2 %v3436_v3  ;;  %1462 = vmatpush.msrb.mxu3 %v3439_v4 }
 0x4a6   :  { %v970_v10 = vpop.permute.xlu0 %969 }
 0x4a7   :  { %v3442_v11 = vadd.f32 %v970_v10, %v966_v2  ;;  %1443 = vmatpush.msrb.mxu2 %v3444_v13  ;;  %1463 = vmatpush.msrb.mxu3 %v3447_v56  ;;  %v3519_v2 = vld [vmem:[#allocation5 + $0x20] sm:$0xff]  ;;  %v3522_v10 = vld [vmem:[#allocation5 + $0x28] sm:$0xff] }
 0x4a9   :  { %2566 = vtanh.f32 %v3442_v11  ;;  %1444 = vmatpush.msrb.mxu2 %v3452_v15  ;;  %1464 = vmatpush.msrb.mxu3 %v3455_v16 }
 0x4aa   :  { %2419 = vmatmul.msk.f32.vlgmr.msra.gmra.mxu2 %vm117_vm11, %v1112_v22  ;;  %2420 = vmatmul.msk.f32.vlgmr.msra.gmra.mxu3 %vm117_vm11, %v1112_v22  ;;  %v3513_v22 = vld [vmem:[#allocation5 + $0x30] sm:$0xff] }
 0x4ab   :  { %1445 = vmatpush.msrb.mxu2 %v3462_v36  ;;  %1465 = vmatpush.msrb.mxu3 %v3465_v20 }
 0x4ad   :  { %1446 = vmatpush.msrb.mxu2 %v3468_v5  ;;  %1466 = vmatpush.msrb.mxu3 %v3471_v14 }
 0x4af   :  { %v2567_v17 = vpop.eup %2566  ;;  %1447 = vmatpush.msrb.mxu2 %v3474_v6  ;;  %1467 = vmatpush.msrb.mxu3 %v3477_v24 }
 0x4b0   :  { %v974_v25 = vmul.f32 %v2567_v17, %v963_v29 }
 0x4b1   :  { %1448 = vmatpush.msrb.mxu2 %v3483_v27  ;;  %1468 = vmatpush.msrb.mxu3 %v3486_v28 }
 0x4b2   :  { %2415 = vmatmul.msk.f32.vlgmr.msrb.gmra.mxu0 %vm117_vm11, %v974_v25  ;;  %2416 = vmatmul.msk.f32.vlgmr.msrb.gmra.mxu1 %vm117_vm11, %v974_v25 }
 0x4b3   :  { %1398 = vmatpush.msrb.mxu0 %v3317_v44  ;;  %1418 = vmatpush.msrb.mxu1 %v3320_v45 }
 0x4b4   :  { %2435 = vmatpush.msk.msra.mxu2 %vm169_vm0, %v3329_v49  ;;  %2437 = vmatpush.msk.msra.mxu3 %vm169_vm0, %v3336_v50 }
 0x4b5   :  { %1399 = vmatpush.msrb.mxu0 %v3340_v51  ;;  %1419 = vmatpush.msrb.mxu1 %v3343_v52 }
 0x4b7   :  { %1400 = vmatpush.msrb.mxu0 %v3347_v1  ;;  %1420 = vmatpush.msrb.mxu1 %v3350_v33 }
 0x4b9   :  { %1401 = vmatpush.msrb.mxu0 %v3505_v61  ;;  %1421 = vmatpush.msrb.mxu1 %v3508_v9 }
 0x4ba   :  { %2422 = vmatmul.msk.f32.vlgmr.msra.gmra.mxu0 %vm166_vm2, %v1294_v47  ;;  %2424 = vmatmul.msk.f32.vlgmr.msra.gmra.mxu1 %vm166_vm2, %v1294_v47 }
 0x4bb   :  { %1402 = vmatpush.msrb.mxu0 %v3513_v22  ;;  %1422 = vmatpush.msrb.mxu1 %v3516_v31 }
 0x4bd   :  { %1403 = vmatpush.msrb.mxu0 %v3519_v2  ;;  %1423 = vmatpush.msrb.mxu1 %v3522_v10 }
 0x4bf   :  { %1404 = vmatpush.msrb.mxu0 %v3525_v23  ;;  %1424 = vmatpush.msrb.mxu1 %v3528_v54 }
 0x4c1   :  { %1405 = vmatpush.msrb.mxu0 %v3531_v32  ;;  %1425 = vmatpush.msrb.mxu1 %v3534_v18 }
 0x4c3   :  { %1533 = vmatpush.msra.mxu0 %v3365_v37  ;;  %1553 = vmatpush.msra.mxu1 %v3368_v38 }
 0x4c5   :  { %1534 = vmatpush.msra.mxu0 %v3371_v39  ;;  %1554 = vmatpush.msra.mxu1 %v3374_v40 }
 0x4c7   :  { %1535 = vmatpush.msra.mxu0 %v3377_v41  ;;  %1555 = vmatpush.msra.mxu1 %v3380_v42 }
 0x4c9   :  { %1536 = vmatpush.msra.mxu0 %v3383_v63  ;;  %1556 = vmatpush.msra.mxu1 %v3386_v0 }
 0x4cb   :  { %1537 = vmatpush.msra.mxu0 %v3389_v8  ;;  %1557 = vmatpush.msra.mxu1 %v3392_v12 }
 0x4cd   :  { %1538 = vmatpush.msra.mxu0 %v3395_v60  ;;  %1558 = vmatpush.msra.mxu1 %v3398_v46 }
 0x4cf   :  { %1539 = vmatpush.msra.mxu0 %v3401_v59  ;;  %1559 = vmatpush.msra.mxu1 %v3404_v53 }
 0x4d1   :  { %1540 = vmatpush.msra.mxu0 %v3407_v58  ;;  %1560 = vmatpush.msra.mxu1 %v3410_v26 }
 0x525   :  { %v1133_v21 = vpop.f32.mrf.mxu2  ;;  %v1153_v8 = vpop.f32.mrf.mxu3 }
 0x52d   :  { %v1268_v34 = vpop.f32.mrf.mxu2 }
 0x52f   :  { %v1176_v17 = vpop.f32.mrf.mxu0  ;;  %v1196_v59 = vpop.f32.mrf.mxu1 }
 0x530   :  { %v1177_v29 = vadd.f32 %v1176_v17, %v1133_v21  ;;  %v1197_v26 = vadd.f32 %v1196_v59, %v1153_v8 }
 0x532   :  { %v1199_v25 = vadd.f32 %v1177_v29, %v3831_v35  ;;  %v1200_v21 = vadd.f32 %v1197_v26, %v3833_v55 }
 0x534   :  { %v2417_v19 = vmul.f32 -1.442695, %v1199_v25 }
 0x536   :  { %2568 = vpow2.f32 %v2417_v19  ;;  %v1288_v19 = vpop.f32.mrf.mxu3 }
 0x537   :  { %v1314_v43 = vpop.f32.mrf.mxu0  ;;  %v1334_v29 = vpop.f32.mrf.mxu1 }
 0x538   :  { %v1315_v47 = vadd.f32 %v1314_v43, %v1268_v34  ;;  %v1335_v43 = vadd.f32 %v1334_v29, %v1288_v19 }
 0x53a   :  { %v1337_v46 = vadd.f32 %v1315_v47, %v3832_v62  ;;  %v1338_v8 = vadd.f32 %v1335_v43, %v3026_v48 }
 0x53c   :  { %v2569_v60 = vpop.eup %2568  ;;  %v2425_v12 = vmul.f32 -1.442695, %v1337_v46 }
 0x53d   :  { %v1207_v53 = vadd.f32 1.0, %v2569_v60 }
 0x53e   :  { %2570 = vpow2.f32 %v2425_v12 }
 0x53f   :  { %2572 = vrcp.f32 %v1207_v53  ;;  %v1220_v47 = vand.u32 2147483648, %v1207_v53  ;;  %v1218_v60 = vand.u32 2147483647, %v1207_v53  ;;  %vm1214_vm13 = vweird.f32 %v1207_v53 }
 0x541   :  { %v1221_v59 = vor.u32 1.1754944e-38, %v1220_v47  ;;  %vm1219_vm15 = vcmp.eq.f32.partialorder %v1218_v60, 8.507059e+37 }
 0x544   :  { %v2571_v58 = vpop.eup %2570 }
 0x545   :  { %v2573_v0 = vpop.eup %2572  ;;  %v1345_v17 = vadd.f32 1.0, %v2571_v58 }
 0x546   :  { %v1210_v25 = vmul.f32 %v2573_v0, %v1207_v53  ;;  %vm1215_vm12 = vweird.f32 %v2573_v0 }
 0x547   :  { %2574 = vrcp.f32 %v1345_v17  ;;  %vm1216_vm14 = vmor %vm1214_vm13, %vm1215_vm12  ;;  %v1358_v29 = vand.u32 2147483648, %v1345_v17  ;;  %vm1352_vm4 = vweird.f32 %v1345_v17 }
 0x548   :  { %v1211_v34 = vsub.f32 1.0, %v1210_v25  ;;  %2576 = vtanh.f32 %v1200_v21 }
 0x549   :  { %2578 = vtanh.f32 %v1338_v8 }
 0x54a   :  { %v1212_v62 = vmul.f32 %v2573_v0, %v1211_v34  ;;  %v1359_v34 = vor.u32 1.1754944e-38, %v1358_v29 }
 0x54c   :  { %v1213_v46 = vadd.f32 %v2573_v0, %v1212_v62  ;;  %v1356_v62 = vand.u32 2147483647, %v1345_v17 }
 0x54d   :  { %v2575_v12 = vpop.eup %2574 }
 0x54e   :  { %v1217_v26 = vsel %vm1216_vm14, %v2573_v0, %v1213_v46  ;;  %v1348_v58 = vmul.f32 %v2575_v12, %v1345_v17  ;;  %v2577_v55 = vpop.eup %2576  ;;  %vm1353_vm3 = vweird.f32 %v2575_v12  ;;  %vm1357_vm6 = vcmp.eq.f32.partialorder %v1356_v62, 8.507059e+37 }
 0x54f   :  { %v1222_v35 = vsel %vm1219_vm15, %v1221_v59, %v1217_v26  ;;  %vm1354_vm5 = vmor %vm1352_vm4, %vm1353_vm3  ;;  %v2579_v0 = vpop.eup %2578  ;;  %v2418_v26 = vmul.f32 -1.442695, %v1200_v21 }
 0x550   :  { %v1241_v63 = vmul.f32 %v2577_v55, %v1222_v35  ;;  %v1349_v25 = vsub.f32 1.0, %v1348_v58  ;;  %v2426_v55 = vmul.f32 -1.442695, %v1338_v8 }
 0x552   :  { %1243 = vrot.lane.b32.xlu1 %v1241_v63, %s2848_s3  ;;  %v1350_v19 = vmul.f32 %v2575_v12, %v1349_v25  ;;  %2580 = vpow2.f32 %v2426_v55 }
 0x554   :  { %v1351_v53 = vadd.f32 %v2575_v12, %v1350_v19 }
 0x556   :  { %v1355_v43 = vsel %vm1354_vm5, %v2575_v12, %v1351_v53 }
 0x557   :  { %v1360_v47 = vsel %vm1357_vm6, %v1359_v34, %v1355_v43 }
 0x558   :  { %v1379_v60 = vmul.f32 %v2579_v0, %v1360_v47  ;;  %v2581_v46 = vpop.eup %2580  ;;  %v1378_v29 = vmul.f32 %v1360_v47, %v3423_v7 }
 0x559   :  { %v1346_v59 = vadd.f32 1.0, %v2581_v46 }
 0x55a   :  { %1381 = vrot.lane.b32.xlu2 %v1379_v60, %s2848_s3 }
 0x55b   :  { %2582 = vrcp.f32 %v1346_v59  ;;  %v1373_v43 = vand.u32 2147483648, %v1346_v59  ;;  %vm1367_vm8 = vweird.f32 %v1346_v59  ;;  %v1371_v21 = vand.u32 2147483647, %v1346_v59 }
 0x55c   :  { %2584 = vpow2.f32 %v2418_v26 }
 0x55d   :  { %v1374_v55 = vor.u32 1.1754944e-38, %v1373_v43  ;;  %vm1372_vm10 = vcmp.eq.f32.partialorder %v1371_v21, 8.507059e+37  ;;  %v1524_v43 = vld [vmem:[%s3771_s0 + $0xd] sm:$0x1]  ;;  %v1523_v21 = vld [vmem:[%s3771_s0 + $0x5] sm:$0x1] }
 0x561   :  { %v2583_v63 = vpop.eup %2582 }
 0x562   :  { %v2585_v58 = vpop.eup %2584  ;;  %v1363_v25 = vmul.f32 %v2583_v63, %v1346_v59  ;;  %vm1368_vm7 = vweird.f32 %v2583_v63  ;;  %v1240_v59 = vmul.f32 %v1222_v35, %v3442_v11 }
 0x563   :  { %v1208_v17 = vadd.f32 1.0, %v2585_v58  ;;  %vm1369_vm9 = vmor %vm1367_vm8, %vm1368_vm7 }
 0x564   :  { %v1364_v19 = vsub.f32 1.0, %v1363_v25 }
 0x565   :  { %2586 = vrcp.f32 %v1208_v17  ;;  %vm1229_vm13 = vweird.f32 %v1208_v17  ;;  %v1233_v35 = vand.u32 2147483647, %v1208_v17 }
 0x566   :  { %v1365_v12 = vmul.f32 %v2583_v63, %v1364_v19 }
 0x567   :  { %vm1234_vm15 = vcmp.eq.f32.partialorder %v1233_v35, 8.507059e+37  ;;  %v3855_v35 = vld [vmem:[#allocation18_spill] sm:$0xff] }
 0x568   :  { %v1366_v34 = vadd.f32 %v2583_v63, %v1365_v12  ;;  %v1235_v12 = vand.u32 2147483648, %v1208_v17 }
 0x56a   :  { %v1370_v60 = vsel %vm1369_vm9, %v2583_v63, %v1366_v34 }
 0x56b   :  { %v2587_v8 = vpop.eup %2586  ;;  %v1375_v26 = vsel %vm1372_vm10, %v1374_v55, %v1370_v60  ;;  %v3846_v60 = vld [vmem:[#allocation13_spill] sm:$0xff]  ;;  %v3847_v55 = vld [vmem:[#allocation10_spill] sm:$0xff] }
 0x56c   :  { %v1225_v0 = vmul.f32 %v2587_v8, %v1208_v17  ;;  %vm1230_vm12 = vweird.f32 %v2587_v8 }
 0x56d   :  { %vm1231_vm14 = vmor %vm1229_vm13, %vm1230_vm12 }
 0x56e   :  { %v1226_v58 = vsub.f32 1.0, %v1225_v0 }
 0x570   :  { %v1227_v47 = vmul.f32 %v2587_v8, %v1226_v58 }
 0x572   :  { %v1228_v19 = vadd.f32 %v2587_v8, %v1227_v47 }
 0x574   :  { %v1232_v11 = vsel %vm1231_vm14, %v2587_v8, %v1228_v19  ;;  %v1567_v8 = vrot.slane %v1524_v43, 7 }
 0x576   :  { %v1568_v0 = vsel %vm164_vm1, %v1567_v8, %v1523_v21 }
 0x5b4   :  { %v1382_v62 = vpop.permute.xlu2 %1381 }
 0x5b5   :  { %v3560_v53 = vadd.f32 %v1382_v62, %v1378_v29  ;;  %v1236_v29 = vor.u32 1.1754944e-38, %v1235_v12 }
 0x5b7   :  { %2588 = vtanh.f32 %v3560_v53  ;;  %v1237_v34 = vsel %vm1234_vm15, %v1236_v29, %v1232_v11 }
 0x5bd   :  { %v2589_v46 = vpop.eup %2588 }
 0x5be   :  { %v1386_v7 = vmul.f32 %v2589_v46, %v1375_v26  ;;  %v3848_v46 = vld [vmem:[#allocation11_spill] sm:$0xff] }
 0x5c0   :  { %2427 = vmatmul.msk.f32.vlgmr.msrb.gmra.mxu0 %vm117_vm11, %v1386_v7  ;;  %2428 = vmatmul.msk.f32.vlgmr.msrb.gmra.mxu1 %vm117_vm11, %v1386_v7 }
 0x5c1   :  { %1715 = vmatpush.msrb.mxu0 %v3429_v30  ;;  %1735 = vmatpush.msrb.mxu1 %v3432_v57 }
 0x5c3   :  { %1716 = vmatpush.msrb.mxu0 %v3436_v3  ;;  %1736 = vmatpush.msrb.mxu1 %v3439_v4 }
 0x5c4   :  { %v1244_v63 = vpop.permute.xlu1 %1243 }
 0x5c5   :  { %v3570_v25 = vadd.f32 %v1244_v63, %v1240_v59  ;;  %1717 = vmatpush.msrb.mxu0 %v3444_v13  ;;  %1737 = vmatpush.msrb.mxu1 %v3447_v56 }
 0x5c7   :  { %2590 = vtanh.f32 %v3570_v25  ;;  %1718 = vmatpush.msrb.mxu0 %v3452_v15  ;;  %1738 = vmatpush.msrb.mxu1 %v3455_v16 }
 0x5c8   :  { %2433 = vmatmul.msk.f32.vlgmr.msra.gmra.mxu0 %vm117_vm11, %v1386_v7  ;;  %2434 = vmatmul.msk.f32.vlgmr.msra.gmra.mxu1 %vm117_vm11, %v1386_v7  ;;  %v3854_v7 = vld [vmem:[#allocation20_spill] sm:$0xff] }
 0x5c9   :  { %1719 = vmatpush.msrb.mxu0 %v3462_v36  ;;  %1739 = vmatpush.msrb.mxu1 %v3465_v20 }
 0x5cb   :  { %1720 = vmatpush.msrb.mxu0 %v3468_v5  ;;  %1740 = vmatpush.msrb.mxu1 %v3471_v14 }
 0x5cd   :  { %v2591_v62 = vpop.eup %2590  ;;  %1721 = vmatpush.msrb.mxu0 %v3474_v6  ;;  %1741 = vmatpush.msrb.mxu1 %v3477_v24 }
 0x5ce   :  { %v1248_v17 = vmul.f32 %v2591_v62, %v1237_v34 }
 0x5cf   :  { %1722 = vmatpush.msrb.mxu0 %v3483_v27  ;;  %1742 = vmatpush.msrb.mxu1 %v3486_v28 }
 0x5d0   :  { %2429 = vmatmul.msk.f32.vlgmr.msrb.gmra.mxu2 %vm117_vm11, %v1248_v17  ;;  %2430 = vmatmul.msk.f32.vlgmr.msrb.gmra.mxu3 %vm117_vm11, %v1248_v17 }
 0x5d1   :  { %1672 = vmatpush.msrb.mxu2 %v3317_v44  ;;  %1692 = vmatpush.msrb.mxu3 %v3320_v45 }
 0x5d2   :  { %2449 = vmatpush.msk.msra.mxu0 %vm169_vm0, %v3329_v49  ;;  %2451 = vmatpush.msk.msra.mxu1 %vm169_vm0, %v3336_v50  ;;  %v3844_v49 = vld [vmem:[#allocation19_spill] sm:$0xff]  ;;  %v3845_v50 = vld [vmem:[#allocation12_spill] sm:$0xff] }
 0x5d3   :  { %1673 = vmatpush.msrb.mxu2 %v3340_v51  ;;  %1693 = vmatpush.msrb.mxu3 %v3343_v52 }
 0x5d5   :  { %1674 = vmatpush.msrb.mxu2 %v3347_v1  ;;  %1694 = vmatpush.msrb.mxu3 %v3350_v33 }
 0x5d7   :  { %1675 = vmatpush.msrb.mxu2 %v3505_v61  ;;  %1695 = vmatpush.msrb.mxu3 %v3508_v9 }
 0x5d8   :  { %2436 = vmatmul.msk.f32.vlgmr.msra.gmra.mxu2 %vm166_vm2, %v1568_v0  ;;  %2438 = vmatmul.msk.f32.vlgmr.msra.gmra.mxu3 %vm166_vm2, %v1568_v0 }
 0x5d9   :  { %1676 = vmatpush.msrb.mxu2 %v3513_v22  ;;  %1696 = vmatpush.msrb.mxu3 %v3516_v31 }
 0x5db   :  { %1677 = vmatpush.msrb.mxu2 %v3519_v2  ;;  %1697 = vmatpush.msrb.mxu3 %v3522_v10 }
 0x5dd   :  { %1678 = vmatpush.msrb.mxu2 %v3525_v23  ;;  %1698 = vmatpush.msrb.mxu3 %v3528_v54 }
 0x5df   :  { %1679 = vmatpush.msrb.mxu2 %v3531_v32  ;;  %1699 = vmatpush.msrb.mxu3 %v3534_v18 }
 0x5e1   :  { %1807 = vmatpush.msra.mxu2 %v3365_v37  ;;  %1827 = vmatpush.msra.mxu3 %v3368_v38  ;;  %v3849_v37 = vld [vmem:[#allocation14_spill] sm:$0xff]  ;;  %v3850_v38 = vld [vmem:[#allocation15_spill] sm:$0xff] }
 0x5e3   :  { %1808 = vmatpush.msra.mxu2 %v3371_v39  ;;  %1828 = vmatpush.msra.mxu3 %v3374_v40  ;;  %v3851_v39 = vld [vmem:[#allocation16_spill] sm:$0xff]  ;;  %v3852_v40 = vld [vmem:[#allocation17_spill] sm:$0xff] }
 0x5e5   :  { %1809 = vmatpush.msra.mxu2 %v3377_v41  ;;  %1829 = vmatpush.msra.mxu3 %v3380_v42  ;;  %v3853_v41 = vld [vmem:[#allocation22_spill] sm:$0xff] }
 0x5e7   :  { %1810 = vmatpush.msra.mxu2 %v3844_v49  ;;  %1830 = vmatpush.msra.mxu3 %v3845_v50  ;;  %v3856_v49 = vld [vmem:[#allocation21_spill] sm:$0xff] }
 0x5e9   :  { %1811 = vmatpush.msra.mxu2 %v3846_v60  ;;  %1831 = vmatpush.msra.mxu3 %v3847_v55 }
 0x5eb   :  { %1812 = vmatpush.msra.mxu2 %v3848_v46  ;;  %1832 = vmatpush.msra.mxu3 %v3849_v37 }
 0x5ed   :  { %1813 = vmatpush.msra.mxu2 %v3850_v38  ;;  %1833 = vmatpush.msra.mxu3 %v3851_v39 }
 0x5ef   :  { %1814 = vmatpush.msra.mxu2 %v3852_v40  ;;  %1834 = vmatpush.msra.mxu3 %v3853_v41 }
 0x63d   :  { %v1407_v42 = vpop.f32.mrf.mxu0  ;;  %v1427_v43 = vpop.f32.mrf.mxu1 }
 0x645   :  { %v1542_v63 = vpop.f32.mrf.mxu0  ;;  %v1562_v37 = vpop.f32.mrf.mxu1 }
 0x653   :  { %v1450_v26 = vpop.f32.mrf.mxu2  ;;  %v1470_v62 = vpop.f32.mrf.mxu3 }
 0x654   :  { %v1451_v58 = vadd.f32 %v1450_v26, %v1407_v42  ;;  %v1471_v8 = vadd.f32 %v1470_v62, %v1427_v43 }
 0x656   :  { %v1473_v47 = vadd.f32 %v1451_v58, %v3854_v7  ;;  %v1474_v50 = vadd.f32 %v1471_v8, %v3856_v49 }
 0x658   :  { %v2431_v59 = vmul.f32 -1.442695, %v1473_v47 }
 0x65a   :  { %2592 = vpow2.f32 %v2431_v59 }
 0x65b   :  { %v1588_v19 = vpop.f32.mrf.mxu2  ;;  %v1608_v55 = vpop.f32.mrf.mxu3 }
 0x65c   :  { %v1589_v12 = vadd.f32 %v1588_v19, %v1542_v63  ;;  %v1609_v39 = vadd.f32 %v1608_v55, %v1562_v37 }
 0x65e   :  { %v1611_v11 = vadd.f32 %v1589_v12, %v3855_v35  ;;  %v1612_v47 = vadd.f32 %v1609_v39, %v3026_v48 }
 0x660   :  { %v2593_v29 = vpop.eup %2592  ;;  %v2439_v34 = vmul.f32 -1.442695, %v1611_v11  ;;  %v2440_v39 = vmul.f32 -1.442695, %v1612_v47 }
 0x661   :  { %v1481_v17 = vadd.f32 1.0, %v2593_v29 }
 0x662   :  { %2594 = vpow2.f32 %v2439_v34 }
 0x663   :  { %2596 = vrcp.f32 %v1481_v17  ;;  %v1494_v40 = vand.u32 2147483648, %v1481_v17  ;;  %v1492_v42 = vand.u32 2147483647, %v1481_v17  ;;  %vm1488_vm4 = vweird.f32 %v1481_v17 }
 0x665   :  { %v1495_v59 = vor.u32 1.1754944e-38, %v1494_v40  ;;  %vm1493_vm6 = vcmp.eq.f32.partialorder %v1492_v42, 8.507059e+37 }
 0x668   :  { %v2595_v21 = vpop.eup %2594 }
 0x669   :  { %v2597_v0 = vpop.eup %2596  ;;  %v1619_v60 = vadd.f32 1.0, %v2595_v21 }
 0x66a   :  { %v1484_v46 = vmul.f32 %v2597_v0, %v1481_v17  ;;  %vm1489_vm3 = vweird.f32 %v2597_v0 }
 0x66b   :  { %2598 = vrcp.f32 %v1619_v60  ;;  %vm1490_vm5 = vmor %vm1488_vm4, %vm1489_vm3  ;;  %v1632_v34 = vand.u32 2147483648, %v1619_v60  ;;  %v1630_v8 = vand.u32 2147483647, %v1619_v60  ;;  %vm1626_vm8 = vweird.f32 %v1619_v60 }
 0x66c   :  { %v1485_v38 = vsub.f32 1.0, %v1484_v46  ;;  %2600 = vtanh.f32 %v1474_v50 }
 0x66d   :  { %2602 = vtanh.f32 %v1612_v47  ;;  %v1633_v21 = vor.u32 1.1754944e-38, %v1632_v34  ;;  %vm1631_vm10 = vcmp.eq.f32.partialorder %v1630_v8, 8.507059e+37 }
 0x66e   :  { %v1486_v41 = vmul.f32 %v2597_v0, %v1485_v38  ;;  %v2432_v38 = vmul.f32 -1.442695, %v1474_v50 }
 0x670   :  { %v1487_v26 = vadd.f32 %v2597_v0, %v1486_v41  ;;  %2604 = vpow2.f32 %v2432_v38 }
 0x671   :  { %v2599_v58 = vpop.eup %2598  ;;  %2606 = vpow2.f32 %v2440_v39 }
 0x672   :  { %v1491_v63 = vsel %vm1490_vm5, %v2597_v0, %v1487_v26  ;;  %v1622_v19 = vmul.f32 %v2599_v58, %v1619_v60  ;;  %v2601_v12 = vpop.eup %2600  ;;  %vm1627_vm7 = vweird.f32 %v2599_v58 }
 0x673   :  { %v1496_v11 = vsel %vm1493_vm6, %v1495_v59, %v1491_v63  ;;  %vm1628_vm9 = vmor %vm1626_vm8, %vm1627_vm7  ;;  %v2603_v0 = vpop.eup %2602 }
 0x674   :  { %v1515_v29 = vmul.f32 %v2601_v12, %v1496_v11  ;;  %v1623_v62 = vsub.f32 1.0, %v1622_v19 }
 0x676   :  { %1517 = vrot.lane.b32.xlu1 %v1515_v29, %s2848_s3  ;;  %v1624_v43 = vmul.f32 %v2599_v58, %v1623_v62  ;;  %v2605_v40 = vpop.eup %2604  ;;  %v1514_v29 = vmul.f32 %v1496_v11, %v3570_v25 }
 0x677   :  { %v1482_v41 = vadd.f32 1.0, %v2605_v40  ;;  %v2607_v42 = vpop.eup %2606 }
 0x678   :  { %v1625_v17 = vadd.f32 %v2599_v58, %v1624_v43  ;;  %v1620_v26 = vadd.f32 1.0, %v2607_v42 }
 0x679   :  { %2608 = vrcp.f32 %v1482_v41  ;;  %v1509_v43 = vand.u32 2147483648, %v1482_v41  ;;  %vm1503_vm13 = vweird.f32 %v1482_v41  ;;  %v1507_v8 = vand.u32 2147483647, %v1482_v41 }
 0x67a   :  { %v1629_v55 = vsel %vm1628_vm9, %v2599_v58, %v1625_v17  ;;  %2610 = vrcp.f32 %v1620_v26  ;;  %v1647_v42 = vand.u32 2147483648, %v1620_v26  ;;  %vm1641_vm4 = vweird.f32 %v1620_v26 }
 0x67b   :  { %v1634_v46 = vsel %vm1631_vm10, %v1633_v21, %v1629_v55  ;;  %v1510_v55 = vor.u32 1.1754944e-38, %v1509_v43  ;;  %vm1508_vm15 = vcmp.eq.f32.partialorder %v1507_v8, 8.507059e+37 }
 0x67c   :  { %v1653_v37 = vmul.f32 %v2603_v0, %v1634_v46  ;;  %v1652_v0 = vmul.f32 %v1634_v46, %v3560_v53 }
 0x67e   :  { %1655 = vrot.lane.b32.xlu0 %v1653_v37, %s2848_s3 }
 0x67f   :  { %v2609_v59 = vpop.eup %2608 }
 0x680   :  { %v1499_v60 = vmul.f32 %v2609_v59, %v1482_v41  ;;  %v2611_v58 = vpop.eup %2610  ;;  %vm1504_vm12 = vweird.f32 %v2609_v59  ;;  %v1798_v41 = vld [vmem:[%s3771_s0 + $0xe] sm:$0x1] }
 0x681   :  { %v1637_v19 = vmul.f32 %v2611_v58, %v1620_v26  ;;  %vm1505_vm14 = vmor %vm1503_vm13, %vm1504_vm12  ;;  %vm1642_vm3 = vweird.f32 %v2611_v58  ;;  %v1841_v46 = vrot.slane %v1798_v41, 7 }
 0x682   :  { %v1500_v63 = vsub.f32 1.0, %v1499_v60  ;;  %vm1643_vm5 = vmor %vm1641_vm4, %vm1642_vm3  ;;  %v1648_v60 = vor.u32 1.1754944e-38, %v1647_v42 }
 0x683   :  { %v1638_v50 = vsub.f32 1.0, %v1637_v19 }
 0x684   :  { %v1501_v12 = vmul.f32 %v2609_v59, %v1500_v63  ;;  %v1797_v63 = vld [vmem:[%s3771_s0 + $0x6] sm:$0x1] }
 0x685   :  { %v1639_v21 = vmul.f32 %v2611_v58, %v1638_v50 }
 0x686   :  { %v1502_v47 = vadd.f32 %v2609_v59, %v1501_v12 }
 0x687   :  { %v1640_v40 = vadd.f32 %v2611_v58, %v1639_v21 }
 0x688   :  { %v1506_v17 = vsel %vm1505_vm14, %v2609_v59, %v1502_v47  ;;  %v1645_v59 = vand.u32 2147483647, %v1620_v26 }
 0x689   :  { %v1511_v11 = vsel %vm1508_vm15, %v1510_v55, %v1506_v17  ;;  %v1644_v53 = vsel %vm1643_vm5, %v2611_v58, %v1640_v40 }
 0x68a   :  { %vm1646_vm6 = vcmp.eq.f32.partialorder %v1645_v59, 8.507059e+37 }
 0x68b   :  { %v1649_v19 = vsel %vm1646_vm6, %v1648_v60, %v1644_v53 }
 0x6e8   :  { %v1518_v62 = vpop.permute.xlu1 %1517 }
 0x6e9   :  { %v3641_v34 = vadd.f32 %v1518_v62, %v1514_v29 }
 0x6eb   :  { %2612 = vtanh.f32 %v3641_v34 }
 0x6f0   :  { %v1656_v37 = vpop.permute.xlu0 %1655 }
 0x6f1   :  { %v2613_v25 = vpop.eup %2612  ;;  %v3645_v38 = vadd.f32 %v1656_v37, %v1652_v0 }
 0x6f2   :  { %v1522_v39 = vmul.f32 %v2613_v25, %v1511_v11 }
 0x6f3   :  { %2614 = vtanh.f32 %v3645_v38 }
 0x6f4   :  { %2443 = vmatmul.msk.f32.vlgmr.msrb.gmra.mxu0 %vm117_vm11, %v1522_v39  ;;  %2444 = vmatmul.msk.f32.vlgmr.msrb.gmra.mxu1 %vm117_vm11, %v1522_v39 }
 0x6f5   :  { %1946 = vmatpush.msrb.mxu0 %v3317_v44  ;;  %1966 = vmatpush.msrb.mxu1 %v3320_v45  ;;  %v1842_v45 = vsel %vm164_vm1, %v1841_v46, %v1797_v63 }
 0x6f7   :  { %1947 = vmatpush.msrb.mxu0 %v3340_v51  ;;  %1967 = vmatpush.msrb.mxu1 %v3343_v52  ;;  %v2726_v51 = vld [vmem:[#allocation3 + $0x70] sm:$0xff]  ;;  %v2727_v52 = vld [vmem:[#allocation3 + $0x78] sm:$0xff] }
 0x6f9   :  { %v2615_v26 = vpop.eup %2614  ;;  %1948 = vmatpush.msrb.mxu0 %v3347_v1  ;;  %1968 = vmatpush.msrb.mxu1 %v3350_v33  ;;  %v2728_v1 = vld [vmem:[#allocation3 + $0x60] sm:$0xff]  ;;  %v2729_v33 = vld [vmem:[#allocation3 + $0x68] sm:$0xff] }
 0x6fa   :  { %v1660_v44 = vmul.f32 %v2615_v26, %v1649_v19 }
 0x6fb   :  { %1949 = vmatpush.msrb.mxu0 %v3505_v61  ;;  %1969 = vmatpush.msrb.mxu1 %v3508_v9 }
 0x6fc   :  { %2441 = vmatmul.msk.f32.vlgmr.msrb.gmra.mxu2 %vm117_vm11, %v1660_v44  ;;  %2442 = vmatmul.msk.f32.vlgmr.msrb.gmra.mxu3 %vm117_vm11, %v1660_v44 }
 0x6fd   :  { %2450 = vmatmul.msk.f32.vlgmr.msra.gmra.mxu0 %vm166_vm2, %v1842_v45  ;;  %2452 = vmatmul.msk.f32.vlgmr.msra.gmra.mxu1 %vm166_vm2, %v1842_v45 }
 0x6fe   :  { %1989 = vmatpush.msrb.mxu2 %v3429_v30  ;;  %2009 = vmatpush.msrb.mxu3 %v3432_v57  ;;  %v2730_v30 = vld [vmem:[#allocation3 + $0x50] sm:$0xff]  ;;  %v2731_v57 = vld [vmem:[#allocation3 + $0x58] sm:$0xff] }
 0x6ff   :  { %1950 = vmatpush.msrb.mxu0 %v3513_v22  ;;  %1970 = vmatpush.msrb.mxu1 %v3516_v31 }
 0x700   :  { %1990 = vmatpush.msrb.mxu2 %v3436_v3  ;;  %2010 = vmatpush.msrb.mxu3 %v3439_v4  ;;  %v2732_v3 = vld [vmem:[%s3772_s1] sm:$0x1f] }
 0x701   :  { %1951 = vmatpush.msrb.mxu0 %v3519_v2  ;;  %1971 = vmatpush.msrb.mxu1 %v3522_v10  ;;  %v2733_v4 = vld [vmem:[#allocation3 + $0x40] sm:$0xff] }
 0x702   :  { %1991 = vmatpush.msrb.mxu2 %v3444_v13  ;;  %2011 = vmatpush.msrb.mxu3 %v3447_v56  ;;  %v2734_v13 = vld [vmem:[#allocation3 + $0x48] sm:$0xff] }
 0x703   :  { %1952 = vmatpush.msrb.mxu0 %v3525_v23  ;;  %1972 = vmatpush.msrb.mxu1 %v3528_v54  ;;  %v2735_v56 = vld [vmem:[%s3772_s1 + $0x8] sm:$0x1f] }
 0x704   :  { %2447 = vmatmul.msk.f32.vlgmr.msra.gmra.mxu2 %vm117_vm11, %v1660_v44  ;;  %2448 = vmatmul.msk.f32.vlgmr.msra.gmra.mxu3 %vm117_vm11, %v1660_v44 }
 0x705   :  { %1992 = vmatpush.msrb.mxu2 %v3452_v15  ;;  %2012 = vmatpush.msrb.mxu3 %v3455_v16  ;;  %v2736_v15 = vld [vmem:[#allocation3 + $0x30] sm:$0xff]  ;;  %v2737_v16 = vld [vmem:[#allocation3 + $0x38] sm:$0xff] }
 0x706   :  { %1953 = vmatpush.msrb.mxu0 %v3531_v32  ;;  %1973 = vmatpush.msrb.mxu1 %v3534_v18 }
 0x707   :  { %1993 = vmatpush.msrb.mxu2 %v3462_v36  ;;  %2013 = vmatpush.msrb.mxu3 %v3465_v20  ;;  %v2738_v36 = vld [vmem:[#allocation3 + $0x20] sm:$0xff]  ;;  %v2739_v20 = vld [vmem:[#allocation3 + $0x28] sm:$0xff] }
 0x708   :  { %2081 = vmatpush.msra.mxu0 %v2726_v51  ;;  %2101 = vmatpush.msra.mxu1 %v2727_v52 }
 0x709   :  { %1994 = vmatpush.msrb.mxu2 %v3468_v5  ;;  %2014 = vmatpush.msrb.mxu3 %v3471_v14  ;;  %v2740_v5 = vld [vmem:[#allocation3 + $0x10] sm:$0xff]  ;;  %v2741_v14 = vld [vmem:[#allocation3 + $0x18] sm:$0xff] }
 0x70a   :  { %2082 = vmatpush.msra.mxu0 %v2728_v1  ;;  %2102 = vmatpush.msra.mxu1 %v2729_v33 }
 0x70b   :  { %1995 = vmatpush.msrb.mxu2 %v3474_v6  ;;  %2015 = vmatpush.msrb.mxu3 %v3477_v24  ;;  %v2742_v6 = vld [vmem:[#allocation3] sm:$0xff]  ;;  %v2743_v24 = vld [vmem:[#allocation3 + $0x8] sm:$0xff] }
 0x70c   :  { %2083 = vmatpush.msra.mxu0 %v2730_v30  ;;  %2103 = vmatpush.msra.mxu1 %v2731_v57 }
 0x70d   :  { %1996 = vmatpush.msrb.mxu2 %v3483_v27  ;;  %2016 = vmatpush.msrb.mxu3 %v3486_v28 }
 0x70e   :  { %2084 = vmatpush.msra.mxu0 %v2733_v4  ;;  %2104 = vmatpush.msra.mxu1 %v2734_v13 }
 0x70f   :  { %2463 = vmatpush.msk.msra.mxu2 %vm169_vm0, %v2732_v3  ;;  %2465 = vmatpush.msk.msra.mxu3 %vm169_vm0, %v2735_v56 }
 0x710   :  { %2085 = vmatpush.msra.mxu0 %v2736_v15  ;;  %2105 = vmatpush.msra.mxu1 %v2737_v16 }
 0x712   :  { %2086 = vmatpush.msra.mxu0 %v2738_v36  ;;  %2106 = vmatpush.msra.mxu1 %v2739_v20 }
 0x714   :  { %2087 = vmatpush.msra.mxu0 %v2740_v5  ;;  %2107 = vmatpush.msra.mxu1 %v2741_v14 }
 0x716   :  { %2088 = vmatpush.msra.mxu0 %v2742_v6  ;;  %2108 = vmatpush.msra.mxu1 %v2743_v24 }
 0x771   :  { %v1724_v27 = vpop.f32.mrf.mxu0  ;;  %v1744_v0 = vpop.f32.mrf.mxu1 }
 0x77a   :  { %v1862_v62 = vpop.f32.mrf.mxu0  ;;  %v1882_v41 = vpop.f32.mrf.mxu1 }
 0x77f   :  { %v1681_v28 = vpop.f32.mrf.mxu2  ;;  %v1701_v17 = vpop.f32.mrf.mxu3 }
 0x780   :  { %v1725_v58 = vadd.f32 %v1724_v27, %v1681_v28  ;;  %v1745_v37 = vadd.f32 %v1744_v0, %v1701_v17 }
 0x782   :  { %v1747_v12 = vadd.f32 %v1725_v58, %v3854_v7  ;;  %v1748_v39 = vadd.f32 %v1745_v37, %v3856_v49 }
 0x784   :  { %v2445_v29 = vmul.f32 -1.442695, %v1747_v12  ;;  %v2446_v6 = vmul.f32 -1.442695, %v1748_v39 }
 0x786   :  { %2616 = vpow2.f32 %v2445_v29 }
 0x787   :  { %v1816_v50 = vpop.f32.mrf.mxu2  ;;  %v1836_v42 = vpop.f32.mrf.mxu3 }
 0x788   :  { %v1863_v47 = vadd.f32 %v1862_v62, %v1816_v50  ;;  %v1883_v46 = vadd.f32 %v1882_v41, %v1836_v42  ;;  %v2744_v41 = vld [vmem:[#allocation5 + $0x70] sm:$0xff] }
 0x78a   :  { %v1885_v43 = vadd.f32 %v1863_v47, %v3855_v35  ;;  %v1886_v45 = vadd.f32 %v1883_v46, %v3026_v48  ;;  %v2746_v46 = vld [vmem:[#allocation5 + $0x60] sm:$0xff] }
 0x78c   :  { %v2617_v8 = vpop.eup %2616  ;;  %v2453_v21 = vmul.f32 -1.442695, %v1885_v43  ;;  %v2454_v29 = vmul.f32 -1.442695, %v1886_v45 }
 0x78d   :  { %v1755_v55 = vadd.f32 1.0, %v2617_v8 }
 0x78e   :  { %2618 = vpow2.f32 %v2453_v21 }
 0x78f   :  { %2620 = vrcp.f32 %v1755_v55  ;;  %v1768_v60 = vand.u32 2147483648, %v1755_v55  ;;  %v1766_v26 = vand.u32 2147483647, %v1755_v55  ;;  %vm1762_vm7 = vweird.f32 %v1755_v55 }
 0x791   :  { %v1769_v51 = vor.u32 1.1754944e-38, %v1768_v60  ;;  %vm1767_vm9 = vcmp.eq.f32.partialorder %v1766_v26, 8.507059e+37  ;;  %v2747_v60 = vld [vmem:[#allocation5 + $0x68] sm:$0xff]  ;;  %v2748_v26 = vld [vmem:[#allocation5 + $0x50] sm:$0xff] }
 0x794   :  { %v2619_v25 = vpop.eup %2618 }
 0x795   :  { %v2621_v11 = vpop.eup %2620  ;;  %v1893_v40 = vadd.f32 1.0, %v2619_v25 }
 0x796   :  { %v1758_v59 = vmul.f32 %v2621_v11, %v1755_v55  ;;  %vm1763_vm0 = vweird.f32 %v2621_v11 }
 0x797   :  { %2622 = vrcp.f32 %v1893_v40  ;;  %vm1764_vm8 = vmor %vm1762_vm7, %vm1763_vm0  ;;  %v1906_v4 = vand.u32 2147483648, %v1893_v40  ;;  %v1904_v56 = vand.u32 2147483647, %v1893_v40  ;;  %vm1900_vm12 = vweird.f32 %v1893_v40 }
 0x798   :  { %v1759_v53 = vsub.f32 1.0, %v1758_v59  ;;  %2624 = vtanh.f32 %v1748_v39  ;;  %v2745_v59 = vld [vmem:[#allocation5 + $0x78] sm:$0xff] }
 0x799   :  { %2626 = vtanh.f32 %v1886_v45  ;;  %v1907_v16 = vor.u32 1.1754944e-38, %v1906_v4  ;;  %vm1905_vm14 = vcmp.eq.f32.partialorder %v1904_v56, 8.507059e+37  ;;  %v2755_v4 = vld [vmem:[#allocation7 + $0x58] sm:$0xff]  ;;  %v2757_v56 = vld [vmem:[#allocation7 + $0x48] sm:$0xff] }
 0x79a   :  { %v1760_v63 = vmul.f32 %v2621_v11, %v1759_v53  ;;  %2628 = vpow2.f32 %v2446_v6  ;;  %v2071_v53 = vld [vmem:[%s3771_s0 + $0x7] sm:$0x1] }
 0x79b   :  { %v2764_v6 = vld [vmem:[#allocation7] sm:$0xff] }
 0x79c   :  { %v1761_v19 = vadd.f32 %v2621_v11, %v1760_v63 }
 0x79d   :  { %v2623_v44 = vpop.eup %2622 }
 0x79e   :  { %v1765_v52 = vsel %vm1764_vm8, %v2621_v11, %v1761_v19  ;;  %v1896_v1 = vmul.f32 %v2623_v44, %v1893_v40  ;;  %v2625_v33 = vpop.eup %2624  ;;  %vm1901_vm10 = vweird.f32 %v2623_v44  ;;  %v2072_v40 = vld [vmem:[%s3771_s0 + $0xf] sm:$0x1]  ;;  %v2749_v19 = vld [vmem:[#allocation5 + $0x58] sm:$0xff] }
 0x79f   :  { %v1770_v30 = vsel %vm1767_vm9, %v1769_v51, %v1765_v52  ;;  %vm1902_vm13 = vmor %vm1900_vm12, %vm1901_vm10  ;;  %v2627_v20 = vpop.eup %2626  ;;  %v2115_v42 = vrot.slane %v2072_v40, 7 }
 0x7a0   :  { %v1789_v57 = vmul.f32 %v2625_v33, %v1770_v30  ;;  %v1897_v3 = vsub.f32 1.0, %v1896_v1  ;;  %v2629_v24 = vpop.eup %2628  ;;  %v1788_v50 = vmul.f32 %v1770_v30, %v3641_v34  ;;  %v2751_v33 = vld [vmem:[#allocation7 + $0x78] sm:$0xff]  ;;  %v2752_v30 = vld [vmem:[#allocation7 + $0x60] sm:$0xff] }
 0x7a1   :  { %v1756_v27 = vadd.f32 1.0, %v2629_v24  ;;  %v2116_v63 = vsel %vm164_vm1, %v2115_v42, %v2071_v53  ;;  %v2765_v24 = vld [vmem:[#allocation7 + $0x8] sm:$0xff] }
 0x7a2   :  { %1791 = vrot.lane.b32.xlu2 %v1789_v57, %s2848_s3  ;;  %v1898_v13 = vmul.f32 %v2623_v44, %v1897_v3  ;;  %v2753_v57 = vld [vmem:[#allocation7 + $0x68] sm:$0xff]  ;;  %v2754_v3 = vld [vmem:[#allocation7 + $0x50] sm:$0xff] }
 0x7a3   :  { %2630 = vrcp.f32 %v1756_v27  ;;  %v1783_v17 = vand.u32 2147483648, %v1756_v27  ;;  %vm1777_vm3 = vweird.f32 %v1756_v27  ;;  %v1781_v21 = vand.u32 2147483647, %v1756_v27 }
 0x7a4   :  { %v1899_v15 = vadd.f32 %v2623_v44, %v1898_v13  ;;  %2632 = vpow2.f32 %v2454_v29  ;;  %v2756_v13 = vld [vmem:[#allocation7 + $0x40] sm:$0xff] }
 0x7a5   :  { %v1784_v37 = vor.u32 1.1754944e-38, %v1783_v17  ;;  %vm1782_vm5 = vcmp.eq.f32.partialorder %v1781_v21, 8.507059e+37 }
 0x7a6   :  { %v1903_v36 = vsel %vm1902_vm13, %v2623_v44, %v1899_v15  ;;  %v2758_v15 = vld [vmem:[#allocation7 + $0x30] sm:$0xff] }
 0x7a7   :  { %v3708_v5 = vsel %vm1905_vm14, %v1907_v16, %v1903_v36  ;;  %v2759_v16 = vld [vmem:[#allocation7 + $0x38] sm:$0xff]  ;;  %v2760_v36 = vld [vmem:[#allocation7 + $0x20] sm:$0xff] }
 0x7a8   :  { %v1927_v14 = vmul.f32 %v2627_v20, %v3708_v5  ;;  %v2761_v20 = vld [vmem:[#allocation7 + $0x28] sm:$0xff] }
 0x7a9   :  { %v2631_v28 = vpop.eup %2630 }
 0x7aa   :  { %1929 = vrot.lane.b32.xlu0 %v1927_v14, %s2848_s3  ;;  %v1773_v58 = vmul.f32 %v2631_v28, %v1756_v27  ;;  %vm1778_vm15 = vweird.f32 %v2631_v28  ;;  %v2633_v55 = vpop.eup %2632  ;;  %v2763_v14 = vld [vmem:[#allocation7 + $0x18] sm:$0xff] }
 0x7ab   :  { %vm1779_vm4 = vmor %vm1777_vm3, %vm1778_vm15  ;;  %v1894_v11 = vadd.f32 1.0, %v2633_v55 }
 0x7ac   :  { %v1774_v12 = vsub.f32 1.0, %v1773_v58 }
 0x7ae   :  { %v1775_v62 = vmul.f32 %v2631_v28, %v1774_v12 }
 0x7b0   :  { %v1776_v8 = vadd.f32 %v2631_v28, %v1775_v62 }
 0x7b2   :  { %v1780_v0 = vsel %vm1779_vm4, %v2631_v28, %v1776_v8 }
 0x7b3   :  { %v1785_v39 = vsel %vm1782_vm5, %v1784_v37, %v1780_v0 }
 0x7fc   :  { %v1792_v47 = vpop.permute.xlu2 %1791 }
 0x7fd   :  { %v3713_v43 = vadd.f32 %v1792_v47, %v1788_v50 }
 0x7ff   :  { %2634 = vtanh.f32 %v3713_v43 }
 0x800   :  { %2636 = vrcp.f32 %v1894_v11 }
 0x805   :  { %v2635_v25 = vpop.eup %2634 }
 0x806   :  { %v1796_v34 = vmul.f32 %v2635_v25, %v1785_v39  ;;  %v2637_v44 = vpop.eup %2636 }
 0x807   :  { %v1911_v45 = vmul.f32 %v2637_v44, %v1894_v11  ;;  %vm1916_vm1 = vweird.f32 %v2637_v44 }
 0x808   :  { %2457 = vmatmul.msk.f32.vlgmr.msrb.gmra.mxu2 %vm117_vm11, %v1796_v34  ;;  %2458 = vmatmul.msk.f32.vlgmr.msrb.gmra.mxu3 %vm117_vm11, %v1796_v34 }
 0x809   :  { %2220 = vmatpush.msrb.mxu2 %v2744_v41  ;;  %2240 = vmatpush.msrb.mxu3 %v2745_v59 }
 0x80b   :  { %2221 = vmatpush.msrb.mxu2 %v2746_v46  ;;  %2241 = vmatpush.msrb.mxu3 %v2747_v60 }
 0x80d   :  { %2222 = vmatpush.msrb.mxu2 %v2748_v26  ;;  %2242 = vmatpush.msrb.mxu3 %v2749_v19 }
 0x80f   :  { %2223 = vmatpush.msrb.mxu2 %v3505_v61  ;;  %2243 = vmatpush.msrb.mxu3 %v3508_v9  ;;  %v1912_v61 = vsub.f32 1.0, %v1911_v45 }
 0x810   :  { %2464 = vmatmul.msk.f32.vlgmr.msra.gmra.mxu2 %vm166_vm2, %v2116_v63  ;;  %2466 = vmatmul.msk.f32.vlgmr.msra.gmra.mxu3 %vm166_vm2, %v2116_v63  ;;  %vm1915_vm2 = vweird.f32 %v1894_v11 }
 0x811   :  { %2224 = vmatpush.msrb.mxu2 %v3513_v22  ;;  %2244 = vmatpush.msrb.mxu3 %v3516_v31  ;;  %v1913_v9 = vmul.f32 %v2637_v44, %v1912_v61  ;;  %v1926_v22 = vmul.f32 %v3708_v5, %v3645_v38  ;;  %vm1917_vm6 = vmor %vm1915_vm2, %vm1916_vm1  ;;  %v2750_v38 = vld [vmem:[#allocation7 + $0x70] sm:$0xff] }
 0x812   :  { %v2762_v5 = vld [vmem:[#allocation7 + $0x10] sm:$0xff] }
 0x813   :  { %2225 = vmatpush.msrb.mxu2 %v3519_v2  ;;  %2245 = vmatpush.msrb.mxu3 %v3522_v10  ;;  %v1914_v52 = vadd.f32 %v2637_v44, %v1913_v9  ;;  %v1921_v2 = vand.u32 2147483648, %v1894_v11  ;;  %v1919_v10 = vand.u32 2147483647, %v1894_v11 }
 0x815   :  { %2226 = vmatpush.msrb.mxu2 %v3525_v23  ;;  %2246 = vmatpush.msrb.mxu3 %v3528_v54  ;;  %v1918_v23 = vsel %vm1917_vm6, %v2637_v44, %v1914_v52  ;;  %v1922_v54 = vor.u32 1.1754944e-38, %v1921_v2  ;;  %vm1920_vm0 = vcmp.eq.f32.partialorder %v1919_v10, 8.507059e+37 }
 0x817   :  { %2227 = vmatpush.msrb.mxu2 %v3531_v32  ;;  %2247 = vmatpush.msrb.mxu3 %v3534_v18  ;;  %v1923_v18 = vsel %vm1920_vm0, %v1922_v54, %v1918_v23 }
 0x81c   :  { %v1930_v51 = vpop.permute.xlu0 %1929 }
 0x81d   :  { %v3739_v31 = vadd.f32 %v1930_v51, %v1926_v22 }
 0x81f   :  { %2638 = vtanh.f32 %v3739_v31 }
 0x825   :  { %v2639_v32 = vpop.eup %2638 }
 0x826   :  { %v1934_v1 = vmul.f32 %v2639_v32, %v1923_v18 }
 0x828   :  { %2455 = vmatmul.msk.f32.vlgmr.msrb.gmra.mxu0 %vm117_vm11, %v1934_v1  ;;  %2456 = vmatmul.msk.f32.vlgmr.msrb.gmra.mxu1 %vm117_vm11, %v1934_v1 }
 0x829   :  { %2263 = vmatpush.msrb.mxu0 %v2750_v38  ;;  %2283 = vmatpush.msrb.mxu1 %v2751_v33 }
 0x82b   :  { %2264 = vmatpush.msrb.mxu0 %v2752_v30  ;;  %2284 = vmatpush.msrb.mxu1 %v2753_v57 }
 0x82d   :  { %2265 = vmatpush.msrb.mxu0 %v2754_v3  ;;  %2285 = vmatpush.msrb.mxu1 %v2755_v4 }
 0x82f   :  { %2266 = vmatpush.msrb.mxu0 %v2756_v13  ;;  %2286 = vmatpush.msrb.mxu1 %v2757_v56 }
 0x830   :  { %2461 = vmatmul.msk.f32.vlgmr.msra.gmra.mxu0 %vm117_vm11, %v1934_v1  ;;  %2462 = vmatmul.msk.f32.vlgmr.msra.gmra.mxu1 %vm117_vm11, %v1934_v1 }
 0x831   :  { %2267 = vmatpush.msrb.mxu0 %v2758_v15  ;;  %2287 = vmatpush.msrb.mxu1 %v2759_v16 }
 0x833   :  { %2268 = vmatpush.msrb.mxu0 %v2760_v36  ;;  %2288 = vmatpush.msrb.mxu1 %v2761_v20 }
 0x835   :  { %2269 = vmatpush.msrb.mxu0 %v2762_v5  ;;  %2289 = vmatpush.msrb.mxu1 %v2763_v14 }
 0x837   :  { %2270 = vmatpush.msrb.mxu0 %v2764_v6  ;;  %2290 = vmatpush.msrb.mxu1 %v2765_v24 }
 0x88b   :  { %v1998_v27 = vpop.f32.mrf.mxu2  ;;  %v2018_v37 = vpop.f32.mrf.mxu3 }
 0x893   :  { %v2136_v62 = vpop.f32.mrf.mxu2  ;;  %v2156_v41 = vpop.f32.mrf.mxu3 }
 0x8a5   :  { %v1955_v28 = vpop.f32.mrf.mxu0  ;;  %v1975_v21 = vpop.f32.mrf.mxu1 }
 0x8a6   :  { %v1999_v58 = vadd.f32 %v1998_v27, %v1955_v28  ;;  %v2019_v25 = vadd.f32 %v2018_v37, %v1975_v21 }
 0x8a8   :  { %v2021_v12 = vadd.f32 %v1999_v58, %v3854_v7  ;;  %v2022_v34 = vadd.f32 %v2019_v25, %v3856_v49 }
 0x8aa   :  { %v2459_v29 = vmul.f32 -1.442695, %v2021_v12  ;;  %v2460_v30 = vmul.f32 -1.442695, %v2022_v34 }
 0x8ac   :  { %2640 = vpow2.f32 %v2459_v29 }
 0x8ad   :  { %v2090_v50 = vpop.f32.mrf.mxu0  ;;  %v2110_v42 = vpop.f32.mrf.mxu1 }
 0x8ae   :  { %v2137_v47 = vadd.f32 %v2136_v62, %v2090_v50 }
 0x8b0   :  { %v2159_v8 = vadd.f32 %v2137_v47, %v3855_v35  ;;  %v2157_v35 = vadd.f32 %v2156_v41, %v2110_v42 }
 0x8b2   :  { %v2641_v17 = vpop.eup %2640  ;;  %v2467_v55 = vmul.f32 -1.442695, %v2159_v8  ;;  %v2160_v44 = vadd.f32 %v2157_v35, %v3026_v48 }
 0x8b3   :  { %v2029_v0 = vadd.f32 1.0, %v2641_v17 }
 0x8b4   :  { %2642 = vpow2.f32 %v2467_v55  ;;  %v2468_v15 = vmul.f32 -1.442695, %v2160_v44 }
 0x8b5   :  { %2644 = vrcp.f32 %v2029_v0  ;;  %v2042_v46 = vand.u32 2147483648, %v2029_v0  ;;  %v2040_v63 = vand.u32 2147483647, %v2029_v0  ;;  %vm2036_vm8 = vweird.f32 %v2029_v0 }
 0x8b7   :  { %v2043_v45 = vor.u32 1.1754944e-38, %v2042_v46  ;;  %vm2041_vm10 = vcmp.eq.f32.partialorder %v2040_v63, 8.507059e+37 }
 0x8ba   :  { %v2643_v11 = vpop.eup %2642 }
 0x8bb   :  { %v2645_v39 = vpop.eup %2644  ;;  %v2167_v40 = vadd.f32 1.0, %v2643_v11 }
 0x8bc   :  { %v2032_v59 = vmul.f32 %v2645_v39, %v2029_v0  ;;  %vm2037_vm7 = vweird.f32 %v2645_v39 }
 0x8bd   :  { %2646 = vrcp.f32 %v2167_v40  ;;  %vm2038_vm9 = vmor %vm2036_vm8, %vm2037_vm7  ;;  %v2180_v10 = vand.u32 2147483648, %v2167_v40  ;;  %v2178_v54 = vand.u32 2147483647, %v2167_v40  ;;  %vm2174_vm13 = vweird.f32 %v2167_v40 }
 0x8be   :  { %v2033_v53 = vsub.f32 1.0, %v2032_v59  ;;  %2648 = vtanh.f32 %v2022_v34 }
 0x8bf   :  { %2650 = vtanh.f32 %v2160_v44  ;;  %v2181_v48 = vor.u32 1.1754944e-38, %v2180_v10  ;;  %vm2179_vm15 = vcmp.eq.f32.partialorder %v2178_v54, 8.507059e+37 }
 0x8c0   :  { %v2034_v60 = vmul.f32 %v2645_v39, %v2033_v53  ;;  %2652 = vpow2.f32 %v2460_v30 }
 0x8c2   :  { %v2035_v26 = vadd.f32 %v2645_v39, %v2034_v60 }
 0x8c3   :  { %v2647_v19 = vpop.eup %2646 }
 0x8c4   :  { %v2039_v61 = vsel %vm2038_vm9, %v2645_v39, %v2035_v26  ;;  %v2170_v9 = vmul.f32 %v2647_v19, %v2167_v40  ;;  %v2649_v22 = vpop.eup %2648  ;;  %vm2175_vm12 = vweird.f32 %v2647_v19 }
 0x8c5   :  { %v2044_v51 = vsel %vm2041_vm10, %v2043_v45, %v2039_v61  ;;  %vm2176_vm14 = vmor %vm2174_vm13, %vm2175_vm12  ;;  %v2651_v1 = vpop.eup %2650 }
 0x8c6   :  { %v2063_v52 = vmul.f32 %v2649_v22, %v2044_v51  ;;  %v2171_v2 = vsub.f32 1.0, %v2170_v9  ;;  %v2653_v57 = vpop.eup %2652  ;;  %v2062_v36 = vmul.f32 %v2044_v51, %v3713_v43 }
 0x8c7   :  { %v2030_v3 = vadd.f32 1.0, %v2653_v57 }
 0x8c8   :  { %2065 = vrot.lane.b32.xlu2 %v2063_v52, %s2848_s3  ;;  %v2172_v23 = vmul.f32 %v2647_v19, %v2171_v2 }
 0x8c9   :  { %2654 = vrcp.f32 %v2030_v3  ;;  %v2057_v6 = vand.u32 2147483648, %v2030_v3  ;;  %vm2051_vm4 = vweird.f32 %v2030_v3  ;;  %v2055_v24 = vand.u32 2147483647, %v2030_v3 }
 0x8ca   :  { %v2173_v32 = vadd.f32 %v2647_v19, %v2172_v23  ;;  %2656 = vpow2.f32 %v2468_v15 }
 0x8cb   :  { %v2058_v58 = vor.u32 1.1754944e-38, %v2057_v6  ;;  %vm2056_vm1 = vcmp.eq.f32.partialorder %v2055_v24, 8.507059e+37 }
 0x8cc   :  { %v2177_v18 = vsel %vm2176_vm14, %v2647_v19, %v2173_v32 }
 0x8cd   :  { %v2182_v38 = vsel %vm2179_vm15, %v2181_v48, %v2177_v18 }
 0x8ce   :  { %v2201_v33 = vmul.f32 %v2651_v1, %v2182_v38  ;;  %v2200_v21 = vmul.f32 %v2182_v38, %v3739_v31 }
 0x8cf   :  { %v2655_v4 = vpop.eup %2654 }
 0x8d0   :  { %2203 = vrot.lane.b32.xlu1 %v2201_v33, %s2848_s3  ;;  %v2047_v13 = vmul.f32 %v2655_v4, %v2030_v3  ;;  %vm2052_vm3 = vweird.f32 %v2655_v4  ;;  %v2657_v27 = vpop.eup %2656 }
 0x8d1   :  { %vm2053_vm5 = vmor %vm2051_vm4, %vm2052_vm3  ;;  %v2168_v29 = vadd.f32 1.0, %v2657_v27  ;;  %vm2350_vm3 = vcmask 517120   ;;  %vm2359_vm4 = vcmask 1024  }
 0x8d2   :  { %v2048_v56 = vsub.f32 1.0, %v2047_v13 }
 0x8d3   :  { %v2195_v25 = vand.u32 2147483648, %v2168_v29  ;;  %vm2189_vm6 = vweird.f32 %v2168_v29  ;;  %v2193_v11 = vand.u32 2147483647, %v2168_v29 }
 0x8d4   :  { %v2049_v16 = vmul.f32 %v2655_v4, %v2048_v56 }
 0x8d5   :  { %v2196_v34 = vor.u32 1.1754944e-38, %v2195_v25  ;;  %vm2194_vm7 = vcmp.eq.f32.partialorder %v2193_v11, 8.507059e+37 }
 0x8d6   :  { %v2050_v14 = vadd.f32 %v2655_v4, %v2049_v16 }
 0x8d8   :  { %v2054_v28 = vsel %vm2053_vm5, %v2655_v4, %v2050_v14  ;;  %v2482_v14 = vld [vmem:[%s3778_s7] ss:$0 sm:$0xff] }
 0x8d9   :  { %v2059_v62 = vsel %vm2056_vm1, %v2058_v58, %v2054_v28  ;;  %v2483_v58 = vld [vmem:[#allocation2] ss:$0 sm:$0xff] }
 0x922   :  { %v2066_v20 = vpop.permute.xlu2 %2065 }
 0x923   :  { %v3753_v5 = vadd.f32 %v2066_v20, %v2062_v36 }
 0x925   :  { %2658 = vtanh.f32 %v3753_v5 }
 0x926   :  { %2660 = vrcp.f32 %v2168_v29 }
 0x92b   :  { %v2659_v12 = vpop.eup %2658 }
 0x92c   :  { %v2070_v43 = vmul.f32 %v2659_v12, %v2059_v62  ;;  %v2661_v50 = vpop.eup %2660 }
 0x92d   :  { %v2185_v47 = vmul.f32 %v2661_v50, %v2168_v29  ;;  %vm2190_vm2 = vweird.f32 %v2661_v50 }
 0x92e   :  { %2471 = vmatmul.msk.f32.vlgmr.msrb.gmra.mxu0 %vm117_vm11, %v2070_v43  ;;  %2472 = vmatmul.msk.f32.vlgmr.msrb.gmra.mxu1 %vm117_vm11, %v2070_v43  ;;  %vm2191_vm0 = vmor %vm2189_vm6, %vm2190_vm2 }
 0x92f   :  { %v2186_v8 = vsub.f32 1.0, %v2185_v47 }
 0x931   :  { %v2187_v17 = vmul.f32 %v2661_v50, %v2186_v8 }
 0x933   :  { %v2188_v37 = vadd.f32 %v2661_v50, %v2187_v17 }
 0x935   :  { %v2192_v39 = vsel %vm2191_vm0, %v2661_v50, %v2188_v37 }
 0x936   :  { %v2197_v42 = vsel %vm2194_vm7, %v2196_v34, %v2192_v39 }
 0x942   :  { %v2204_v55 = vpop.permute.xlu1 %2203 }
 0x943   :  { %v2206_v0 = vadd.f32 %v2204_v55, %v2200_v21 }
 0x945   :  { %2662 = vtanh.f32 %v2206_v0 }
 0x94b   :  { %v2663_v40 = vpop.eup %2662 }
 0x94c   :  { %v2208_v41 = vmul.f32 %v2663_v40, %v2197_v42 }
 0x94e   :  { %2469 = vmatmul.msk.f32.vlgmr.msrb.gmra.mxu2 %vm117_vm11, %v2208_v41  ;;  %2470 = vmatmul.msk.f32.vlgmr.msrb.gmra.mxu3 %vm117_vm11, %v2208_v41 }
 0x9ab   :  { %v2272_v31 = vpop.f32.mrf.mxu0  ;;  %v2292_v19 = vpop.f32.mrf.mxu1 }
 0x9d1   :  { %v2229_v59 = vpop.f32.mrf.mxu2  ;;  %v2249_v26 = vpop.f32.mrf.mxu3 }
 0x9d2   :  { %v2273_v53 = vadd.f32 %v2272_v31, %v2229_v59  ;;  %v2293_v44 = vadd.f32 %v2292_v19, %v2249_v26 }
 0x9d4   :  { %v2295_v35 = vadd.f32 %v2273_v53, %v3854_v7  ;;  %v2296_v61 = vadd.f32 %v2293_v44, %v3856_v49 }
 0x9d6   :  { %v2473_v46 = vmul.f32 -1.442695, %v2295_v35  ;;  %v2474_v18 = vmul.f32 -1.442695, %v2296_v61 }
 0x9d8   :  { %2664 = vpow2.f32 %v2473_v46 }
 0x9de   :  { %v2665_v60 = vpop.eup %2664 }
 0x9df   :  { %v2303_v63 = vadd.f32 1.0, %v2665_v60 }
 0x9e1   :  { %2666 = vrcp.f32 %v2303_v63  ;;  %v2316_v51 = vand.u32 2147483648, %v2303_v63  ;;  %v2314_v2 = vand.u32 2147483647, %v2303_v63  ;;  %vm2310_vm8 = vweird.f32 %v2303_v63 }
 0x9e2   :  { %2668 = vtanh.f32 %v2296_v61 }
 0x9e3   :  { %v2317_v7 = vor.u32 1.1754944e-38, %v2316_v51  ;;  %vm2315_vm10 = vcmp.eq.f32.partialorder %v2314_v2, 8.507059e+37  ;;  %2670 = vpow2.f32 %v2474_v18 }
 0x9e7   :  { %v2667_v45 = vpop.eup %2666 }
 0x9e8   :  { %v2306_v9 = vmul.f32 %v2667_v45, %v2303_v63  ;;  %vm2311_vm11 = vweird.f32 %v2667_v45  ;;  %v2669_v54 = vpop.eup %2668 }
 0x9e9   :  { %vm2312_vm9 = vmor %vm2310_vm8, %vm2311_vm11  ;;  %v2671_v49 = vpop.eup %2670 }
 0x9ea   :  { %v2307_v22 = vsub.f32 1.0, %v2306_v9  ;;  %v2304_v1 = vadd.f32 1.0, %v2671_v49 }
 0x9ec   :  { %v2308_v52 = vmul.f32 %v2667_v45, %v2307_v22  ;;  %2672 = vrcp.f32 %v2304_v1  ;;  %v2331_v15 = vand.u32 2147483648, %v2304_v1  ;;  %vm2325_vm13 = vweird.f32 %v2304_v1 }
 0x9ed   :  { %v2329_v16 = vand.u32 2147483647, %v2304_v1 }
 0x9ee   :  { %v2309_v10 = vadd.f32 %v2667_v45, %v2308_v52  ;;  %v2332_v20 = vor.u32 1.1754944e-38, %v2331_v15 }
 0x9ef   :  { %vm2330_vm15 = vcmp.eq.f32.partialorder %v2329_v16, 8.507059e+37 }
 0x9f0   :  { %v2313_v23 = vsel %vm2312_vm9, %v2667_v45, %v2309_v10 }
 0x9f1   :  { %v2318_v32 = vsel %vm2315_vm10, %v2317_v7, %v2313_v23 }
 0x9f2   :  { %v2337_v48 = vmul.f32 %v2669_v54, %v2318_v32  ;;  %v2673_v38 = vpop.eup %2672  ;;  %v2336_v3 = vmul.f32 %v2318_v32, %v3753_v5 }
 0x9f3   :  { %v2321_v33 = vmul.f32 %v2673_v38, %v2304_v1  ;;  %vm2326_vm12 = vweird.f32 %v2673_v38 }
 0x9f4   :  { %2339 = vrot.lane.b32.xlu0 %v2337_v48, %s2848_s3  ;;  %vm2327_vm14 = vmor %vm2325_vm13, %vm2326_vm12 }
 0x9f5   :  { %v2322_v30 = vsub.f32 1.0, %v2321_v33 }
 0x9f7   :  { %v2323_v57 = vmul.f32 %v2673_v38, %v2322_v30 }
 0x9f9   :  { %v2324_v56 = vadd.f32 %v2673_v38, %v2323_v57 }
 0x9fb   :  { %v2328_v36 = vsel %vm2327_vm14, %v2673_v38, %v2324_v56 }
 0x9fc   :  { %v2333_v24 = vsel %vm2330_vm15, %v2332_v20, %v2328_v36 }
 0xa66   :  { %v2340_v4 = vpop.permute.xlu0 %2339 }
 0xa67   :  { %v2342_v13 = vadd.f32 %v2340_v4, %v2336_v3 }
 0xa69   :  { %2674 = vtanh.f32 %v2342_v13 }
 0xa6f   :  { %v2675_v6 = vpop.eup %2674 }
 0xa70   :  { %v2344_v27 = vmul.f32 %v2675_v6, %v2333_v24 }
 0xa72   :  { %v2349_v5 = vmul.f32 %v2482_v14, %v2344_v27 }
 0xa74   :  { %v2351_v28 = vsel %vm2350_vm3, %v2349_v5, 0.0 }
 0xa75   :  { %2352 = vadd.xlane.f32.xlu1 %v2351_v28 }
 0xae8   :  { %v2353_v12 = vpop.xlane.xlu1 %2352 }
 0xae9   :  { %v2358_v29 = vadd.f32 %v2483_v58, %v2353_v12 }
 0xaeb   :  { %2360 = vst.msk [vmem:[%s3780_s9] sm:$0x3] %vm2359_vm4, %v2358_v29 }
 0xaec   :  { %2365 = vsyncpa [#allocation4], 1 }
 0xaed   :  { %2366 = vsyncpa [#allocation6], 1 }

</bundles_post_ra>
